<compile_context>
chip_gen: v6e
topology: v6e:2x2x1
jax: 0.10.0
libtpu: 0.0.40
codegen_flags: <defaults>
</compile_context>

<pallas_src>
import functools
import math

import jax
import jax.numpy as jnp
from jax import lax
from jax.experimental import pallas as pl
from jax.experimental.pallas import tpu as pltpu

_INT32_MIN = jnp.iinfo(jnp.int32).min
_INT32_MAX = jnp.iinfo(jnp.int32).max

# VMEM budgeting (conservative across v5e / v6e / v7x):
#   _VMEM_LIMIT   : scoped-VMEM limit handed to Mosaic. Above the 16/32 MiB defaults,
#                   below v7x's 64 MiB physical VMEM, far below v5e/v6e's 128 MiB.
#   _BLOCK_BUDGET : bytes for ONE copy of the pipelined input block; real footprint is
#                   ~2x (double buffering) + ~1x for the int32 key intermediate, which
#                   stays comfortably under _VMEM_LIMIT.
_VMEM_LIMIT = 48 * 1024 * 1024
_BLOCK_BUDGET = 8 * 1024 * 1024

# Reduction lengths up to this use the fully-unrolled stable-rank counting loop;
# longer reductions switch to the 32-step value bisection.
_UNROLL_MAX_N = 32


# --------------------------------- helpers -----------------------------------

def _largest_divisor_leq(m, cap):
    """Largest divisor of m that is <= cap (always >= 1). Trace-time only."""
    cap = max(1, min(int(cap), int(m)))
    for d in range(cap, 0, -1):
        if m % d == 0:
            return d
    return 1


def _monotone_key(x):
    """int32 key with the same ordering as the values of x.

    Floats: sign-magnitude flip of the f32 bit pattern (bf16/f16 widen exactly).
    Ints  : the value itself (exact for <= 32-bit integer dtypes).
    NOTE: NaNs are ordered by bit pattern, not the way torch.median handles them.
    """
    if jnp.issubdtype(x.dtype, jnp.floating):
        bits = pltpu.bitcast(x.astype(jnp.float32), jnp.int32)
        return jnp.where(bits < 0, _INT32_MIN - bits, bits)
    return x.astype(jnp.int32)


def _lower_median_block(x, *, axis):
    """Lower-median value and index along `axis` of a resident 2-D block.

    Returns (values, indices) with keepdims=True along `axis`.
      * n <= _UNROLL_MAX_N : fully-unrolled stable-rank counting (O(n) passes).
      * n >  _UNROLL_MAX_N : 32-step bisection over a monotone int32 key, plus one
                             pass to recover a (first-occurrence) index.
    For repeated values the returned index may differ from torch's pick; the value
    is exact and the index always points at an occurrence of it.
    """
    n = x.shape[axis]
    k = (n - 1) // 2                                   # torch's "lower median" rank
    pos = lax.broadcasted_iota(jnp.int32, x.shape, axis)
    out_shape = tuple(1 if a == axis else s for a, s in enumerate(x.shape))

    if n <= _UNROLL_MAX_N:
        vals = jnp.zeros(out_shape, x.dtype)
        idxs = jnp.zeros(out_shape, jnp.int32)
        for j in range(n):                             # static -> fully unrolled
            xj = lax.slice_in_dim(x, j, j + 1, axis=axis)
            # stable rank of x[j]: #{x_i < x_j} + #{i < j : x_i == x_j}
            below = (x < xj) | ((x == xj) & (pos < j))
            rank = jnp.sum(below, axis=axis, keepdims=True)   # bool-sum -> int32
            hit = rank == k
            vals = jnp.where(hit, xj, vals)
            idxs = jnp.where(hit, j, idxs)
        return vals, idxs

    # 32-step value bisection over the int32 key space (one vectorized count per step).
    key = _monotone_key(x)
    lo = jnp.full(out_shape, _INT32_MIN, jnp.int32)
    hi = jnp.full(out_shape, _INT32_MAX, jnp.int32)

    def body(_, carry):
        lo, hi = carry
        mid = (lo & hi) + ((lo ^ hi) >> 1)             # overflow-free floor((lo+hi)/2)
        cnt = jnp.sum(key <= mid, axis=axis, keepdims=True)
        go_left = cnt >= (k + 1)
        return jnp.where(go_left, lo, mid + 1), jnp.where(go_left, mid, hi)

    key_med, _ = lax.fori_loop(0, 32, body, (lo, hi), unroll=True)

    if jnp.issubdtype(x.dtype, jnp.floating):
        med_bits = jnp.where(key_med < 0, _INT32_MIN - key_med, key_med)
        vals = pltpu.bitcast(med_bits, jnp.float32).astype(x.dtype)
    else:
        vals = key_med.astype(x.dtype)
    hit = key == key_med
    idxs = jnp.min(jnp.where(hit, pos, n), axis=axis, keepdims=True)
    return vals, idxs


# ------------------------------ dim is not None -------------------------------

def _median_sublane_kernel(x_ref, val_ref, idx_ref):
    """Median along the SUBLANE axis of an (n, TC) block; lane-dense (1, TC) outputs."""
    vals, idxs = _lower_median_block(x_ref[...], axis=0)
    val_ref[...] = vals
    idx_ref[...] = idxs


def _median_lane_kernel(x_ref, val_ref, idx_ref):
    """Median along the LANE axis of a (TR, n) block; (TR, 1) outputs."""
    vals, idxs = _lower_median_block(x_ref[...], axis=1)
    val_ref[...] = vals
    idx_ref[...] = idxs


def _median_dim_not_last(x, d):
    """Lower median along axis d (d < ndim-1).

    x.reshape(lead, n, trail) is a FREE reshape (no HBM transpose): the reduced axis n
    rides on sublanes, trail on lanes, lead on the grid.
    """
    shape = x.shape
    lead = math.prod(shape[:d])
    n = shape[d]
    trail = math.prod(shape[d + 1:])
    itemsize = jnp.dtype(x.dtype).itemsize

    x3 = x.reshape(lead, n, trail)
    trail_pad = pl.cdiv(trail, 128) * 128              # pad only to lane alignment
    if trail_pad != trail:
        x3 = jnp.pad(x3, ((0, 0), (0, 0), (0, trail_pad - trail)))

    # Lane tile: multiple of 128 dividing trail_pad (no extra padding), capped by the
    # double-buffered VMEM budget; force >=2 total grid steps when possible (v7x
    # megacore), which is a no-op cost on v5e/v6e.
    m = trail_pad // 128
    cap_units = max(1, _BLOCK_BUDGET // (n * 128 * itemsize))
    if lead == 1 and m >= 2:
        cap_units = min(cap_units, m // 2)
    tile_cols = _largest_divisor_leq(m, cap_units) * 128
    grid = (lead, trail_pad // tile_cols)
    # TODO(synk): for extremely long reduction axes (n*128*itemsize > budget) the block
    #             exceeds the nominal budget; a two-level (tiled-n) variant would be needed.

    vals, idxs = pl.pallas_call(
        _median_sublane_kernel,
        out_shape=(jax.ShapeDtypeStruct((lead, 1, trail_pad), x.dtype),
                   jax.ShapeDtypeStruct((lead, 1, trail_pad), jnp.int32)),
        grid=grid,
        in_specs=[pl.BlockSpec((None, n, tile_cols), lambda i, j: (i, 0, j))],
        out_specs=(pl.BlockSpec((None, 1, tile_cols), lambda i, j: (i, 0, j)),
                   pl.BlockSpec((None, 1, tile_cols), lambda i, j: (i, 0, j))),
        compiler_params=pltpu.CompilerParams(
            dimension_semantics=("parallel", "parallel"),
            vmem_limit_bytes=_VMEM_LIMIT),
    )(x3)
    return vals[:, 0, :trail], idxs[:, 0, :trail]      # (lead, trail)


def _median_dim_last(x):
    """Lower median along the LAST axis.

    Natural layout, no transpose: rows on sublanes, the reduced axis n on lanes;
    reductions go to the XLU (lane sums/mins), which has plenty of slack here.
    """
    n = x.shape[-1]
    lead = x.size // n
    itemsize = jnp.dtype(x.dtype).itemsize

    x2 = x.reshape(lead, n)
    lead_pad = pl.cdiv(lead, 8) * 8                    # pad only to sublane alignment
    if lead_pad != lead:
        x2 = jnp.pad(x2, ((0, lead_pad - lead), (0, 0)))

    m = lead_pad // 8
    cap_units = max(1, _BLOCK_BUDGET // (n * 8 * itemsize))
    if m >= 2:
        cap_units = min(cap_units, m // 2)             # >=2 grid steps -> v7x megacore
    tile_rows = _largest_divisor_leq(m, cap_units) * 8
    grid = (lead_pad // tile_rows,)

    vals, idxs = pl.pallas_call(
        _median_lane_kernel,
        out_shape=(jax.ShapeDtypeStruct((lead_pad, 1), x.dtype),
                   jax.ShapeDtypeStruct((lead_pad, 1), jnp.int32)),
        grid=grid,
        in_specs=[pl.BlockSpec((tile_rows, n), lambda i: (i, 0))],
        out_specs=(pl.BlockSpec((tile_rows, 1), lambda i: (i, 0)),
                   pl.BlockSpec((tile_rows, 1), lambda i: (i, 0))),
        compiler_params=pltpu.CompilerParams(
            dimension_semantics=("parallel",),
            vmem_limit_bytes=_VMEM_LIMIT),
    )(x2)
    return vals[:lead, 0], idxs[:lead, 0]              # (lead,)


# -------------------------------- dim is None ---------------------------------

def _global_median_resident_kernel(x_ref, out_ref, *, k):
    """k-th smallest key of a fully-resident (rows, 128) block via 32-step bisection."""
    key = _monotone_key(x_ref[...])
    lo = jnp.full((1, 1), _INT32_MIN, jnp.int32)
    hi = jnp.full((1, 1), _INT32_MAX, jnp.int32)

    def body(_, carry):
        lo, hi = carry
        mid = (lo & hi) + ((lo ^ hi) >> 1)
        le = key <= mid
        cnt = jnp.sum(jnp.sum(le, axis=0, keepdims=True), axis=1, keepdims=True)
        go_left = cnt >= (k + 1)
        return jnp.where(go_left, lo, mid + 1), jnp.where(go_left, mid, hi)

    lo, _ = lax.fori_loop(0, 32, body, (lo, hi), unroll=True)
    out_ref[...] = lo


def _global_median_streamed_kernel(x_ref, out_ref, lo_ref, hi_ref, cnt_ref, *, k):
    """Grid-tiled bisection: grid = (32 bisection steps, row tiles).

    Only one row tile is resident at a time (auto-pipelined by BlockSpec), so there is
    no VMEM ceiling on the input size; lo/hi/count are carried in VMEM scratch.
    """
    step = pl.program_id(0)
    t = pl.program_id(1)
    last_t = pl.num_programs(1) - 1

    @pl.when((step == 0) & (t == 0))
    def _():
        lo_ref[...] = jnp.full((1, 1), _INT32_MIN, jnp.int32)
        hi_ref[...] = jnp.full((1, 1), _INT32_MAX, jnp.int32)
        cnt_ref[...] = jnp.zeros((1, 1), jnp.int32)

    lo = lo_ref[...]
    hi = hi_ref[...]
    mid = (lo & hi) + ((lo ^ hi) >> 1)
    le = _monotone_key(x_ref[...]) <= mid
    cnt_ref[...] += jnp.sum(jnp.sum(le, axis=0, keepdims=True), axis=1, keepdims=True)

    @pl.when(t == last_t)
    def _():
        go_left = cnt_ref[...] >= (k + 1)
        lo_ref[...] = jnp.where(go_left, lo, mid + 1)
        hi_ref[...] = jnp.where(go_left, mid, hi)
        cnt_ref[...] = jnp.zeros((1, 1), jnp.int32)

    @pl.when((step == pl.num_programs(0) - 1) & (t == last_t))
    def _():
        out_ref[...] = lo_ref[...]


def _global_median(x, *, force_streamed=False):
    """Global (lower) median of all elements (torch.median with dim=None)."""
    orig_dtype = x.dtype
    flat = x.reshape(-1)                               # native dtype, no upcast copy
    total = flat.shape[0]
    k = (total - 1) // 2
    itemsize = jnp.dtype(orig_dtype).itemsize
    lanes = 128

    rows = pl.cdiv(total, lanes)
    resident = (rows * lanes * itemsize <= _BLOCK_BUDGET) and not force_streamed
    if not resident:
        rows = pl.cdiv(rows, 8) * 8                    # row tiles need a multiple of 8
    padded = rows * lanes
    if padded != total:
        # Pad with the dtype's maximum so padding can never become the k-th smallest.
        pad_val = (jnp.inf if jnp.issubdtype(orig_dtype, jnp.floating)
                   else jnp.iinfo(orig_dtype).max)
        flat = jnp.pad(flat, (0, padded - total), constant_values=pad_val)
    x2 = flat.reshape(rows, lanes)

    if resident:
        key_out = pl.pallas_call(
            functools.partial(_global_median_resident_kernel, k=k),
            out_shape=jax.ShapeDtypeStruct((1, 1), jnp.int32),
            grid=(1,),
            in_specs=[pl.BlockSpec((rows, lanes), lambda i: (0, 0))],
            out_specs=pl.BlockSpec((1, 1), lambda i: (0, 0)),
            compiler_params=pltpu.CompilerParams(vmem_limit_bytes=_VMEM_LIMIT),
        )(x2)
    else:
        m = rows // 8
        cap_units = max(1, _BLOCK_BUDGET // (8 * lanes * itemsize))
        tile_rows = _largest_divisor_leq(m, cap_units) * 8
        key_out = pl.pallas_call(
            functools.partial(_global_median_streamed_kernel, k=k),
            out_shape=jax.ShapeDtypeStruct((1, 1), jnp.int32),
            grid=(32, rows // tile_rows),
            in_specs=[pl.BlockSpec((tile_rows, lanes), lambda s, t: (t, 0))],
            out_specs=pl.BlockSpec((1, 1), lambda s, t: (0, 0)),
            scratch_shapes=[pltpu.VMEM((1, 1), jnp.int32)] * 3,
            compiler_params=pltpu.CompilerParams(
                dimension_semantics=("arbitrary", "arbitrary"),
                vmem_limit_bytes=_VMEM_LIMIT),
        )(x2)

    key_med = key_out[0, 0]
    if jnp.issubdtype(orig_dtype, jnp.floating):
        bits = jnp.where(key_med < 0, _INT32_MIN - key_med, key_med).astype(jnp.int32)
        return lax.bitcast_convert_type(bits, jnp.float32).astype(orig_dtype)
    return key_med.astype(orig_dtype)


# ---------------------------------- forward -----------------------------------

def median_model_forward(x, dim=None, keepdim=False):
    """JAX/Pallas equivalent of MedianModel.forward (torch.median).

    dim is None : global (lower) median -> 0-d array.
    dim is int  : (values, indices) along dim; lower median for even lengths.
    NOTE: indices are int32 (torch returns int64; same values).
    """
    if dim is None:
        return _global_median(x)

    d = dim % x.ndim
    out_shape = x.shape[:d] + x.shape[d + 1:]
    if d == x.ndim - 1:
        v, i = _median_dim_last(x)
    else:
        v, i = _median_dim_not_last(x, d)
    v = v.reshape(out_shape)
    i = i.reshape(out_shape)
    if keepdim:
        v = jnp.expand_dims(v, d)
        i = jnp.expand_dims(i, d)
    return v, i


if __name__ == "__main__":
    rng = jax.random.PRNGKey(0)
    x = jax.random.normal(rng, (2, 4, 16, 16), dtype=jnp.float32)

    # Case 1: dim=-1 (last axis), keepdim=False -> (values, indices); lane-axis kernel.
    values, indices = median_model_forward(x, dim=-1, keepdim=False)
    jax.block_until_ready((values, indices))
    n = x.shape[-1]
    ref_vals = jnp.sort(x, axis=-1)[..., (n - 1) // 2]
    assert values.shape == ref_vals.shape and indices.shape == ref_vals.shape
    assert jnp.array_equal(values, ref_vals), "dim=-1 median values mismatch"
    gathered = jnp.take_along_axis(x, indices[..., None], axis=-1)[..., 0]
    assert jnp.array_equal(gathered, values), "dim=-1 indices mismatch"

    # Case 2: dim=None (default MedianModel()) -> global scalar median (resident kernel).
    g = median_model_forward(x)
    jax.block_until_ready(g)
    ref_g = jnp.sort(x.reshape(-1))[(x.size - 1) // 2]
    assert g.shape == () and jnp.array_equal(g, ref_g), "global median mismatch"

    # Case 2b: exercise the streamed (grid-tiled bisection) global path on the same data.
    g_s = _global_median(x, force_streamed=True)
    jax.block_until_ready(g_s)
    assert jnp.array_equal(g_s, ref_g), "streamed global median mismatch"

    # Case 3: dim=1 (channel axis), keepdim=True; sublane-axis kernel, no transpose.
    v2, i2 = median_model_forward(x, dim=1, keepdim=True)
    jax.block_until_ready((v2, i2))
    assert v2.shape == (2, 1, 16, 16) and i2.shape == (2, 1, 16, 16)
    n1 = x.shape[1]
    ref_v2 = jnp.sort(x, axis=1)[:, (n1 - 1) // 2][:, None]
    assert jnp.array_equal(v2, ref_v2), "dim=1 median values mismatch"
    assert jnp.array_equal(jnp.take_along_axis(x, i2, axis=1), v2), "dim=1 indices mismatch"

    # Case 4: long reduction axes -> exercises the 32-step bisection in both kernels.
    y = jax.random.normal(jax.random.PRNGKey(1), (4, 96, 256), dtype=jnp.float32)
    v4, i4 = median_model_forward(y, dim=1)
    jax.block_until_ready((v4, i4))
    ref_v4 = jnp.sort(y, axis=1)[:, (96 - 1) // 2, :]
    assert jnp.array_equal(v4, ref_v4), "dim=1 (n=96) median values mismatch"
    g4 = jnp.take_along_axis(y, i4[:, None, :], axis=1)[:, 0, :]
    assert jnp.array_equal(g4, v4), "dim=1 (n=96) indices mismatch"

    v5, i5 = median_model_forward(y, dim=-1)
    jax.block_until_ready((v5, i5))
    ref_v5 = jnp.sort(y, axis=-1)[..., (256 - 1) // 2]
    assert jnp.array_equal(v5, ref_v5), "dim=-1 (n=256) median values mismatch"
    g5 = jnp.take_along_axis(y, i5[..., None], axis=-1)[..., 0]
    assert jnp.array_equal(g5, v5), "dim=-1 (n=256) indices mismatch"

    # Case 5: bf16 stays bf16 through the kernel (no wrapper-side f32 upcast).
    xb = x.astype(jnp.bfloat16)
    vb, ib = median_model_forward(xb, dim=2)
    jax.block_until_ready((vb, ib))
    ref_vb = jnp.sort(xb, axis=2)[:, :, (16 - 1) // 2, :]
    assert vb.dtype == jnp.bfloat16 and jnp.array_equal(vb, ref_vb), "bf16 median values mismatch"
    gb = jnp.take_along_axis(xb, ib[:, :, None, :], axis=2)[:, :, 0, :]
    assert jnp.array_equal(gb, vb), "bf16 indices mismatch"

    print("KERNEL_OK")
</pallas_src>

<mosaic_0001>
module attributes {stable_mosaic.version = 11 : i64} {
  func.func @_median_lane_kernel(%arg0: i32, %arg1: memref<64x16xf32, #tpu.memory_space<vmem>>, %arg2: memref<64x1xf32, #tpu.memory_space<vmem>>, %arg3: memref<64x1xi32, #tpu.memory_space<vmem>>) attributes {dimension_semantics = [#tpu.dimension_semantics<parallel>], iteration_bounds = array<i64: 2>, scalar_prefetch = 0 : i64, scratch_operands = 0 : i64, tpu.core_type = #tpu.core_type<tc>, window_params = [{transform_indices = @transform_0, window_bounds = array<i64: 64, 16>}, {transform_indices = @transform_1, window_bounds = array<i64: 64, 1>}, {transform_indices = @transform_2, window_bounds = array<i64: 64, 1>}]} {
    %c0 = arith.constant 0 : index
    %c0_0 = arith.constant 0 : index
    %0 = vector.load %arg1[%c0, %c0_0] : memref<64x16xf32, #tpu.memory_space<vmem>>, vector<64x16xf32>
    %1 = tpu.iota {dimensions = array<i32: 1>} : vector<64x16xi32>
    %cst = arith.constant 0.000000e+00 : f32
    %2 = vector.broadcast %cst : f32 to vector<64x1xf32>
    %c0_i32 = arith.constant 0 : i32
    %3 = vector.broadcast %c0_i32 : i32 to vector<64x1xi32>
    %4 = vector.extract_strided_slice %0 {offsets = [0, 0], sizes = [64, 1], strides = [1, 1]} : vector<64x16xf32> to vector<64x1xf32>
    %5 = vector.broadcast %4 : vector<64x1xf32> to vector<64x16xf32>
    %6 = arith.cmpf olt, %0, %5 : vector<64x16xf32>
    %7 = vector.broadcast %4 : vector<64x1xf32> to vector<64x16xf32>
    %8 = arith.cmpf oeq, %0, %7 : vector<64x16xf32>
    %c0_i32_1 = arith.constant 0 : i32
    %9 = vector.broadcast %c0_i32_1 : i32 to vector<64x16xi32>
    %10 = arith.cmpi slt, %1, %9 : vector<64x16xi32>
    %11 = arith.andi %8, %10 : vector<64x16xi1>
    %12 = arith.ori %6, %11 : vector<64x16xi1>
    %13 = arith.extui %12 : vector<64x16xi1> to vector<64x16xi32>
    %cst_2 = arith.constant dense<0> : vector<64xi32>
    %14 = vector.multi_reduction <add>, %13, %cst_2 [1] : vector<64x16xi32> to vector<64xi32>
    %15 = vector.shape_cast %14 : vector<64xi32> to vector<64x1xi32>
    %c7_i32 = arith.constant 7 : i32
    %16 = vector.broadcast %c7_i32 : i32 to vector<64x1xi32>
    %17 = arith.cmpi eq, %15, %16 : vector<64x1xi32>
    %18 = arith.select %17, %4, %2 : vector<64x1xi1>, vector<64x1xf32>
    %c0_i32_3 = arith.constant 0 : i32
    %19 = vector.broadcast %c0_i32_3 : i32 to vector<64x1xi32>
    %20 = arith.select %17, %19, %3 : vector<64x1xi1>, vector<64x1xi32>
    %21 = vector.extract_strided_slice %0 {offsets = [0, 1], sizes = [64, 1], strides = [1, 1]} : vector<64x16xf32> to vector<64x1xf32>
    %22 = vector.broadcast %21 : vector<64x1xf32> to vector<64x16xf32>
    %23 = arith.cmpf olt, %0, %22 : vector<64x16xf32>
    %24 = vector.broadcast %21 : vector<64x1xf32> to vector<64x16xf32>
    %25 = arith.cmpf oeq, %0, %24 : vector<64x16xf32>
    %c1_i32 = arith.constant 1 : i32
    %26 = vector.broadcast %c1_i32 : i32 to vector<64x16xi32>
    %27 = arith.cmpi slt, %1, %26 : vector<64x16xi32>
    %28 = arith.andi %25, %27 : vector<64x16xi1>
    %29 = arith.ori %23, %28 : vector<64x16xi1>
    %30 = arith.extui %29 : vector<64x16xi1> to vector<64x16xi32>
    %cst_4 = arith.constant dense<0> : vector<64xi32>
    %31 = vector.multi_reduction <add>, %30, %cst_4 [1] : vector<64x16xi32> to vector<64xi32>
    %32 = vector.shape_cast %31 : vector<64xi32> to vector<64x1xi32>
    %c7_i32_5 = arith.constant 7 : i32
    %33 = vector.broadcast %c7_i32_5 : i32 to vector<64x1xi32>
    %34 = arith.cmpi eq, %32, %33 : vector<64x1xi32>
    %35 = arith.select %34, %21, %18 : vector<64x1xi1>, vector<64x1xf32>
    %c1_i32_6 = arith.constant 1 : i32
    %36 = vector.broadcast %c1_i32_6 : i32 to vector<64x1xi32>
    %37 = arith.select %34, %36, %20 : vector<64x1xi1>, vector<64x1xi32>
    %38 = vector.extract_strided_slice %0 {offsets = [0, 2], sizes = [64, 1], strides = [1, 1]} : vector<64x16xf32> to vector<64x1xf32>
    %39 = vector.broadcast %38 : vector<64x1xf32> to vector<64x16xf32>
    %40 = arith.cmpf olt, %0, %39 : vector<64x16xf32>
    %41 = vector.broadcast %38 : vector<64x1xf32> to vector<64x16xf32>
    %42 = arith.cmpf oeq, %0, %41 : vector<64x16xf32>
    %c2_i32 = arith.constant 2 : i32
    %43 = vector.broadcast %c2_i32 : i32 to vector<64x16xi32>
    %44 = arith.cmpi slt, %1, %43 : vector<64x16xi32>
    %45 = arith.andi %42, %44 : vector<64x16xi1>
    %46 = arith.ori %40, %45 : vector<64x16xi1>
    %47 = arith.extui %46 : vector<64x16xi1> to vector<64x16xi32>
    %cst_7 = arith.constant dense<0> : vector<64xi32>
    %48 = vector.multi_reduction <add>, %47, %cst_7 [1] : vector<64x16xi32> to vector<64xi32>
    %49 = vector.shape_cast %48 : vector<64xi32> to vector<64x1xi32>
    %c7_i32_8 = arith.constant 7 : i32
    %50 = vector.broadcast %c7_i32_8 : i32 to vector<64x1xi32>
    %51 = arith.cmpi eq, %49, %50 : vector<64x1xi32>
    %52 = arith.select %51, %38, %35 : vector<64x1xi1>, vector<64x1xf32>
    %c2_i32_9 = arith.constant 2 : i32
    %53 = vector.broadcast %c2_i32_9 : i32 to vector<64x1xi32>
    %54 = arith.select %51, %53, %37 : vector<64x1xi1>, vector<64x1xi32>
    %55 = vector.extract_strided_slice %0 {offsets = [0, 3], sizes = [64, 1], strides = [1, 1]} : vector<64x16xf32> to vector<64x1xf32>
    %56 = vector.broadcast %55 : vector<64x1xf32> to vector<64x16xf32>
    %57 = arith.cmpf olt, %0, %56 : vector<64x16xf32>
    %58 = vector.broadcast %55 : vector<64x1xf32> to vector<64x16xf32>
    %59 = arith.cmpf oeq, %0, %58 : vector<64x16xf32>
    %c3_i32 = arith.constant 3 : i32
    %60 = vector.broadcast %c3_i32 : i32 to vector<64x16xi32>
    %61 = arith.cmpi slt, %1, %60 : vector<64x16xi32>
    %62 = arith.andi %59, %61 : vector<64x16xi1>
    %63 = arith.ori %57, %62 : vector<64x16xi1>
    %64 = arith.extui %63 : vector<64x16xi1> to vector<64x16xi32>
    %cst_10 = arith.constant dense<0> : vector<64xi32>
    %65 = vector.multi_reduction <add>, %64, %cst_10 [1] : vector<64x16xi32> to vector<64xi32>
    %66 = vector.shape_cast %65 : vector<64xi32> to vector<64x1xi32>
    %c7_i32_11 = arith.constant 7 : i32
    %67 = vector.broadcast %c7_i32_11 : i32 to vector<64x1xi32>
    %68 = arith.cmpi eq, %66, %67 : vector<64x1xi32>
    %69 = arith.select %68, %55, %52 : vector<64x1xi1>, vector<64x1xf32>
    %c3_i32_12 = arith.constant 3 : i32
    %70 = vector.broadcast %c3_i32_12 : i32 to vector<64x1xi32>
    %71 = arith.select %68, %70, %54 : vector<64x1xi1>, vector<64x1xi32>
    %72 = vector.extract_strided_slice %0 {offsets = [0, 4], sizes = [64, 1], strides = [1, 1]} : vector<64x16xf32> to vector<64x1xf32>
    %73 = vector.broadcast %72 : vector<64x1xf32> to vector<64x16xf32>
    %74 = arith.cmpf olt, %0, %73 : vector<64x16xf32>
    %75 = vector.broadcast %72 : vector<64x1xf32> to vector<64x16xf32>
    %76 = arith.cmpf oeq, %0, %75 : vector<64x16xf32>
    %c4_i32 = arith.constant 4 : i32
    %77 = vector.broadcast %c4_i32 : i32 to vector<64x16xi32>
    %78 = arith.cmpi slt, %1, %77 : vector<64x16xi32>
    %79 = arith.andi %76, %78 : vector<64x16xi1>
    %80 = arith.ori %74, %79 : vector<64x16xi1>
    %81 = arith.extui %80 : vector<64x16xi1> to vector<64x16xi32>
    %cst_13 = arith.constant dense<0> : vector<64xi32>
    %82 = vector.multi_reduction <add>, %81, %cst_13 [1] : vector<64x16xi32> to vector<64xi32>
    %83 = vector.shape_cast %82 : vector<64xi32> to vector<64x1xi32>
    %c7_i32_14 = arith.constant 7 : i32
    %84 = vector.broadcast %c7_i32_14 : i32 to vector<64x1xi32>
    %85 = arith.cmpi eq, %83, %84 : vector<64x1xi32>
    %86 = arith.select %85, %72, %69 : vector<64x1xi1>, vector<64x1xf32>
    %c4_i32_15 = arith.constant 4 : i32
    %87 = vector.broadcast %c4_i32_15 : i32 to vector<64x1xi32>
    %88 = arith.select %85, %87, %71 : vector<64x1xi1>, vector<64x1xi32>
    %89 = vector.extract_strided_slice %0 {offsets = [0, 5], sizes = [64, 1], strides = [1, 1]} : vector<64x16xf32> to vector<64x1xf32>
    %90 = vector.broadcast %89 : vector<64x1xf32> to vector<64x16xf32>
    %91 = arith.cmpf olt, %0, %90 : vector<64x16xf32>
    %92 = vector.broadcast %89 : vector<64x1xf32> to vector<64x16xf32>
    %93 = arith.cmpf oeq, %0, %92 : vector<64x16xf32>
    %c5_i32 = arith.constant 5 : i32
    %94 = vector.broadcast %c5_i32 : i32 to vector<64x16xi32>
    %95 = arith.cmpi slt, %1, %94 : vector<64x16xi32>
    %96 = arith.andi %93, %95 : vector<64x16xi1>
    %97 = arith.ori %91, %96 : vector<64x16xi1>
    %98 = arith.extui %97 : vector<64x16xi1> to vector<64x16xi32>
    %cst_16 = arith.constant dense<0> : vector<64xi32>
    %99 = vector.multi_reduction <add>, %98, %cst_16 [1] : vector<64x16xi32> to vector<64xi32>
    %100 = vector.shape_cast %99 : vector<64xi32> to vector<64x1xi32>
    %c7_i32_17 = arith.constant 7 : i32
    %101 = vector.broadcast %c7_i32_17 : i32 to vector<64x1xi32>
    %102 = arith.cmpi eq, %100, %101 : vector<64x1xi32>
    %103 = arith.select %102, %89, %86 : vector<64x1xi1>, vector<64x1xf32>
    %c5_i32_18 = arith.constant 5 : i32
    %104 = vector.broadcast %c5_i32_18 : i32 to vector<64x1xi32>
    %105 = arith.select %102, %104, %88 : vector<64x1xi1>, vector<64x1xi32>
    %106 = vector.extract_strided_slice %0 {offsets = [0, 6], sizes = [64, 1], strides = [1, 1]} : vector<64x16xf32> to vector<64x1xf32>
    %107 = vector.broadcast %106 : vector<64x1xf32> to vector<64x16xf32>
    %108 = arith.cmpf olt, %0, %107 : vector<64x16xf32>
    %109 = vector.broadcast %106 : vector<64x1xf32> to vector<64x16xf32>
    %110 = arith.cmpf oeq, %0, %109 : vector<64x16xf32>
    %c6_i32 = arith.constant 6 : i32
    %111 = vector.broadcast %c6_i32 : i32 to vector<64x16xi32>
    %112 = arith.cmpi slt, %1, %111 : vector<64x16xi32>
    %113 = arith.andi %110, %112 : vector<64x16xi1>
    %114 = arith.ori %108, %113 : vector<64x16xi1>
    %115 = arith.extui %114 : vector<64x16xi1> to vector<64x16xi32>
    %cst_19 = arith.constant dense<0> : vector<64xi32>
    %116 = vector.multi_reduction <add>, %115, %cst_19 [1] : vector<64x16xi32> to vector<64xi32>
    %117 = vector.shape_cast %116 : vector<64xi32> to vector<64x1xi32>
    %c7_i32_20 = arith.constant 7 : i32
    %118 = vector.broadcast %c7_i32_20 : i32 to vector<64x1xi32>
    %119 = arith.cmpi eq, %117, %118 : vector<64x1xi32>
    %120 = arith.select %119, %106, %103 : vector<64x1xi1>, vector<64x1xf32>
    %c6_i32_21 = arith.constant 6 : i32
    %121 = vector.broadcast %c6_i32_21 : i32 to vector<64x1xi32>
    %122 = arith.select %119, %121, %105 : vector<64x1xi1>, vector<64x1xi32>
    %123 = vector.extract_strided_slice %0 {offsets = [0, 7], sizes = [64, 1], strides = [1, 1]} : vector<64x16xf32> to vector<64x1xf32>
    %124 = vector.broadcast %123 : vector<64x1xf32> to vector<64x16xf32>
    %125 = arith.cmpf olt, %0, %124 : vector<64x16xf32>
    %126 = vector.broadcast %123 : vector<64x1xf32> to vector<64x16xf32>
    %127 = arith.cmpf oeq, %0, %126 : vector<64x16xf32>
    %c7_i32_22 = arith.constant 7 : i32
    %128 = vector.broadcast %c7_i32_22 : i32 to vector<64x16xi32>
    %129 = arith.cmpi slt, %1, %128 : vector<64x16xi32>
    %130 = arith.andi %127, %129 : vector<64x16xi1>
    %131 = arith.ori %125, %130 : vector<64x16xi1>
    %132 = arith.extui %131 : vector<64x16xi1> to vector<64x16xi32>
    %cst_23 = arith.constant dense<0> : vector<64xi32>
    %133 = vector.multi_reduction <add>, %132, %cst_23 [1] : vector<64x16xi32> to vector<64xi32>
    %134 = vector.shape_cast %133 : vector<64xi32> to vector<64x1xi32>
    %c7_i32_24 = arith.constant 7 : i32
    %135 = vector.broadcast %c7_i32_24 : i32 to vector<64x1xi32>
    %136 = arith.cmpi eq, %134, %135 : vector<64x1xi32>
    %137 = arith.select %136, %123, %120 : vector<64x1xi1>, vector<64x1xf32>
    %c7_i32_25 = arith.constant 7 : i32
    %138 = vector.broadcast %c7_i32_25 : i32 to vector<64x1xi32>
    %139 = arith.select %136, %138, %122 : vector<64x1xi1>, vector<64x1xi32>
    %140 = vector.extract_strided_slice %0 {offsets = [0, 8], sizes = [64, 1], strides = [1, 1]} : vector<64x16xf32> to vector<64x1xf32>
    %141 = vector.broadcast %140 : vector<64x1xf32> to vector<64x16xf32>
    %142 = arith.cmpf olt, %0, %141 : vector<64x16xf32>
    %143 = vector.broadcast %140 : vector<64x1xf32> to vector<64x16xf32>
    %144 = arith.cmpf oeq, %0, %143 : vector<64x16xf32>
    %c8_i32 = arith.constant 8 : i32
    %145 = vector.broadcast %c8_i32 : i32 to vector<64x16xi32>
    %146 = arith.cmpi slt, %1, %145 : vector<64x16xi32>
    %147 = arith.andi %144, %146 : vector<64x16xi1>
    %148 = arith.ori %142, %147 : vector<64x16xi1>
    %149 = arith.extui %148 : vector<64x16xi1> to vector<64x16xi32>
    %cst_26 = arith.constant dense<0> : vector<64xi32>
    %150 = vector.multi_reduction <add>, %149, %cst_26 [1] : vector<64x16xi32> to vector<64xi32>
    %151 = vector.shape_cast %150 : vector<64xi32> to vector<64x1xi32>
    %c7_i32_27 = arith.constant 7 : i32
    %152 = vector.broadcast %c7_i32_27 : i32 to vector<64x1xi32>
    %153 = arith.cmpi eq, %151, %152 : vector<64x1xi32>
    %154 = arith.select %153, %140, %137 : vector<64x1xi1>, vector<64x1xf32>
    %c8_i32_28 = arith.constant 8 : i32
    %155 = vector.broadcast %c8_i32_28 : i32 to vector<64x1xi32>
    %156 = arith.select %153, %155, %139 : vector<64x1xi1>, vector<64x1xi32>
    %157 = vector.extract_strided_slice %0 {offsets = [0, 9], sizes = [64, 1], strides = [1, 1]} : vector<64x16xf32> to vector<64x1xf32>
    %158 = vector.broadcast %157 : vector<64x1xf32> to vector<64x16xf32>
    %159 = arith.cmpf olt, %0, %158 : vector<64x16xf32>
    %160 = vector.broadcast %157 : vector<64x1xf32> to vector<64x16xf32>
    %161 = arith.cmpf oeq, %0, %160 : vector<64x16xf32>
    %c9_i32 = arith.constant 9 : i32
    %162 = vector.broadcast %c9_i32 : i32 to vector<64x16xi32>
    %163 = arith.cmpi slt, %1, %162 : vector<64x16xi32>
    %164 = arith.andi %161, %163 : vector<64x16xi1>
    %165 = arith.ori %159, %164 : vector<64x16xi1>
    %166 = arith.extui %165 : vector<64x16xi1> to vector<64x16xi32>
    %cst_29 = arith.constant dense<0> : vector<64xi32>
    %167 = vector.multi_reduction <add>, %166, %cst_29 [1] : vector<64x16xi32> to vector<64xi32>
    %168 = vector.shape_cast %167 : vector<64xi32> to vector<64x1xi32>
    %c7_i32_30 = arith.constant 7 : i32
    %169 = vector.broadcast %c7_i32_30 : i32 to vector<64x1xi32>
    %170 = arith.cmpi eq, %168, %169 : vector<64x1xi32>
    %171 = arith.select %170, %157, %154 : vector<64x1xi1>, vector<64x1xf32>
    %c9_i32_31 = arith.constant 9 : i32
    %172 = vector.broadcast %c9_i32_31 : i32 to vector<64x1xi32>
    %173 = arith.select %170, %172, %156 : vector<64x1xi1>, vector<64x1xi32>
    %174 = vector.extract_strided_slice %0 {offsets = [0, 10], sizes = [64, 1], strides = [1, 1]} : vector<64x16xf32> to vector<64x1xf32>
    %175 = vector.broadcast %174 : vector<64x1xf32> to vector<64x16xf32>
    %176 = arith.cmpf olt, %0, %175 : vector<64x16xf32>
    %177 = vector.broadcast %174 : vector<64x1xf32> to vector<64x16xf32>
    %178 = arith.cmpf oeq, %0, %177 : vector<64x16xf32>
    %c10_i32 = arith.constant 10 : i32
    %179 = vector.broadcast %c10_i32 : i32 to vector<64x16xi32>
    %180 = arith.cmpi slt, %1, %179 : vector<64x16xi32>
    %181 = arith.andi %178, %180 : vector<64x16xi1>
    %182 = arith.ori %176, %181 : vector<64x16xi1>
    %183 = arith.extui %182 : vector<64x16xi1> to vector<64x16xi32>
    %cst_32 = arith.constant dense<0> : vector<64xi32>
    %184 = vector.multi_reduction <add>, %183, %cst_32 [1] : vector<64x16xi32> to vector<64xi32>
    %185 = vector.shape_cast %184 : vector<64xi32> to vector<64x1xi32>
    %c7_i32_33 = arith.constant 7 : i32
    %186 = vector.broadcast %c7_i32_33 : i32 to vector<64x1xi32>
    %187 = arith.cmpi eq, %185, %186 : vector<64x1xi32>
    %188 = arith.select %187, %174, %171 : vector<64x1xi1>, vector<64x1xf32>
    %c10_i32_34 = arith.constant 10 : i32
    %189 = vector.broadcast %c10_i32_34 : i32 to vector<64x1xi32>
    %190 = arith.select %187, %189, %173 : vector<64x1xi1>, vector<64x1xi32>
    %191 = vector.extract_strided_slice %0 {offsets = [0, 11], sizes = [64, 1], strides = [1, 1]} : vector<64x16xf32> to vector<64x1xf32>
    %192 = vector.broadcast %191 : vector<64x1xf32> to vector<64x16xf32>
    %193 = arith.cmpf olt, %0, %192 : vector<64x16xf32>
    %194 = vector.broadcast %191 : vector<64x1xf32> to vector<64x16xf32>
    %195 = arith.cmpf oeq, %0, %194 : vector<64x16xf32>
    %c11_i32 = arith.constant 11 : i32
    %196 = vector.broadcast %c11_i32 : i32 to vector<64x16xi32>
    %197 = arith.cmpi slt, %1, %196 : vector<64x16xi32>
    %198 = arith.andi %195, %197 : vector<64x16xi1>
    %199 = arith.ori %193, %198 : vector<64x16xi1>
    %200 = arith.extui %199 : vector<64x16xi1> to vector<64x16xi32>
    %cst_35 = arith.constant dense<0> : vector<64xi32>
    %201 = vector.multi_reduction <add>, %200, %cst_35 [1] : vector<64x16xi32> to vector<64xi32>
    %202 = vector.shape_cast %201 : vector<64xi32> to vector<64x1xi32>
    %c7_i32_36 = arith.constant 7 : i32
    %203 = vector.broadcast %c7_i32_36 : i32 to vector<64x1xi32>
    %204 = arith.cmpi eq, %202, %203 : vector<64x1xi32>
    %205 = arith.select %204, %191, %188 : vector<64x1xi1>, vector<64x1xf32>
    %c11_i32_37 = arith.constant 11 : i32
    %206 = vector.broadcast %c11_i32_37 : i32 to vector<64x1xi32>
    %207 = arith.select %204, %206, %190 : vector<64x1xi1>, vector<64x1xi32>
    %208 = vector.extract_strided_slice %0 {offsets = [0, 12], sizes = [64, 1], strides = [1, 1]} : vector<64x16xf32> to vector<64x1xf32>
    %209 = vector.broadcast %208 : vector<64x1xf32> to vector<64x16xf32>
    %210 = arith.cmpf olt, %0, %209 : vector<64x16xf32>
    %211 = vector.broadcast %208 : vector<64x1xf32> to vector<64x16xf32>
    %212 = arith.cmpf oeq, %0, %211 : vector<64x16xf32>
    %c12_i32 = arith.constant 12 : i32
    %213 = vector.broadcast %c12_i32 : i32 to vector<64x16xi32>
    %214 = arith.cmpi slt, %1, %213 : vector<64x16xi32>
    %215 = arith.andi %212, %214 : vector<64x16xi1>
    %216 = arith.ori %210, %215 : vector<64x16xi1>
    %217 = arith.extui %216 : vector<64x16xi1> to vector<64x16xi32>
    %cst_38 = arith.constant dense<0> : vector<64xi32>
    %218 = vector.multi_reduction <add>, %217, %cst_38 [1] : vector<64x16xi32> to vector<64xi32>
    %219 = vector.shape_cast %218 : vector<64xi32> to vector<64x1xi32>
    %c7_i32_39 = arith.constant 7 : i32
    %220 = vector.broadcast %c7_i32_39 : i32 to vector<64x1xi32>
    %221 = arith.cmpi eq, %219, %220 : vector<64x1xi32>
    %222 = arith.select %221, %208, %205 : vector<64x1xi1>, vector<64x1xf32>
    %c12_i32_40 = arith.constant 12 : i32
    %223 = vector.broadcast %c12_i32_40 : i32 to vector<64x1xi32>
    %224 = arith.select %221, %223, %207 : vector<64x1xi1>, vector<64x1xi32>
    %225 = vector.extract_strided_slice %0 {offsets = [0, 13], sizes = [64, 1], strides = [1, 1]} : vector<64x16xf32> to vector<64x1xf32>
    %226 = vector.broadcast %225 : vector<64x1xf32> to vector<64x16xf32>
    %227 = arith.cmpf olt, %0, %226 : vector<64x16xf32>
    %228 = vector.broadcast %225 : vector<64x1xf32> to vector<64x16xf32>
    %229 = arith.cmpf oeq, %0, %228 : vector<64x16xf32>
    %c13_i32 = arith.constant 13 : i32
    %230 = vector.broadcast %c13_i32 : i32 to vector<64x16xi32>
    %231 = arith.cmpi slt, %1, %230 : vector<64x16xi32>
    %232 = arith.andi %229, %231 : vector<64x16xi1>
    %233 = arith.ori %227, %232 : vector<64x16xi1>
    %234 = arith.extui %233 : vector<64x16xi1> to vector<64x16xi32>
    %cst_41 = arith.constant dense<0> : vector<64xi32>
    %235 = vector.multi_reduction <add>, %234, %cst_41 [1] : vector<64x16xi32> to vector<64xi32>
    %236 = vector.shape_cast %235 : vector<64xi32> to vector<64x1xi32>
    %c7_i32_42 = arith.constant 7 : i32
    %237 = vector.broadcast %c7_i32_42 : i32 to vector<64x1xi32>
    %238 = arith.cmpi eq, %236, %237 : vector<64x1xi32>
    %239 = arith.select %238, %225, %222 : vector<64x1xi1>, vector<64x1xf32>
    %c13_i32_43 = arith.constant 13 : i32
    %240 = vector.broadcast %c13_i32_43 : i32 to vector<64x1xi32>
    %241 = arith.select %238, %240, %224 : vector<64x1xi1>, vector<64x1xi32>
    %242 = vector.extract_strided_slice %0 {offsets = [0, 14], sizes = [64, 1], strides = [1, 1]} : vector<64x16xf32> to vector<64x1xf32>
    %243 = vector.broadcast %242 : vector<64x1xf32> to vector<64x16xf32>
    %244 = arith.cmpf olt, %0, %243 : vector<64x16xf32>
    %245 = vector.broadcast %242 : vector<64x1xf32> to vector<64x16xf32>
    %246 = arith.cmpf oeq, %0, %245 : vector<64x16xf32>
    %c14_i32 = arith.constant 14 : i32
    %247 = vector.broadcast %c14_i32 : i32 to vector<64x16xi32>
    %248 = arith.cmpi slt, %1, %247 : vector<64x16xi32>
    %249 = arith.andi %246, %248 : vector<64x16xi1>
    %250 = arith.ori %244, %249 : vector<64x16xi1>
    %251 = arith.extui %250 : vector<64x16xi1> to vector<64x16xi32>
    %cst_44 = arith.constant dense<0> : vector<64xi32>
    %252 = vector.multi_reduction <add>, %251, %cst_44 [1] : vector<64x16xi32> to vector<64xi32>
    %253 = vector.shape_cast %252 : vector<64xi32> to vector<64x1xi32>
    %c7_i32_45 = arith.constant 7 : i32
    %254 = vector.broadcast %c7_i32_45 : i32 to vector<64x1xi32>
    %255 = arith.cmpi eq, %253, %254 : vector<64x1xi32>
    %256 = arith.select %255, %242, %239 : vector<64x1xi1>, vector<64x1xf32>
    %c14_i32_46 = arith.constant 14 : i32
    %257 = vector.broadcast %c14_i32_46 : i32 to vector<64x1xi32>
    %258 = arith.select %255, %257, %241 : vector<64x1xi1>, vector<64x1xi32>
    %259 = vector.extract_strided_slice %0 {offsets = [0, 15], sizes = [64, 1], strides = [1, 1]} : vector<64x16xf32> to vector<64x1xf32>
    %260 = vector.broadcast %259 : vector<64x1xf32> to vector<64x16xf32>
    %261 = arith.cmpf olt, %0, %260 : vector<64x16xf32>
    %262 = vector.broadcast %259 : vector<64x1xf32> to vector<64x16xf32>
    %263 = arith.cmpf oeq, %0, %262 : vector<64x16xf32>
    %c15_i32 = arith.constant 15 : i32
    %264 = vector.broadcast %c15_i32 : i32 to vector<64x16xi32>
    %265 = arith.cmpi slt, %1, %264 : vector<64x16xi32>
    %266 = arith.andi %263, %265 : vector<64x16xi1>
    %267 = arith.ori %261, %266 : vector<64x16xi1>
    %268 = arith.extui %267 : vector<64x16xi1> to vector<64x16xi32>
    %cst_47 = arith.constant dense<0> : vector<64xi32>
    %269 = vector.multi_reduction <add>, %268, %cst_47 [1] : vector<64x16xi32> to vector<64xi32>
    %270 = vector.shape_cast %269 : vector<64xi32> to vector<64x1xi32>
    %c7_i32_48 = arith.constant 7 : i32
    %271 = vector.broadcast %c7_i32_48 : i32 to vector<64x1xi32>
    %272 = arith.cmpi eq, %270, %271 : vector<64x1xi32>
    %273 = arith.select %272, %259, %256 : vector<64x1xi1>, vector<64x1xf32>
    %c15_i32_49 = arith.constant 15 : i32
    %274 = vector.broadcast %c15_i32_49 : i32 to vector<64x1xi32>
    %275 = arith.select %272, %274, %258 : vector<64x1xi1>, vector<64x1xi32>
    %c0_50 = arith.constant 0 : index
    %c0_51 = arith.constant 0 : index
    %276 = vector.load %arg2[%c0_50, %c0_51] : memref<64x1xf32, #tpu.memory_space<vmem>>, vector<64x1xf32>
    tpu.vector_store %arg2[%c0_50, %c0_51], %273 {strides = array<i32>} : memref<64x1xf32, #tpu.memory_space<vmem>>, vector<64x1xf32>,
    %c0_52 = arith.constant 0 : index
    %c0_53 = arith.constant 0 : index
    %277 = vector.load %arg3[%c0_52, %c0_53] : memref<64x1xi32, #tpu.memory_space<vmem>>, vector<64x1xi32>
    tpu.vector_store %arg3[%c0_52, %c0_53], %275 {strides = array<i32>} : memref<64x1xi32, #tpu.memory_space<vmem>>, vector<64x1xi32>,
    return
  }
  func.func @transform_0(%arg0: i32) -> (i32, i32) {
    %c0_i32 = arith.constant 0 : i32
    %c0_i32_0 = arith.constant 0 : i32
    return %arg0, %c0_i32 : i32, i32
  }
  func.func @transform_1(%arg0: i32) -> (i32, i32) {
    %c0_i32 = arith.constant 0 : i32
    %c0_i32_0 = arith.constant 0 : i32
    return %arg0, %c0_i32 : i32, i32
  }
  func.func @transform_2(%arg0: i32) -> (i32, i32) {
    %c0_i32 = arith.constant 0 : i32
    %c0_i32_0 = arith.constant 0 : i32
    return %arg0, %c0_i32 : i32, i32
  }
}

</mosaic_0001>

<bundles_post_ra>
// kernel: tpu_custom_call.1
= control target key start
LH: loop header
LB: loop body
LE: loop exit
PB: predicated region body
PF: predicated region fallthrough
CT: control target
= control target key end

     0   :  { %s4159_s9 = smov 0   ;;  %s7279_s0 = inlined_call_operand.vmem [shape: f32[128,16], index: 0, kind: input, shape index: {}]   ;;  %s7280_s1 = inlined_call_operand.vmem [shape: f32[128,1], index: 1, kind: output, shape index: {0}]   ;;  %s7281_s2 = inlined_call_operand.vmem [shape: s32[128,1], index: 2, kind: output, shape index: {1}]  }
   0x1 LB: > { %s4007_s10 = sadd.s32 4294967295, %s4124_s9   ;;  %p4011_p0 = scmp.ge.s32.totalorder %s4124_s9, 1  ;;  %s4124_s9 = sphi %s4159_s9, %s13_s9  }
   0x2   : > { %p116_p1 = scmp.lt.s32.totalorder %s4124_s9, 3 }
   0x4   : > { %p117_p2 = pnand %p4011_p0, %p116_p1 }
   0x6   : > { %120 = sbr.rel (%p117_p2) target bundleno = 3285 (0xcd5), region = 24 }
   0xb   : > { %s4012_s11 = sshll.u32 %s4007_s10, 3  ;;  %v7292_v0 = vmov 0   ;;  %v4127_v9 = vmov 1   ;;  %v4128_v10 = vmov 2   ;;  %vm252_vm0 = vcmask 130048   ;;  %s4130_s16 = smov 1  }
   0xc   : > { %4047 = vset.pattern.permute.xlu1 %v7292_v0  ;;  %4046 = vset.pattern.permute.xlu0 %v7292_v0  ;;  %p144_p3 = scmp.lt.s32.totalorder %s4012_s11, 15  ;;  %v169_v33 = vlaneseq  ;;  %s4143_s20 = smov 113  }
   0xe   : > { %s7720_s11 = smov (!%p144_p3, %s4012_s11), 15  ;;  %v4234_v42 = vand.u32 127, %v169_v33 }
   0xf   : > { %s4169_s12 = sshll.u32 %s7720_s11, 3 }
  0x10   : > { %s4175_s15 = scalar_lea.vmem %s7279_s0, %s4169_s12  ;;  %vm421_vm8 = vcmp.lt.s32.totalorder %v4234_v42, 1  ;;  %s7111_s19 = scalar_lea.vmem %s7281_s2, %s4169_s12 }
  0x11   : > { %v4178_v1 = vld [vmem:[%s4175_s15 + $0x10] sm:$0xff]  ;;  %v4181_v2 = vld [vmem:[%s4175_s15] sm:$0xff]  ;;  %v4186_v3 = vld [vmem:[%s4175_s15 + $0x18] sm:$0xff]  ;;  %s153_s23 = scalar_lea.vmem %s7280_s1, %s4169_s12 }
  0x12   : > { %183 = vperm.xlu1 %4047, %v4178_v1   ;;  %173 = vperm.xlu0 %4046, %v4181_v2   ;;  %v4189_v4 = vld [vmem:[%s4175_s15 + $0x8] sm:$0xff]  ;;  %v4197_v6 = vld [vmem:[%s4175_s15 + $0x20] sm:$0xff]  ;;  %v4202_v7 = vld [vmem:[%s4175_s15 + $0x38] sm:$0xff] }
  0x13   : > { %v4194_v5 = vld [vmem:[%s4175_s15 + $0x28] sm:$0xff]  ;;  %v4205_v8 = vld [vmem:[%s4175_s15 + $0x30] sm:$0xff] }
  0x16   : > { %188 = vperm.xlu1 %4047, %v4186_v3   ;;  %178 = vperm.xlu0 %4046, %v4189_v4  }
  0x1a   : > { %198 = vperm.xlu1 %4047, %v4194_v5   ;;  %193 = vperm.xlu0 %4046, %v4197_v6  }
  0x1e   : > { %208 = vperm.xlu1 %4047, %v4202_v7   ;;  %203 = vperm.xlu0 %4046, %v4205_v8  }
  0x22   : > { %4048 = vset.pattern.permute.xlu1 %v4127_v9  ;;  %4049 = vset.pattern.permute.xlu0 %v4127_v9 }
  0x23   : > { %374 = vperm.xlu1 %4048, %v4181_v2   ;;  %378 = vperm.xlu0 %4049, %v4189_v4  }
  0x27   : > { %382 = vperm.xlu1 %4048, %v4178_v1   ;;  %4050 = vset.pattern.permute.xlu0 %v4128_v10 }
  0x2b   : > { %386 = vperm.xlu1 %4048, %v4186_v3  }
  0x2f   : > { %390 = vperm.xlu1 %4048, %v4197_v6  }
  0x33   : > { %394 = vperm.xlu1 %4048, %v4194_v5  }
  0x37   : > { %398 = vperm.xlu1 %4048, %v4205_v8  }
  0x3b   : > { %402 = vperm.xlu1 %4048, %v4202_v7  }
  0x3f   : > { %4051 = vset.pattern.permute.xlu1 %v4128_v10 }
  0x8d   : > { %v184_v11 = vpop.permute.xlu1 %183  ;;  %v174_v12 = vpop.permute.xlu0 %173 }
  0x8e   : > { %vm213_vm1 = vcmp.lt.f32.partialorder %v4178_v1, %v184_v11  ;;  %vm211_vm2 = vcmp.lt.f32.partialorder %v4181_v2, %v174_v12 }
  0x8f   : > { %v246_v13 = vsel %vm213_vm1, 1, %v7292_v0  ;;  %v244_v14 = vsel %vm211_vm2, 1, %v7292_v0 }
  0x90   : > { %v253_v15 = vsel %vm252_vm0, %v244_v14, 0  ;;  %v279_v16 = vsel %vm252_vm0, %v246_v13, 0 }
  0x91   : > { %v189_v17 = vpop.permute.xlu1 %188  ;;  %v179_v18 = vpop.permute.xlu0 %178  ;;  %v255_v19 = vshrl.u32 %v253_v15, 16  ;;  %v254_v20 = vand.u32 65535, %v253_v15  ;;  %v280_v21 = vand.u32 65535, %v279_v16  ;;  %v281_v43 = vshrl.u32 %v279_v16, 16 }
  0x92   : > { %vm214_vm3 = vcmp.lt.f32.partialorder %v4186_v3, %v189_v17  ;;  %vm212_vm4 = vcmp.lt.f32.partialorder %v4189_v4, %v179_v18 }
  0x93   : > { %v247_v22 = vsel %vm214_vm3, 1, %v7292_v0  ;;  %v245_v23 = vsel %vm212_vm4, 1, %v7292_v0  ;;  %v257_v24 = vcvt.s32.f32 %v255_v19  ;;  %v256_v25 = vcvt.s32.f32 %v254_v20 }
  0x94   : > { %v266_v26 = vsel %vm252_vm0, %v245_v23, 0  ;;  %v292_v27 = vsel %vm252_vm0, %v247_v22, 0  ;;  %v282_v30 = vcvt.s32.f32 %v280_v21  ;;  %v283_v48 = vcvt.s32.f32 %v281_v43 }
  0x95   : > { %v199_v28 = vpop.permute.xlu1 %198  ;;  %260 = vadd.xlane.f32.xlu1 %v257_v24  ;;  %258 = vadd.xlane.f32.xlu0 %v256_v25  ;;  %v194_v29 = vpop.permute.xlu0 %193  ;;  %v267_v31 = vand.u32 65535, %v266_v26  ;;  %v293_v32 = vand.u32 65535, %v292_v27  ;;  %v268_v36 = vshrl.u32 %v266_v26, 16  ;;  %v294_v50 = vshrl.u32 %v292_v27, 16 }
  0x96   : > { %vm216_vm5 = vcmp.lt.f32.partialorder %v4194_v5, %v199_v28  ;;  %vm215_vm6 = vcmp.lt.f32.partialorder %v4197_v6, %v194_v29 }
  0x97   : > { %v248_v34 = vsel %vm215_vm6, 1, %v7292_v0  ;;  %v269_v35 = vcvt.s32.f32 %v267_v31  ;;  %v249_v38 = vsel %vm216_vm5, 1, %v7292_v0  ;;  %v295_v41 = vcvt.s32.f32 %v293_v32 }
  0x98   : > { %v305_v37 = vsel %vm252_vm0, %v248_v34, 0  ;;  %v270_v44 = vcvt.s32.f32 %v268_v36  ;;  %v318_v46 = vsel %vm252_vm0, %v249_v38, 0  ;;  %v296_v57 = vcvt.s32.f32 %v294_v50 }
  0x99   : > { %v209_v39 = vpop.permute.xlu1 %208  ;;  %284 = vadd.xlane.f32.xlu1 %v282_v30  ;;  %271 = vadd.xlane.f32.xlu0 %v269_v35  ;;  %v204_v40 = vpop.permute.xlu0 %203  ;;  %v306_v45 = vand.u32 65535, %v305_v37  ;;  %v319_v53 = vand.u32 65535, %v318_v46  ;;  %v307_v58 = vshrl.u32 %v305_v37, 16  ;;  %v320_v9 = vshrl.u32 %v318_v46, 16 }
  0x9a   : > { %vm217_vm7 = vcmp.lt.f32.partialorder %v4205_v8, %v204_v40  ;;  %vm218_vm9 = vcmp.lt.f32.partialorder %v4202_v7, %v209_v39 }
  0x9b   : > { %v250_v47 = vsel %vm217_vm7, 1, %v7292_v0  ;;  %v308_v52 = vcvt.s32.f32 %v306_v45  ;;  %v251_v55 = vsel %vm218_vm9, 1, %v7292_v0  ;;  %v321_v59 = vcvt.s32.f32 %v319_v53 }
  0x9c   : > { %v331_v54 = vsel %vm252_vm0, %v250_v47, 0  ;;  %v344_v62 = vsel %vm252_vm0, %v251_v55, 0  ;;  %v309_v11 = vcvt.s32.f32 %v307_v58  ;;  %v322_v17 = vcvt.s32.f32 %v320_v9 }
  0x9d   : > { %297 = vadd.xlane.f32.xlu1 %v295_v41  ;;  %273 = vadd.xlane.f32.xlu0 %v270_v44  ;;  %v332_v60 = vand.u32 65535, %v331_v54  ;;  %v345_v13 = vand.u32 65535, %v344_v62  ;;  %v333_v20 = vshrl.u32 %v331_v54, 16  ;;  %v346_v27 = vshrl.u32 %v344_v62, 16 }
  0x9e   : > { %v375_v49 = vpop.permute.xlu1 %374  ;;  %v379_v51 = vpop.permute.xlu0 %378 }
  0x9f   : > { %vm405_vm10 = vcmp.lt.f32.partialorder %v4181_v2, %v375_v49  ;;  %vm413_vm11 = vcmp.eq.f32.partialorder %v4181_v2, %v375_v49  ;;  %vm414_vm13 = vcmp.eq.f32.partialorder %v4189_v4, %v379_v51  ;;  %vm406_vm15 = vcmp.lt.f32.partialorder %v4189_v4, %v379_v51 }
  0xa0   : > { %vm422_vm12 = vmand %vm413_vm11, %vm421_vm8  ;;  %v334_v12 = vcvt.s32.f32 %v332_v60  ;;  %v347_v19 = vcvt.s32.f32 %v345_v13  ;;  %v335_v26 = vcvt.s32.f32 %v333_v20  ;;  %v348_v33 = vcvt.s32.f32 %v346_v27 }
  0xa1   : > { %vm430_vm14 = vmor %vm405_vm10, %vm422_vm12  ;;  %286 = vadd.xlane.f32.xlu0 %v283_v48  ;;  %310 = vadd.xlane.f32.xlu1 %v308_v52 }
  0xa2   : > { %v383_v56 = vpop.permute.xlu1 %382  ;;  %vm423_vm1 = vmand %vm414_vm13, %vm421_vm8  ;;  %v438_v61 = vsel %vm430_vm14, 1, %v7292_v0 }
  0xa3   : > { %vm415_vm2 = vcmp.eq.f32.partialorder %v4178_v1, %v383_v56  ;;  %vm431_vm3 = vmor %vm406_vm15, %vm423_vm1  ;;  %vm407_vm4 = vcmp.lt.f32.partialorder %v4178_v1, %v383_v56  ;;  %v446_v10 = vsel %vm252_vm0, %v438_v61, 0 }
  0xa4   : > { %vm424_vm5 = vmand %vm415_vm2, %vm421_vm8  ;;  %v439_v14 = vsel %vm431_vm3, 1, %v7292_v0  ;;  %v447_v15 = vand.u32 65535, %v446_v10  ;;  %v448_v29 = vshrl.u32 %v446_v10, 16 }
  0xa5   : > { %299 = vadd.xlane.f32.xlu0 %v296_v57  ;;  %323 = vadd.xlane.f32.xlu1 %v321_v59  ;;  %vm432_vm6 = vmor %vm407_vm4, %vm424_vm5  ;;  %v459_v18 = vsel %vm252_vm0, %v439_v14, 0 }
  0xa6   : > { %v387_v63 = vpop.permute.xlu1 %386  ;;  %v440_v21 = vsel %vm432_vm6, 1, %v7292_v0  ;;  %v449_v22 = vcvt.s32.f32 %v447_v15  ;;  %v460_v23 = vand.u32 65535, %v459_v18  ;;  %v450_v35 = vcvt.s32.f32 %v448_v29 }
  0xa7   : > { %vm416_vm7 = vcmp.eq.f32.partialorder %v4186_v3, %v387_v63  ;;  %vm408_vm9 = vcmp.lt.f32.partialorder %v4186_v3, %v387_v63  ;;  %v472_v25 = vsel %vm252_vm0, %v440_v21, 0  ;;  %v461_v37 = vshrl.u32 %v459_v18, 16 }
  0xa8   : > { %vm425_vm10 = vmand %vm416_vm7, %vm421_vm8  ;;  %v462_v28 = vcvt.s32.f32 %v460_v23  ;;  %v473_v30 = vand.u32 65535, %v472_v25  ;;  %v474_v46 = vshrl.u32 %v472_v25, 16 }
  0xa9   : > { %312 = vadd.xlane.f32.xlu0 %v309_v11  ;;  %336 = vadd.xlane.f32.xlu1 %v334_v12  ;;  %vm433_vm12 = vmor %vm408_vm9, %vm425_vm10  ;;  %v463_v43 = vcvt.s32.f32 %v461_v37 }
  0xaa   : > { %v391_v16 = vpop.permute.xlu1 %390  ;;  %v441_v31 = vsel %vm433_vm12, 1, %v7292_v0  ;;  %v475_v36 = vcvt.s32.f32 %v473_v30  ;;  %v476_v50 = vcvt.s32.f32 %v474_v46 }
  0xab   : > { %vm417_vm11 = vcmp.eq.f32.partialorder %v4197_v6, %v391_v16  ;;  %vm409_vm13 = vcmp.lt.f32.partialorder %v4197_v6, %v391_v16  ;;  %v485_v34 = vsel %vm252_vm0, %v441_v31, 0 }
  0xac   : > { %vm426_vm14 = vmand %vm417_vm11, %vm421_vm8  ;;  %v486_v40 = vand.u32 65535, %v485_v34  ;;  %v487_v52 = vshrl.u32 %v485_v34, 16 }
  0xad   : > { %325 = vadd.xlane.f32.xlu0 %v322_v17  ;;  %349 = vadd.xlane.f32.xlu1 %v347_v19  ;;  %vm434_vm1 = vmor %vm409_vm13, %vm426_vm14  ;;  %vm654_vm14 = vcmp.lt.s32.totalorder %v4234_v42, 2 }
  0xae   : > { %v395_v24 = vpop.permute.xlu1 %394  ;;  %v442_v38 = vsel %vm434_vm1, 1, %v7292_v0  ;;  %v488_v45 = vcvt.s32.f32 %v486_v40  ;;  %v489_v56 = vcvt.s32.f32 %v487_v52 }
  0xaf   : > { %vm418_vm15 = vcmp.eq.f32.partialorder %v4194_v5, %v395_v24  ;;  %vm410_vm2 = vcmp.lt.f32.partialorder %v4194_v5, %v395_v24  ;;  %v498_v41 = vsel %vm252_vm0, %v442_v38, 0 }
  0xb0   : > { %vm427_vm3 = vmand %vm418_vm15, %vm421_vm8  ;;  %v499_v47 = vand.u32 65535, %v498_v41  ;;  %v500_v58 = vshrl.u32 %v498_v41, 16 }
  0xb1   : > { %338 = vadd.xlane.f32.xlu0 %v335_v26  ;;  %451 = vadd.xlane.f32.xlu1 %v449_v22  ;;  %vm435_vm5 = vmor %vm410_vm2, %vm427_vm3 }
  0xb2   : > { %v399_v32 = vpop.permute.xlu1 %398  ;;  %v443_v44 = vsel %vm435_vm5, 1, %v7292_v0  ;;  %v501_v51 = vcvt.s32.f32 %v499_v47  ;;  %v502_v61 = vcvt.s32.f32 %v500_v58 }
  0xb3   : > { %vm419_vm4 = vcmp.eq.f32.partialorder %v4205_v8, %v399_v32  ;;  %vm411_vm6 = vcmp.lt.f32.partialorder %v4205_v8, %v399_v32  ;;  %v511_v48 = vsel %vm252_vm0, %v443_v44, 0 }
  0xb4   : > { %vm428_vm7 = vmand %vm419_vm4, %vm421_vm8  ;;  %v512_v53 = vand.u32 65535, %v511_v48  ;;  %v513_v63 = vshrl.u32 %v511_v48, 16 }
  0xb5   : > { %351 = vadd.xlane.f32.xlu0 %v348_v33  ;;  %464 = vadd.xlane.f32.xlu1 %v462_v28  ;;  %vm436_vm10 = vmor %vm411_vm6, %vm428_vm7 }
  0xb6   : > { %v403_v39 = vpop.permute.xlu1 %402  ;;  %v444_v49 = vsel %vm436_vm10, 1, %v7292_v0  ;;  %v514_v57 = vcvt.s32.f32 %v512_v53  ;;  %v515_v10 = vcvt.s32.f32 %v513_v63 }
  0xb7   : > { %vm420_vm9 = vcmp.eq.f32.partialorder %v4202_v7, %v403_v39  ;;  %vm412_vm11 = vcmp.lt.f32.partialorder %v4202_v7, %v403_v39  ;;  %v524_v54 = vsel %vm252_vm0, %v444_v49, 0 }
  0xb8   : > { %vm429_vm12 = vmand %vm420_vm9, %vm421_vm8  ;;  %v525_v59 = vand.u32 65535, %v524_v54  ;;  %v526_v12 = vshrl.u32 %v524_v54, 16 }
  0xb9   : > { %453 = vadd.xlane.f32.xlu0 %v450_v35  ;;  %477 = vadd.xlane.f32.xlu1 %v475_v36  ;;  %vm437_vm13 = vmor %vm412_vm11, %vm429_vm12 }
  0xba   : > { %v445_v55 = vsel %vm437_vm13, 1, %v7292_v0  ;;  %v527_v62 = vcvt.s32.f32 %v525_v59  ;;  %v528_v13 = vcvt.s32.f32 %v526_v12 }
  0xbb   : > { %v537_v60 = vsel %vm252_vm0, %v445_v55, 0 }
  0xbc   : > { %v538_v9 = vand.u32 65535, %v537_v60  ;;  %v539_v14 = vshrl.u32 %v537_v60, 16 }
  0xbd   : > { %466 = vadd.xlane.f32.xlu0 %v463_v43  ;;  %490 = vadd.xlane.f32.xlu1 %v488_v45  ;;  %v4129_v43 = vmov 3  }
  0xbe   : > { %v540_v11 = vcvt.s32.f32 %v538_v9  ;;  %v541_v15 = vcvt.s32.f32 %v539_v14 }
  0xc1   : > { %479 = vadd.xlane.f32.xlu0 %v476_v50  ;;  %503 = vadd.xlane.f32.xlu1 %v501_v51 }
  0xc5   : > { %492 = vadd.xlane.f32.xlu0 %v489_v56  ;;  %516 = vadd.xlane.f32.xlu1 %v514_v57 }
  0xc9   : > { %505 = vadd.xlane.f32.xlu0 %v502_v61  ;;  %529 = vadd.xlane.f32.xlu1 %v527_v62 }
  0xcd   : > { %518 = vadd.xlane.f32.xlu0 %v515_v10  ;;  %542 = vadd.xlane.f32.xlu1 %v540_v11 }
  0xd1   : > { %531 = vadd.xlane.f32.xlu0 %v528_v13 }
  0xd5   : > { %544 = vadd.xlane.f32.xlu0 %v541_v15 }
  0xde   : > { %611 = vperm.xlu1 %4051, %v4189_v4  }
  0xe2   : > { %615 = vperm.xlu1 %4051, %v4178_v1  }
  0xe6   : > { %623 = vperm.xlu1 %4051, %v4197_v6  }
  0xea   : > { %631 = vperm.xlu1 %4051, %v4205_v8  }
  0xeb   : > { %607 = vperm.xlu0 %4050, %v4181_v2  }
  0xee   : > { %4052 = vset.pattern.permute.xlu1 %v4129_v43 }
  0xef   : > { %619 = vperm.xlu0 %4050, %v4186_v3  }
  0xf3   : > { %627 = vperm.xlu0 %4050, %v4194_v5  }
  0xf7   : > { %635 = vperm.xlu0 %4050, %v4202_v7  }
  0xfb   : > { %4053 = vset.pattern.permute.xlu0 %v4129_v43 }
 0x11e   : > { %v4300_v16 = vpop.xlane.xlu1 %260  ;;  %v4302_v17 = vpop.xlane.xlu0 %258 }
 0x122   : > { %v4304_v18 = vpop.xlane.xlu1 %284  ;;  %v4306_v19 = vpop.xlane.xlu0 %271 }
 0x126   : > { %v4308_v20 = vpop.xlane.xlu1 %297  ;;  %v4310_v21 = vpop.xlane.xlu0 %273 }
 0x12a   : > { %v4312_v22 = vpop.xlane.xlu1 %310  ;;  %v4314_v23 = vpop.xlane.xlu0 %286 }
 0x12e   : > { %v4316_v24 = vpop.xlane.xlu1 %323  ;;  %v4318_v25 = vpop.xlane.xlu0 %299 }
 0x132   : > { %v4320_v26 = vpop.xlane.xlu1 %336  ;;  %v4322_v27 = vpop.xlane.xlu0 %312 }
 0x136   : > { %v4324_v28 = vpop.xlane.xlu1 %349  ;;  %v4326_v29 = vpop.xlane.xlu0 %325 }
 0x13a   : > { %v4328_v30 = vpop.xlane.xlu1 %451  ;;  %v4330_v31 = vpop.xlane.xlu0 %338 }
 0x13e   : > { %v4332_v32 = vpop.xlane.xlu1 %464  ;;  %v4334_v33 = vpop.xlane.xlu0 %351 }
 0x142   : > { %v4336_v34 = vpop.xlane.xlu1 %477  ;;  %v4338_v35 = vpop.xlane.xlu0 %453 }
 0x146   : > { %v4340_v36 = vpop.xlane.xlu1 %490  ;;  %v4342_v37 = vpop.xlane.xlu0 %466 }
 0x14a   : > { %v4344_v38 = vpop.xlane.xlu1 %503  ;;  %v4346_v39 = vpop.xlane.xlu0 %479 }
 0x14e   : > { %v4348_v40 = vpop.xlane.xlu1 %516  ;;  %v4350_v41 = vpop.xlane.xlu0 %492 }
 0x152   : > { %v4352_v44 = vpop.xlane.xlu1 %529  ;;  %v4354_v45 = vpop.xlane.xlu0 %505 }
 0x156   : > { %v4356_v46 = vpop.xlane.xlu1 %542  ;;  %v4358_v47 = vpop.xlane.xlu0 %518 }
 0x15a   : > { %v612_v48 = vpop.permute.xlu1 %611  ;;  %v4361_v49 = vpop.xlane.xlu0 %531 }
 0x15b   : > { %vm647_vm8 = vcmp.eq.f32.partialorder %v4189_v4, %v612_v48  ;;  %vm639_vm15 = vcmp.lt.f32.partialorder %v4189_v4, %v612_v48 }
 0x15c   : > { %vm656_vm1 = vmand %vm647_vm8, %vm654_vm14 }
 0x15d   : > { %vm664_vm2 = vmor %vm639_vm15, %vm656_vm1 }
 0x15e   : > { %v616_v50 = vpop.permute.xlu1 %615  ;;  %v4368_v51 = vpop.xlane.xlu0 %544  ;;  %v672_v52 = vsel %vm664_vm2, 1, %v7292_v0 }
 0x15f   : > { %vm648_vm3 = vcmp.eq.f32.partialorder %v4178_v1, %v616_v50  ;;  %vm640_vm4 = vcmp.lt.f32.partialorder %v4178_v1, %v616_v50  ;;  %v692_v55 = vsel %vm252_vm0, %v672_v52, 0 }
 0x160   : > { %vm657_vm5 = vmand %vm648_vm3, %vm654_vm14  ;;  %v693_v59 = vand.u32 65535, %v692_v55  ;;  %v694_v63 = vshrl.u32 %v692_v55, 16 }
 0x161   : > { %vm4374_vm6 = vmor %vm640_vm4, %vm657_vm5 }
 0x162   : > { %v624_v56 = vpop.permute.xlu1 %623  ;;  %v673_v9 = vsel %vm4374_vm6, 1, %v7292_v0  ;;  %v695_v15 = vcvt.s32.f32 %v693_v59  ;;  %v696_v43 = vcvt.s32.f32 %v694_v63 }
 0x163   : > { %vm650_vm12 = vcmp.eq.f32.partialorder %v4197_v6, %v624_v56  ;;  %vm642_vm2 = vcmp.lt.f32.partialorder %v4197_v6, %v624_v56  ;;  %v705_v13 = vsel %vm252_vm0, %v673_v9, 0 }
 0x164   : > { %vm659_vm3 = vmand %vm650_vm12, %vm654_vm14  ;;  %v706_v50 = vand.u32 65535, %v705_v13  ;;  %v707_v52 = vshrl.u32 %v705_v13, 16 }
 0x165   : > { %vm667_vm5 = vmor %vm642_vm2, %vm659_vm3 }
 0x166   : > { %v608_v53 = vpop.permute.xlu0 %607  ;;  %v632_v14 = vpop.permute.xlu1 %631  ;;  %v675_v54 = vsel %vm667_vm5, 1, %v7292_v0  ;;  %v708_v55 = vcvt.s32.f32 %v706_v50  ;;  %v709_v56 = vcvt.s32.f32 %v707_v52 }
 0x167   : > { %vm638_vm7 = vcmp.lt.f32.partialorder %v4181_v2, %v608_v53  ;;  %vm646_vm9 = vcmp.eq.f32.partialorder %v4181_v2, %v608_v53  ;;  %v731_v59 = vsel %vm252_vm0, %v675_v54, 0 }
 0x168   : > { %vm655_vm10 = vmand %vm646_vm9, %vm654_vm14  ;;  %vm652_vm9 = vcmp.eq.f32.partialorder %v4205_v8, %v632_v14  ;;  %v733_v63 = vshrl.u32 %v731_v59, 16  ;;  %v732_v9 = vand.u32 65535, %v731_v59  ;;  %v302_v59 = vcvt.f32.s32 %v4318_v25 }
 0x169   : > { %vm663_vm11 = vmor %vm638_vm7, %vm655_vm10  ;;  %vm644_vm10 = vcmp.lt.f32.partialorder %v4205_v8, %v632_v14 }
 0x16a   : > { %v620_v57 = vpop.permute.xlu0 %619  ;;  %v671_v58 = vsel %vm663_vm11, 1, %v7292_v0  ;;  %vm661_vm12 = vmand %vm652_vm9, %vm654_vm14  ;;  %v734_v13 = vcvt.s32.f32 %v732_v9  ;;  %v328_v9 = vcvt.f32.s32 %v4326_v29  ;;  %v341_v29 = vcvt.f32.s32 %v4330_v31 }
 0x16b   : > { %vm641_vm13 = vcmp.lt.f32.partialorder %v4186_v3, %v620_v57  ;;  %vm649_vm8 = vcmp.eq.f32.partialorder %v4186_v3, %v620_v57  ;;  %v679_v60 = vsel %vm252_vm0, %v671_v58, 0 }
 0x16c   : > { %vm658_vm15 = vmand %vm649_vm8, %vm654_vm14  ;;  %v681_v61 = vshrl.u32 %v679_v60, 16  ;;  %v680_v62 = vand.u32 65535, %v679_v60  ;;  %v329_v25 = vshll.u32 %v328_v9, 16 }
 0x16d   : > { %vm666_vm1 = vmor %vm641_vm13, %vm658_vm15 }
 0x16e   : > { %v628_v10 = vpop.permute.xlu0 %627  ;;  %v683_v11 = vcvt.s32.f32 %v681_v61  ;;  %v682_v12 = vcvt.s32.f32 %v680_v62  ;;  %v674_v48 = vsel %vm666_vm1, 1, %v7292_v0  ;;  %vm669_vm13 = vmor %vm644_vm10, %vm661_vm12 }
 0x16f   : > { %vm651_vm4 = vcmp.eq.f32.partialorder %v4194_v5, %v628_v10  ;;  %vm643_vm6 = vcmp.lt.f32.partialorder %v4194_v5, %v628_v10  ;;  %v718_v53 = vsel %vm252_vm0, %v674_v48, 0 }
 0x170   : > { %686 = vadd.xlane.f32.xlu0 %v683_v11  ;;  %684 = vadd.xlane.f32.xlu1 %v682_v12  ;;  %vm660_vm7 = vmand %vm651_vm4, %vm654_vm14  ;;  %v720_v57 = vshrl.u32 %v718_v53, 16  ;;  %v719_v58 = vand.u32 65535, %v718_v53  ;;  %v677_v11 = vsel %vm669_vm13, 1, %v7292_v0  ;;  %v735_v12 = vcvt.s32.f32 %v733_v63 }
 0x171   : > { %vm668_vm11 = vmor %vm643_vm6, %vm660_vm7  ;;  %v263_v53 = vcvt.f32.s32 %v4300_v16  ;;  %v303_v63 = vshll.u32 %v302_v59, 16 }
 0x172   : > { %v676_v60 = vsel %vm668_vm11, 1, %v7292_v0  ;;  %v722_v61 = vcvt.s32.f32 %v720_v57  ;;  %v721_v62 = vcvt.s32.f32 %v719_v58  ;;  %v262_v57 = vcvt.f32.s32 %v4302_v17 }
 0x173   : > { %v744_v10 = vsel %vm252_vm0, %v676_v60, 0  ;;  %v275_v17 = vcvt.f32.s32 %v4306_v19 }
 0x174   : > { %697 = vadd.xlane.f32.xlu0 %v695_v15  ;;  %699 = vadd.xlane.f32.xlu1 %v696_v43  ;;  %v746_v14 = vshrl.u32 %v744_v10, 16  ;;  %v745_v15 = vand.u32 65535, %v744_v10  ;;  %v4413_v43 = vsel %vm252_vm0, %v677_v11, 0  ;;  %v315_v11 = vcvt.f32.s32 %v4322_v27 }
 0x175   : > { %v758_v52 = vand.u32 65535, %v4413_v43  ;;  %v327_v27 = vcvt.f32.s32 %v4316_v24 }
 0x176   : > { %v748_v48 = vcvt.s32.f32 %v746_v14  ;;  %v747_v50 = vcvt.s32.f32 %v745_v15 }
 0x177   : > { %v760_v54 = vcvt.s32.f32 %v758_v52  ;;  %v353_v52 = vcvt.f32.s32 %v4324_v28 }
 0x178   : > { %710 = vadd.xlane.f32.xlu0 %v708_v55  ;;  %712 = vadd.xlane.f32.xlu1 %v709_v56  ;;  %v264_v55 = vshll.u32 %v263_v53, 16  ;;  %v289_v56 = vcvt.f32.s32 %v4314_v23  ;;  %v301_v23 = vcvt.f32.s32 %v4308_v20  ;;  %v314_v20 = vcvt.f32.s32 %v4312_v22 }
 0x179   : > { %v340_v53 = vcvt.f32.s32 %v4320_v26 }
 0x17a   : > { %v290_v58 = vshll.u32 %v289_v56, 16  ;;  %v265_v60 = vadd.s32 %v264_v55, %v262_v57  ;;  %v636_v57 = vpop.permute.xlu0 %635 }
 0x17b   : > { %vm653_vm7 = vcmp.eq.f32.partialorder %v4202_v7, %v636_v57  ;;  %vm645_vm9 = vcmp.lt.f32.partialorder %v4202_v7, %v636_v57 }
 0x17c   : > { %725 = vadd.xlane.f32.xlu1 %v722_v61  ;;  %723 = vadd.xlane.f32.xlu0 %v721_v62  ;;  %v276_v61 = vcvt.f32.s32 %v4310_v21  ;;  %v288_v62 = vcvt.f32.s32 %v4304_v18  ;;  %vm357_vm8 = vcmp.eq.s32.totalorder %v265_v60, 7  ;;  %v304_v18 = vadd.s32 %v303_v63, %v301_v23  ;;  %vm662_vm10 = vmand %vm653_vm7, %vm654_vm14 }
 0x17d   : > { %v316_v21 = vshll.u32 %v315_v11, 16  ;;  %vm670_vm11 = vmor %vm645_vm9, %vm662_vm10  ;;  %vm887_vm14 = vcmp.lt.s32.totalorder %v4234_v42, 3 }
 0x17e   : > { %v291_v16 = vadd.s32 %v290_v58, %v288_v62  ;;  %v277_v10 = vshll.u32 %v276_v61, 16  ;;  %vm360_vm1 = vcmp.eq.s32.totalorder %v304_v18, 7  ;;  %v678_v58 = vsel %vm670_vm11, 1, %v7292_v0 }
 0x17f   : > { %v368_v31 = vsel %vm360_vm1, %v4186_v3, 0.0  ;;  %v770_v59 = vsel %vm252_vm0, %v678_v58, 0  ;;  %v759_v62 = vshrl.u32 %v4413_v43, 16 }
 0x180   : > { %738 = vadd.xlane.f32.xlu1 %v735_v12  ;;  %736 = vadd.xlane.f32.xlu0 %v734_v13  ;;  %v365_v12 = vsel %vm357_vm8, %v4181_v2, 0.0  ;;  %v354_v13 = vcvt.f32.s32 %v4334_v33  ;;  %vm359_vm15 = vcmp.eq.s32.totalorder %v291_v16, 7  ;;  %v278_v14 = vadd.s32 %v277_v10, %v275_v17 }
 0x181   : > { %v367_v19 = vsel %vm359_vm15, %v4178_v1, 0.0  ;;  %v330_v33 = vadd.s32 %v329_v25, %v327_v27  ;;  %v771_v60 = vand.u32 65535, %v770_v59  ;;  %v761_v63 = vcvt.s32.f32 %v759_v62 }
 0x182   : > { %v355_v15 = vshll.u32 %v354_v13, 16  ;;  %vm358_vm2 = vcmp.eq.s32.totalorder %v278_v14, 7  ;;  %v772_v9 = vshrl.u32 %v770_v59, 16 }
 0x183   : > { %v366_v22 = vsel %vm358_vm2, %v4189_v4, 0.0  ;;  %vm362_vm3 = vcmp.eq.s32.totalorder %v330_v33, 7  ;;  %v773_v61 = vcvt.s32.f32 %v771_v60 }
 0x184   : > { %751 = vadd.xlane.f32.xlu1 %v748_v48  ;;  %749 = vadd.xlane.f32.xlu0 %v747_v50  ;;  %v342_v48 = vshll.u32 %v341_v29, 16  ;;  %v317_v50 = vadd.s32 %v316_v21, %v314_v20  ;;  %v356_v24 = vadd.s32 %v355_v15, %v353_v52  ;;  %v370_v55 = vsel %vm362_vm3, %v4194_v5, 0.0 }
 0x185   : > { %v774_v16 = vcvt.s32.f32 %v772_v9 }
 0x186   : > { %vm361_vm4 = vcmp.eq.s32.totalorder %v317_v50, 7  ;;  %vm364_vm5 = vcmp.eq.s32.totalorder %v356_v24, 7 }
 0x187   : > { %v369_v28 = vsel %vm361_vm4, %v4197_v6, 0.0  ;;  %v372_v26 = vsel %vm364_vm5, %v4202_v7, 0.0 }
 0x188   : > { %762 = vadd.xlane.f32.xlu0 %v760_v54  ;;  %v343_v54 = vadd.s32 %v342_v48, %v340_v53 }
 0x18a   : > { %vm363_vm6 = vcmp.eq.s32.totalorder %v343_v54, 7 }
 0x18b   : > { %v371_v56 = vsel %vm363_vm6, %v4205_v8, 0.0 }
 0x195   : > { %566 = vrot.lane.b32.xlu1 %v365_v12, %s4130_s16  ;;  %v4131_v12 = vmov 4  }
 0x199   : > { %570 = vrot.lane.b32.xlu1 %v367_v19, %s4130_s16 }
 0x19d   : > { %572 = vrot.lane.b32.xlu1 %v368_v31, %s4130_s16 }
 0x19e   : > { %568 = vrot.lane.b32.xlu0 %v366_v22, %s4130_s16 }
 0x1a1   : > { %576 = vrot.lane.b32.xlu1 %v370_v55, %s4130_s16 }
 0x1a2   : > { %574 = vrot.lane.b32.xlu0 %v369_v28, %s4130_s16 }
 0x1a5   : > { %580 = vrot.lane.b32.xlu1 %v372_v26, %s4130_s16 }
 0x1a6   : > { %578 = vrot.lane.b32.xlu0 %v371_v56, %s4130_s16 }
 0x1c5   : > { %775 = vadd.xlane.f32.xlu0 %v773_v61 }
 0x1c9   : > { %764 = vadd.xlane.f32.xlu1 %v761_v63 }
 0x1cd   : > { %777 = vadd.xlane.f32.xlu1 %v774_v16 }
 0x1db   : > { %844 = vperm.xlu0 %4053, %v4189_v4  }
 0x1de   : > { %840 = vperm.xlu1 %4052, %v4181_v2  }
 0x1df   : > { %856 = vperm.xlu0 %4053, %v4197_v6  }
 0x1e2   : > { %848 = vperm.xlu1 %4052, %v4178_v1  }
 0x1e3   : > { %864 = vperm.xlu0 %4053, %v4205_v8  }
 0x1e6   : > { %852 = vperm.xlu1 %4052, %v4186_v3  }
 0x1e7   : > { %4054 = vset.pattern.permute.xlu0 %v4131_v12 }
 0x1ea   : > { %860 = vperm.xlu1 %4052, %v4194_v5  }
 0x1ee   : > { %868 = vperm.xlu1 %4052, %v4202_v7  }
 0x1f2   : > { %4055 = vset.pattern.permute.xlu1 %v4131_v12 }
 0x1f9   : > { %v4463_v43 = vpop.xlane.xlu1 %684  ;;  %v4465_v10 = vpop.xlane.xlu0 %686 }
 0x1fd   : > { %v4467_v11 = vpop.xlane.xlu1 %699  ;;  %v4469_v23 = vpop.xlane.xlu0 %697 }
 0x201   : > { %v4471_v17 = vpop.xlane.xlu1 %712  ;;  %v4473_v25 = vpop.xlane.xlu0 %710 }
 0x205   : > { %v4475_v13 = vpop.xlane.xlu1 %725  ;;  %v4477_v18 = vpop.xlane.xlu0 %723 }
 0x209   : > { %v4479_v21 = vpop.xlane.xlu1 %738  ;;  %v4481_v29 = vpop.xlane.xlu0 %736 }
 0x20d   : > { %v4483_v14 = vpop.xlane.xlu1 %751  ;;  %v4485_v27 = vpop.xlane.xlu0 %749 }
 0x211   : > { %v4487_v20 = vpop.permute.xlu1 %566  ;;  %v4489_v19 = vpop.xlane.xlu0 %762 }
 0x215   : > { %v4491_v15 = vpop.permute.xlu1 %570  ;;  %v4493_v33 = vpop.permute.xlu0 %568 }
 0x219   : > { %v4495_v48 = vpop.permute.xlu1 %572  ;;  %v4497_v50 = vpop.permute.xlu0 %574 }
 0x21d   : > { %v4499_v52 = vpop.permute.xlu1 %576  ;;  %v4501_v53 = vpop.permute.xlu0 %578 }
 0x221   : > { %v4503_v31 = vpop.permute.xlu1 %580 }
 0x24e   : > { %v4505_v22 = vpop.xlane.xlu0 %775 }
 0x252   : > { %v4507_v24 = vpop.xlane.xlu1 %764 }
 0x256   : > { %v4509_v54 = vpop.xlane.xlu1 %777  ;;  %v845_v55 = vpop.permute.xlu0 %844 }
 0x257   : > { %vm872_vm12 = vcmp.lt.f32.partialorder %v4189_v4, %v845_v55  ;;  %vm880_vm13 = vcmp.eq.f32.partialorder %v4189_v4, %v845_v55 }
 0x258   : > { %vm889_vm8 = vmand %vm880_vm13, %vm887_vm14 }
 0x259   : > { %vm897_vm15 = vmor %vm872_vm12, %vm889_vm8 }
 0x25a   : > { %v841_v28 = vpop.permute.xlu1 %840  ;;  %v857_v26 = vpop.permute.xlu0 %856  ;;  %v905_v56 = vsel %vm897_vm15, 1, %v7292_v0 }
 0x25b   : > { %vm871_vm1 = vcmp.lt.f32.partialorder %v4181_v2, %v841_v28  ;;  %vm879_vm2 = vcmp.eq.f32.partialorder %v4181_v2, %v841_v28  ;;  %vm883_vm4 = vcmp.eq.f32.partialorder %v4197_v6, %v857_v26  ;;  %v925_v58 = vsel %vm252_vm0, %v905_v56, 0 }
 0x25c   : > { %vm888_vm3 = vmand %vm879_vm2, %vm887_vm14  ;;  %vm875_vm6 = vcmp.lt.f32.partialorder %v4197_v6, %v857_v26  ;;  %v926_v62 = vand.u32 65535, %v925_v58  ;;  %v927_v56 = vshrl.u32 %v925_v58, 16 }
 0x25d   : > { %vm896_vm5 = vmor %vm871_vm1, %vm888_vm3 }
 0x25e   : > { %v849_v57 = vpop.permute.xlu1 %848  ;;  %v904_v4 = vsel %vm896_vm5, 1, %v7292_v0  ;;  %vm892_vm7 = vmand %vm883_vm4, %vm887_vm14  ;;  %v865_v59 = vpop.permute.xlu0 %864  ;;  %v928_v28 = vcvt.s32.f32 %v926_v62 }
 0x25f   : > { %vm873_vm9 = vcmp.lt.f32.partialorder %v4178_v1, %v849_v57  ;;  %vm881_vm10 = vcmp.eq.f32.partialorder %v4178_v1, %v849_v57  ;;  %v912_v2 = vsel %vm252_vm0, %v904_v4, 0  ;;  %vm900_vm13 = vmor %vm875_vm6, %vm892_vm7  ;;  %vm885_vm1 = vcmp.eq.f32.partialorder %v4205_v8, %v865_v59 }
 0x260   : > { %vm890_vm11 = vmand %vm881_vm10, %vm887_vm14  ;;  %v914_v60 = vshrl.u32 %v912_v2, 16  ;;  %v913_v61 = vand.u32 65535, %v912_v2  ;;  %v908_v12 = vsel %vm900_vm13, 1, %v7292_v0  ;;  %vm877_vm4 = vcmp.lt.f32.partialorder %v4205_v8, %v865_v59 }
 0x261   : > { %vm898_vm12 = vmor %vm873_vm9, %vm890_vm11 }
 0x262   : > { %v906_v6 = vsel %vm898_vm12, 1, %v7292_v0  ;;  %v853_v63 = vpop.permute.xlu1 %852  ;;  %v916_v9 = vcvt.s32.f32 %v914_v60  ;;  %v915_v1 = vcvt.s32.f32 %v913_v61  ;;  %vm894_vm5 = vmand %vm885_vm1, %vm887_vm14  ;;  %v964_v60 = vsel %vm252_vm0, %v908_v12, 0 }
 0x263   : > { %vm874_vm8 = vcmp.lt.f32.partialorder %v4186_v3, %v853_v63  ;;  %vm882_vm15 = vcmp.eq.f32.partialorder %v4186_v3, %v853_v63  ;;  %v938_v16 = vsel %vm252_vm0, %v906_v6, 0  ;;  %vm902_vm11 = vmor %vm877_vm4, %vm894_vm5  ;;  %v965_v63 = vand.u32 65535, %v964_v60 }
 0x264   : > { %vm891_vm2 = vmand %vm882_vm15, %vm887_vm14  ;;  %919 = vadd.xlane.f32.xlu1 %v916_v9  ;;  %917 = vadd.xlane.f32.xlu0 %v915_v1  ;;  %v939_v55 = vand.u32 65535, %v938_v16  ;;  %v940_v6 = vshrl.u32 %v938_v16, 16  ;;  %v910_v1 = vsel %vm902_vm11, 1, %v7292_v0 }
 0x265   : > { %vm899_vm3 = vmor %vm874_vm8, %vm891_vm2  ;;  %v967_v59 = vcvt.s32.f32 %v965_v63 }
 0x266   : > { %v907_v3 = vsel %vm899_vm3, 1, %v7292_v0  ;;  %v861_v26 = vpop.permute.xlu1 %860  ;;  %v941_v57 = vcvt.s32.f32 %v939_v55  ;;  %v942_v8 = vcvt.s32.f32 %v940_v6 }
 0x267   : > { %vm876_vm6 = vcmp.lt.f32.partialorder %v4194_v5, %v861_v26  ;;  %vm884_vm7 = vcmp.eq.f32.partialorder %v4194_v5, %v861_v26  ;;  %v951_v4 = vsel %vm252_vm0, %v907_v3, 0  ;;  %v929_v5 = vcvt.s32.f32 %v927_v56 }
 0x268   : > { %vm893_vm9 = vmand %vm884_vm7, %vm887_vm14  ;;  %v952_v2 = vand.u32 65535, %v951_v4  ;;  %943 = vadd.xlane.f32.xlu1 %v941_v57  ;;  %930 = vadd.xlane.f32.xlu0 %v928_v28  ;;  %v953_v12 = vshrl.u32 %v951_v4, 16  ;;  %v990_v28 = vsel %vm252_vm0, %v910_v1, 0  ;;  %v966_v26 = vshrl.u32 %v964_v60, 16 }
 0x269   : > { %vm901_vm10 = vmor %vm876_vm6, %vm893_vm9  ;;  %v991_v56 = vand.u32 65535, %v990_v28  ;;  %v992_v6 = vshrl.u32 %v990_v28, 16  ;;  %v469_v60 = vcvt.f32.s32 %v4342_v37  ;;  %v508_v28 = vcvt.f32.s32 %v4354_v45 }
 0x26a   : > { %v909_v58 = vsel %vm901_vm10, 1, %v7292_v0  ;;  %v869_v61 = vpop.permute.xlu1 %868  ;;  %v954_v62 = vcvt.s32.f32 %v952_v2  ;;  %v955_v16 = vcvt.s32.f32 %v953_v12  ;;  %v968_v2 = vcvt.s32.f32 %v966_v26 }
 0x26b   : > { %vm878_vm12 = vcmp.lt.f32.partialorder %v4202_v7, %v869_v61  ;;  %vm886_vm13 = vcmp.eq.f32.partialorder %v4202_v7, %v869_v61  ;;  %v977_v9 = vsel %vm252_vm0, %v909_v58, 0  ;;  %v993_v58 = vcvt.s32.f32 %v991_v56 }
 0x26c   : > { %vm895_vm8 = vmand %vm886_vm13, %vm887_vm14  ;;  %956 = vadd.xlane.f32.xlu1 %v954_v62  ;;  %932 = vadd.xlane.f32.xlu0 %v929_v5  ;;  %v978_v55 = vand.u32 65535, %v977_v9  ;;  %v979_v61 = vshrl.u32 %v977_v9, 16  ;;  %v994_v63 = vcvt.s32.f32 %v992_v6  ;;  %v482_v12 = vcvt.f32.s32 %v4346_v39  ;;  %v4575_v39 = vld [vmem:[%s4175_s15 + $0x8] sm:$0xff] }
 0x26d   : > { %vm903_vm15 = vmor %vm878_vm12, %vm895_vm8  ;;  %v468_v9 = vcvt.f32.s32 %v4332_v32  ;;  %v509_v26 = vshll.u32 %v508_v28, 16  ;;  %v534_v56 = vcvt.f32.s32 %v4361_v49  ;;  %v507_v45 = vcvt.f32.s32 %v4344_v38 }
 0x26e   : > { %v911_v7 = vsel %vm903_vm15, 1, %v7292_v0  ;;  %v980_v3 = vcvt.s32.f32 %v978_v55  ;;  %v981_v4 = vcvt.s32.f32 %v979_v61  ;;  %v495_v49 = vcvt.f32.s32 %v4350_v41 }
 0x26f   : > { %v1003_v57 = vsel %vm252_vm0, %v911_v7, 0  ;;  %v483_v7 = vshll.u32 %v482_v12, 16  ;;  %v455_v38 = vcvt.f32.s32 %v4328_v30  ;;  %v4651_v12 = vld [vmem:[%s4175_s15 + $0x28] sm:$0xff]  ;;  %vm1120_vm10 = vcmp.lt.s32.totalorder %v4234_v42, 4 }
 0x270   : > { %945 = vadd.xlane.f32.xlu0 %v942_v8  ;;  %969 = vadd.xlane.f32.xlu1 %v967_v59  ;;  %v1004_v62 = vand.u32 65535, %v1003_v57  ;;  %v1005_v1 = vshrl.u32 %v1003_v57, 16  ;;  %v470_v59 = vshll.u32 %v469_v60, 16  ;;  %v535_v57 = vshll.u32 %v534_v56, 16 }
 0x271   : > { %v496_v41 = vshll.u32 %v495_v49, 16  ;;  %v520_v60 = vcvt.f32.s32 %v4348_v40 }
 0x272   : > { %v1006_v5 = vcvt.s32.f32 %v1004_v62  ;;  %v1007_v8 = vcvt.s32.f32 %v1005_v1  ;;  %v4565_v55 = vadd.s32 %v470_v59, %v468_v9  ;;  %v4625_v1 = vld [vmem:[%s4175_s15] sm:$0xff] }
 0x274   : > { %958 = vadd.xlane.f32.xlu0 %v955_v16  ;;  %982 = vadd.xlane.f32.xlu1 %v980_v3  ;;  %7453 = vst [vmem:[#allocation2_spill] sm:$0xff] %v4565_v55  ;;  %v481_v16 = vcvt.f32.s32 %v4336_v34  ;;  %v456_v3 = vcvt.f32.s32 %v4338_v35  ;;  %vm7284_vm14 = vcmp.eq.s32.totalorder %v4565_v55, 7  ;;  %v4583_v35 = vadd.s32 %v509_v26, %v507_v45 }
 0x275   : > { %v591_v32 = vsel %vm7284_vm14, %v4575_v39, %v4493_v33 }
 0x276   : > { %v4570_v37 = vadd.s32 %v483_v7, %v481_v16  ;;  %v457_v34 = vshll.u32 %v456_v3, 16  ;;  %7455 = vst [vmem:[#allocation4_spill] sm:$0xff] %v4583_v35  ;;  %vm7283_vm2 = vcmp.eq.s32.totalorder %v4583_v35, 7 }
 0x278   : > { %971 = vadd.xlane.f32.xlu0 %v968_v2  ;;  %995 = vadd.xlane.f32.xlu1 %v993_v58  ;;  %7454 = vst [vmem:[#allocation3_spill] sm:$0xff] %v4570_v37  ;;  %vm7285_vm1 = vcmp.eq.s32.totalorder %v4570_v37, 7  ;;  %v4588_v2 = vld [vmem:[%s4175_s15 + $0x10] sm:$0xff]  ;;  %v533_v58 = vcvt.f32.s32 %v4352_v44  ;;  %v4597_v61 = vadd.s32 %v457_v34, %v455_v38  ;;  %v494_v44 = vcvt.f32.s32 %v4340_v36 }
 0x279   : > { %v592_v33 = vsel %vm7285_vm1, %v4588_v2, %v4491_v15 }
 0x27a   : > { %7456 = vst [vmem:[#allocation5_spill] sm:$0xff] %v4597_v61  ;;  %v4599_v62 = vadd.s32 %v535_v57, %v533_v58  ;;  %vm7286_vm3 = vcmp.eq.s32.totalorder %v4597_v61, 7  ;;  %v4614_v15 = vadd.s32 %v496_v41, %v494_v44 }
 0x27b   : > { %v590_v36 = vsel %vm7286_vm3, %v4625_v1, %v4487_v20  ;;  %v546_v20 = vcvt.f32.s32 %v4356_v46  ;;  %v4661_v46 = vld [vmem:[%s4175_s15 + $0x38] sm:$0xff] }
 0x27c   : > { %984 = vadd.xlane.f32.xlu0 %v981_v4  ;;  %1008 = vadd.xlane.f32.xlu1 %v1006_v5  ;;  %7457 = vst [vmem:[#allocation6_spill] sm:$0xff] %v4599_v62  ;;  %v521_v4 = vcvt.f32.s32 %v4358_v47  ;;  %v4604_v5 = vld [vmem:[%s4175_s15 + $0x20] sm:$0xff]  ;;  %vm7282_vm4 = vcmp.eq.s32.totalorder %v4599_v62, 7  ;;  %7458 = vst [vmem:[#allocation7_spill] sm:$0xff] %v4614_v15  ;;  %v547_v47 = vcvt.f32.s32 %v4368_v51  ;;  %vm553_vm5 = vcmp.eq.s32.totalorder %v4614_v15, 7 }
 0x27d   : > { %v594_v30 = vsel %vm7283_vm2, %v4604_v5, %v4497_v50 }
 0x27e   : > { %v522_v6 = vshll.u32 %v521_v4, 16 }
 0x280   : > { %997 = vadd.xlane.f32.xlu0 %v994_v63  ;;  %v4618_v63 = vld [vmem:[%s4175_s15 + $0x30] sm:$0xff]  ;;  %v4634_v51 = vadd.s32 %v522_v6, %v520_v60 }
 0x281   : > { %v596_v50 = vsel %vm7282_vm4, %v4618_v63, %v4501_v53  ;;  %v4638_v53 = vld [vmem:[%s4175_s15 + $0x18] sm:$0xff] }
 0x282   : > { %7459 = vst [vmem:[#allocation8_spill] sm:$0xff] %v4634_v51  ;;  %v593_v59 = vsel %vm553_vm5, %v4638_v53, %v4495_v48  ;;  %vm555_vm6 = vcmp.eq.s32.totalorder %v4634_v51, 7 }
 0x283   : > { %v595_v9 = vsel %vm555_vm6, %v4651_v12, %v4499_v52  ;;  %v4132_v52 = vmov 5  }
 0x284   : > { %1010 = vadd.xlane.f32.xlu0 %v1007_v8  ;;  %v548_v8 = vshll.u32 %v547_v47, 16 }
 0x286   : > { %v4647_v40 = vadd.s32 %v548_v8, %v546_v20 }
 0x288   : > { %7460 = vst [vmem:[#allocation9_spill] sm:$0xff] %v4647_v40  ;;  %vm7319_vm7 = vcmp.eq.s32.totalorder %v4647_v40, 7 }
 0x289   : > { %v597_v48 = vsel %vm7319_vm7, %v4661_v46, %v4503_v31 }
 0x28d   : > { %801 = vrot.lane.b32.xlu1 %v591_v32, %s4130_s16 }
 0x291   : > { %803 = vrot.lane.b32.xlu1 %v592_v33, %s4130_s16 }
 0x295   : > { %807 = vrot.lane.b32.xlu1 %v594_v30, %s4130_s16 }
 0x299   : > { %811 = vrot.lane.b32.xlu1 %v596_v50, %s4130_s16 }
 0x29a   : > { %799 = vrot.lane.b32.xlu0 %v590_v36, %s4130_s16 }
 0x29d   : > { %1077 = vperm.xlu1 %4055, %v4575_v39  }
 0x29e   : > { %805 = vrot.lane.b32.xlu0 %v593_v59, %s4130_s16 }
 0x2a1   : > { %1081 = vperm.xlu1 %4055, %v4588_v2  }
 0x2a2   : > { %809 = vrot.lane.b32.xlu0 %v595_v9, %s4130_s16 }
 0x2a5   : > { %1089 = vperm.xlu1 %4055, %v4604_v5  }
 0x2a6   : > { %813 = vrot.lane.b32.xlu0 %v597_v48, %s4130_s16 }
 0x2a9   : > { %1097 = vperm.xlu1 %4055, %v4618_v63  }
 0x2aa   : > { %1073 = vperm.xlu0 %4054, %v4625_v1  }
 0x2ad   : > { %4056 = vset.pattern.permute.xlu1 %v4132_v52 }
 0x2ae   : > { %1085 = vperm.xlu0 %4054, %v4638_v53  }
 0x2b2   : > { %1093 = vperm.xlu0 %4054, %v4651_v12  }
 0x2b6   : > { %1101 = vperm.xlu0 %4054, %v4661_v46  }
 0x2ba   : > { %4057 = vset.pattern.permute.xlu0 %v4132_v52 }
 0x2ed   : > { %v4674_v7 = vpop.xlane.xlu1 %919  ;;  %v4676_v31 = vpop.xlane.xlu0 %917 }
 0x2f1   : > { %v4678_v28 = vpop.xlane.xlu1 %943  ;;  %v4680_v16 = vpop.xlane.xlu0 %930 }
 0x2f5   : > { %v4682_v3 = vpop.xlane.xlu1 %956  ;;  %v4684_v26 = vpop.xlane.xlu0 %932 }
 0x2f9   : > { %v4686_v56 = vpop.xlane.xlu1 %969  ;;  %v4688_v32 = vpop.xlane.xlu0 %945 }
 0x2fd   : > { %v4690_v45 = vpop.xlane.xlu1 %982  ;;  %v4692_v34 = vpop.xlane.xlu0 %958 }
 0x2fe   : > { %7461 = vst [vmem:[#allocation10_spill] sm:$0xff] %v4690_v45 }
 0x301   : > { %v4694_v57 = vpop.xlane.xlu1 %995  ;;  %v4696_v49 = vpop.xlane.xlu0 %971 }
 0x302   : > { %7462 = vst [vmem:[#allocation11_spill] sm:$0xff] %v4694_v57 }
 0x305   : > { %v4698_v33 = vpop.xlane.xlu1 %1008  ;;  %v4700_v38 = vpop.xlane.xlu0 %984 }
 0x306   : > { %7463 = vst [vmem:[#allocation12_spill] sm:$0xff] %v4698_v33 }
 0x309   : > { %v4702_v58 = vpop.permute.xlu1 %801  ;;  %v4704_v41 = vpop.xlane.xlu0 %997 }
 0x30d   : > { %v4706_v4 = vpop.permute.xlu1 %803  ;;  %v4708_v30 = vpop.xlane.xlu0 %1010 }
 0x311   : > { %v4710_v44 = vpop.permute.xlu1 %807  ;;  %v4712_v6 = vpop.permute.xlu0 %799 }
 0x315   : > { %v4714_v47 = vpop.permute.xlu1 %811  ;;  %v4716_v50 = vpop.permute.xlu0 %805 }
 0x319   : > { %v1078_v36 = vpop.permute.xlu1 %1077  ;;  %v4718_v60 = vpop.permute.xlu0 %809 }
 0x31a   : > { %vm1113_vm9 = vcmp.eq.f32.partialorder %v4575_v39, %v1078_v36  ;;  %vm1105_vm11 = vcmp.lt.f32.partialorder %v4575_v39, %v1078_v36 }
 0x31b   : > { %vm1122_vm12 = vmand %vm1113_vm9, %vm1120_vm10 }
 0x31c   : > { %vm1130_vm8 = vmor %vm1105_vm11, %vm1122_vm12 }
 0x31d   : > { %v1082_v8 = vpop.permute.xlu1 %1081  ;;  %v4726_v59 = vpop.permute.xlu0 %813  ;;  %v1138_v20 = vsel %vm1130_vm8, 1, %v7292_v0 }
 0x31e   : > { %vm1114_vm13 = vcmp.eq.f32.partialorder %v4588_v2, %v1082_v8  ;;  %vm1106_vm15 = vcmp.lt.f32.partialorder %v4588_v2, %v1082_v8  ;;  %v1158_v52 = vsel %vm252_vm0, %v1138_v20, 0 }
 0x31f   : > { %vm1123_vm4 = vmand %vm1114_vm13, %vm1120_vm10  ;;  %v1159_v37 = vand.u32 65535, %v1158_v52  ;;  %v1160_v61 = vshrl.u32 %v1158_v52, 16 }
 0x320   : > { %vm1131_vm2 = vmor %vm1106_vm15, %vm1123_vm4 }
 0x321   : > { %v1090_v48 = vpop.permute.xlu1 %1089  ;;  %v1139_v62 = vsel %vm1131_vm2, 1, %v7292_v0  ;;  %v1162_v52 = vcvt.s32.f32 %v1160_v61 }
 0x322   : > { %vm1116_vm1 = vcmp.eq.f32.partialorder %v4604_v5, %v1090_v48  ;;  %vm1108_vm2 = vcmp.lt.f32.partialorder %v4604_v5, %v1090_v48  ;;  %v1171_v15 = vsel %vm252_vm0, %v1139_v62, 0 }
 0x323   : > { %vm4742_vm4 = vmand %vm1116_vm1, %vm1120_vm10  ;;  %v1172_v57 = vand.u32 65535, %v1171_v15  ;;  %v1173_v48 = vshrl.u32 %v1171_v15, 16 }
 0x324   : > { %vm1133_vm8 = vmor %vm1108_vm2, %vm4742_vm4 }
 0x325   : > { %v1074_v9 = vpop.permute.xlu0 %1073 }
 0x326   : > { %vm1104_vm14 = vcmp.lt.f32.partialorder %v4625_v1, %v1074_v9  ;;  %vm1112_vm9 = vcmp.eq.f32.partialorder %v4625_v1, %v1074_v9 }
 0x327   : > { %vm1121_vm3 = vmand %vm1112_vm9, %vm1120_vm10 }
 0x328   : > { %vm1129_vm11 = vmor %vm1104_vm14, %vm1121_vm3 }
 0x329   : > { %v1137_v36 = vsel %vm1129_vm11, 1, %v7292_v0  ;;  %v1086_v8 = vpop.permute.xlu0 %1085 }
 0x32a   : > { %vm1107_vm12 = vcmp.lt.f32.partialorder %v4638_v53, %v1086_v8  ;;  %vm1115_vm13 = vcmp.eq.f32.partialorder %v4638_v53, %v1086_v8  ;;  %v1145_v9 = vsel %vm252_vm0, %v1137_v36, 0  ;;  %v1098_v36 = vpop.permute.xlu1 %1097  ;;  %v7466_v8 = vmov 0  }
 0x32b   : > { %vm1124_vm14 = vmand %vm1115_vm13, %vm1120_vm10  ;;  %v1147_v20 = vshrl.u32 %v1145_v9, 16  ;;  %v1146_v55 = vand.u32 65535, %v1145_v9  ;;  %v1161_v9 = vcvt.s32.f32 %v1159_v37  ;;  %vm1118_vm11 = vcmp.eq.f32.partialorder %v4618_v63, %v1098_v36 }
 0x32c   : > { %vm1132_vm3 = vmor %vm1107_vm12, %vm1124_vm14  ;;  %v1175_v37 = vcvt.s32.f32 %v1173_v48  ;;  %vm1110_vm12 = vcmp.lt.f32.partialorder %v4618_v63, %v1098_v36 }
 0x32d   : > { %v1094_v0 = vpop.permute.xlu0 %1093  ;;  %v1149_v40 = vcvt.s32.f32 %v1147_v20  ;;  %v1148_v51 = vcvt.s32.f32 %v1146_v55  ;;  %v1140_v33 = vsel %vm1132_vm3, 1, %v7466_v8  ;;  %v1141_v55 = vsel %vm1133_vm8, 1, %v7466_v8  ;;  %vm1127_vm13 = vmand %vm1118_vm11, %vm1120_vm10 }
 0x32e   : > { %vm1117_vm1 = vcmp.eq.f32.partialorder %v4651_v12, %v1094_v0  ;;  %vm1109_vm15 = vcmp.lt.f32.partialorder %v4651_v12, %v1094_v0  ;;  %v1184_v35 = vsel %vm252_vm0, %v1140_v33, 0  ;;  %v1197_v15 = vsel %vm252_vm0, %v1141_v55, 0  ;;  %vm1135_vm2 = vmor %vm1110_vm12, %vm1127_vm13 }
 0x32f   : > { %1152 = vadd.xlane.f32.xlu0 %v1149_v40  ;;  %1150 = vadd.xlane.f32.xlu1 %v1148_v51  ;;  %vm1126_vm9 = vmand %vm1117_vm1, %vm1120_vm10  ;;  %v1174_v51 = vcvt.s32.f32 %v1172_v57  ;;  %v1186_v0 = vshrl.u32 %v1184_v35, 16  ;;  %v1185_v61 = vand.u32 65535, %v1184_v35  ;;  %v1199_v33 = vshrl.u32 %v1197_v15, 16 }
 0x330   : > { %vm1134_vm4 = vmor %vm1109_vm15, %vm1126_vm9  ;;  %v1198_v36 = vand.u32 65535, %v1197_v15 }
 0x331   : > { %v1102_v62 = vpop.permute.xlu0 %1101  ;;  %v1142_v40 = vsel %vm1134_vm4, 1, %v7466_v8  ;;  %v1188_v57 = vcvt.s32.f32 %v1186_v0  ;;  %v1187_v20 = vcvt.s32.f32 %v1185_v61  ;;  %v1201_v48 = vcvt.s32.f32 %v1199_v33 }
 0x332   : > { %vm1119_vm14 = vcmp.eq.f32.partialorder %v4661_v46, %v1102_v62  ;;  %vm1111_vm3 = vcmp.lt.f32.partialorder %v4661_v46, %v1102_v62  ;;  %v1200_v55 = vcvt.s32.f32 %v1198_v36 }
 0x333   : > { %1163 = vadd.xlane.f32.xlu0 %v1161_v9  ;;  %1165 = vadd.xlane.f32.xlu1 %v1162_v52  ;;  %vm1128_vm1 = vmand %vm1119_vm14, %vm1120_vm10  ;;  %v1210_v9 = vsel %vm252_vm0, %v1142_v40, 0  ;;  %v1143_v52 = vsel %vm1135_vm2, 1, %v7466_v8  ;;  %vm1353_vm2 = vcmp.lt.s32.totalorder %v4234_v42, 5 }
 0x334   : > { %vm1136_vm8 = vmor %vm1111_vm3, %vm1128_vm1  ;;  %v1212_v35 = vshrl.u32 %v1210_v9, 16 }
 0x335   : > { %v1144_v62 = vsel %vm1136_vm8, 1, %v7466_v8 }
 0x336   : > { %v1214_v0 = vcvt.s32.f32 %v1212_v35  ;;  %v1236_v40 = vsel %vm252_vm0, %v1144_v62, 0  ;;  %v715_v35 = vcvt.f32.s32 %v4471_v17 }
 0x337   : > { %1176 = vadd.xlane.f32.xlu0 %v1174_v51  ;;  %1178 = vadd.xlane.f32.xlu1 %v1175_v37  ;;  %v1211_v51 = vand.u32 65535, %v1210_v9  ;;  %v1223_v37 = vsel %vm252_vm0, %v1143_v52, 0  ;;  %v1238_v33 = vshrl.u32 %v1236_v40, 16  ;;  %v1237_v36 = vand.u32 65535, %v1236_v40 }
 0x338   : > { %v1225_v15 = vshrl.u32 %v1223_v37, 16  ;;  %v1224_v45 = vand.u32 65535, %v1223_v37  ;;  %v688_v37 = vcvt.f32.s32 %v4463_v43  ;;  %v714_v40 = vcvt.f32.s32 %v4473_v25 }
 0x339   : > { %v1213_v61 = vcvt.s32.f32 %v1211_v51  ;;  %v1240_v9 = vcvt.s32.f32 %v1238_v33  ;;  %v1239_v52 = vcvt.s32.f32 %v1237_v36  ;;  %v702_v51 = vcvt.f32.s32 %v4467_v11 }
 0x33a   : > { %v754_v11 = vcvt.f32.s32 %v4483_v14  ;;  %v780_v36 = vcvt.f32.s32 %v4509_v54  ;;  %v766_v54 = vcvt.f32.s32 %v4489_v19 }
 0x33b   : > { %1191 = vadd.xlane.f32.xlu1 %v1188_v57  ;;  %1189 = vadd.xlane.f32.xlu0 %v1187_v20  ;;  %v1227_v57 = vcvt.s32.f32 %v1225_v15  ;;  %v1226_v20 = vcvt.s32.f32 %v1224_v45  ;;  %v716_v45 = vshll.u32 %v715_v35, 16  ;;  %v741_v15 = vcvt.f32.s32 %v4479_v21 }
 0x33c   : > { %v727_v21 = vcvt.f32.s32 %v4477_v18  ;;  %v755_v33 = vshll.u32 %v754_v11, 16 }
 0x33f   : > { %1204 = vadd.xlane.f32.xlu1 %v1201_v48  ;;  %1202 = vadd.xlane.f32.xlu0 %v1200_v55  ;;  %v689_v48 = vcvt.f32.s32 %v4465_v10  ;;  %v701_v10 = vcvt.f32.s32 %v4469_v23  ;;  %v740_v23 = vcvt.f32.s32 %v4481_v29  ;;  %v753_v29 = vcvt.f32.s32 %v4485_v27 }
 0x341   : > { %v690_v55 = vshll.u32 %v689_v48, 16  ;;  %v781_v48 = vshll.u32 %v780_v36, 16 }
 0x343   : > { %1217 = vadd.xlane.f32.xlu1 %v1214_v0  ;;  %1215 = vadd.xlane.f32.xlu0 %v1213_v61  ;;  %v4781_v62 = vadd.s32 %v690_v55, %v688_v37  ;;  %v728_v0 = vcvt.f32.s32 %v4475_v13  ;;  %v703_v61 = vshll.u32 %v702_v51, 16  ;;  %v767_v13 = vcvt.f32.s32 %v4507_v24 }
 0x345   : > { %7467 = vst [vmem:[#allocation13_spill] sm:$0xff] %v4781_v62  ;;  %v729_v17 = vshll.u32 %v728_v0, 16  ;;  %vm7298_vm10 = vcmp.eq.s32.totalorder %v4781_v62, 7  ;;  %v4792_v43 = vadd.s32 %v703_v61, %v701_v10 }
 0x346   : > { %v823_v25 = vsel %vm7298_vm10, %v4625_v1, %v4712_v6 }
 0x347   : > { %1230 = vadd.xlane.f32.xlu1 %v1227_v57  ;;  %1228 = vadd.xlane.f32.xlu0 %v1226_v20  ;;  %v4788_v57 = vadd.s32 %v716_v45, %v714_v40  ;;  %7469 = vst [vmem:[#allocation15_spill] sm:$0xff] %v4792_v43  ;;  %v742_v20 = vshll.u32 %v741_v15, 16  ;;  %v4803_v14 = vadd.s32 %v729_v17, %v727_v21  ;;  %vm7301_vm9 = vcmp.eq.s32.totalorder %v4792_v43, 7 }
 0x348   : > { %v824_v6 = vsel %vm7301_vm9, %v4575_v39, %v4702_v58  ;;  %v779_v58 = vcvt.f32.s32 %v4505_v22 }
 0x349   : > { %7468 = vst [vmem:[#allocation14_spill] sm:$0xff] %v4788_v57  ;;  %7470 = vst [vmem:[#allocation16_spill] sm:$0xff] %v4803_v14  ;;  %vm7300_vm15 = vcmp.eq.s32.totalorder %v4788_v57, 7  ;;  %v4807_v24 = vadd.s32 %v742_v20, %v740_v23  ;;  %vm786_vm11 = vcmp.eq.s32.totalorder %v4803_v14, 7 }
 0x34a   : > { %v825_v18 = vsel %vm7300_vm15, %v4588_v2, %v4706_v4  ;;  %v826_v27 = vsel %vm786_vm11, %v4638_v53, %v4716_v50  ;;  %v4839_v4 = vadd.s32 %v781_v48, %v779_v58 }
 0x34b   : > { %1243 = vadd.xlane.f32.xlu1 %v1240_v9  ;;  %1241 = vadd.xlane.f32.xlu0 %v1239_v52  ;;  %7471 = vst [vmem:[#allocation17_spill] sm:$0xff] %v4807_v24  ;;  %v768_v9 = vshll.u32 %v767_v13, 16  ;;  %v4822_v52 = vadd.s32 %v755_v33, %v753_v29  ;;  %vm7299_vm4 = vcmp.eq.s32.totalorder %v4807_v24, 7 }
 0x34c   : > { %v827_v19 = vsel %vm7299_vm4, %v4604_v5, %v4710_v44  ;;  %7474 = vst [vmem:[#allocation20_spill] sm:$0xff] %v4839_v4  ;;  %vm7302_vm14 = vcmp.eq.s32.totalorder %v4839_v4, 7 }
 0x34d   : > { %7472 = vst [vmem:[#allocation18_spill] sm:$0xff] %v4822_v52  ;;  %v4825_v55 = vadd.s32 %v768_v9, %v766_v54  ;;  %vm7303_vm12 = vcmp.eq.s32.totalorder %v4822_v52, 7  ;;  %v830_v50 = vsel %vm7302_vm14, %v4661_v46, %v4726_v59 }
 0x34e   : > { %v828_v22 = vsel %vm7303_vm12, %v4651_v12, %v4718_v60 }
 0x34f   : > { %7473 = vst [vmem:[#allocation19_spill] sm:$0xff] %v4825_v55  ;;  %vm7297_vm13 = vcmp.eq.s32.totalorder %v4825_v55, 7 }
 0x350   : > { %v829_v44 = vsel %vm7297_vm13, %v4618_v63, %v4714_v47  ;;  %v4133_v47 = vmov 6  }
 0x35c   : > { %1306 = vperm.xlu1 %4056, %v4625_v1  }
 0x360   : > { %1032 = vrot.lane.b32.xlu1 %v823_v25, %s4130_s16 }
 0x361   : > { %1310 = vperm.xlu0 %4057, %v4575_v39  }
 0x364   : > { %1036 = vrot.lane.b32.xlu1 %v825_v18, %s4130_s16 }
 0x365   : > { %1034 = vrot.lane.b32.xlu0 %v824_v6, %s4130_s16 }
 0x368   : > { %1038 = vrot.lane.b32.xlu1 %v826_v27, %s4130_s16 }
 0x369   : > { %1040 = vrot.lane.b32.xlu0 %v827_v19, %s4130_s16 }
 0x36c   : > { %1042 = vrot.lane.b32.xlu1 %v828_v22, %s4130_s16 }
 0x36d   : > { %1044 = vrot.lane.b32.xlu0 %v829_v44, %s4130_s16 }
 0x370   : > { %1046 = vrot.lane.b32.xlu1 %v830_v50, %s4130_s16 }
 0x371   : > { %1322 = vperm.xlu0 %4057, %v4604_v5  }
 0x374   : > { %1314 = vperm.xlu1 %4056, %v4588_v2  }
 0x375   : > { %1330 = vperm.xlu0 %4057, %v4618_v63  }
 0x378   : > { %1318 = vperm.xlu1 %4056, %v4638_v53  }
 0x379   : > { %4058 = vset.pattern.permute.xlu0 %v4133_v47 }
 0x37c   : > { %1326 = vperm.xlu1 %4056, %v4651_v12  }
 0x380   : > { %1334 = vperm.xlu1 %4056, %v4661_v46  }
 0x384   : > { %4059 = vset.pattern.permute.xlu1 %v4133_v47 }
 0x3b8   : > { %v4865_v60 = vpop.xlane.xlu1 %1150  ;;  %v4867_v59 = vpop.xlane.xlu0 %1152 }
 0x3bc   : > { %v4869_v35 = vpop.xlane.xlu1 %1165  ;;  %v4871_v51 = vpop.xlane.xlu0 %1163 }
 0x3c0   : > { %v4873_v37 = vpop.xlane.xlu1 %1178  ;;  %v4875_v45 = vpop.xlane.xlu0 %1176 }
 0x3c4   : > { %v4877_v0 = vpop.xlane.xlu1 %1191  ;;  %v4879_v61 = vpop.xlane.xlu0 %1189 }
 0x3c8   : > { %v4881_v15 = vpop.xlane.xlu1 %1204  ;;  %v4883_v40 = vpop.xlane.xlu0 %1202 }
 0x3cc   : > { %v4885_v10 = vpop.xlane.xlu1 %1217  ;;  %v4887_v17 = vpop.xlane.xlu0 %1215 }
 0x3d0   : > { %v4889_v11 = vpop.xlane.xlu1 %1230  ;;  %v4891_v20 = vpop.xlane.xlu0 %1228 }
 0x3d4   : > { %v4893_v13 = vpop.xlane.xlu1 %1243  ;;  %v4896_v25 = vpop.xlane.xlu0 %1241 }
 0x3d8   : > { %v1307_v21 = vpop.permute.xlu1 %1306 }
 0x3d9   : > { %vm1337_vm3 = vcmp.lt.f32.partialorder %v4625_v1, %v1307_v21  ;;  %vm1345_vm1 = vcmp.eq.f32.partialorder %v4625_v1, %v1307_v21 }
 0x3da   : > { %vm1354_vm8 = vmand %vm1345_vm1, %vm1353_vm2 }
 0x3db   : > { %vm1362_vm13 = vmor %vm1337_vm3, %vm1354_vm8 }
 0x3dc   : > { %v1370_v23 = vsel %vm1362_vm13, 1, %v7466_v8  ;;  %v4903_v33 = vpop.permute.xlu1 %1032  ;;  %v1311_v36 = vpop.permute.xlu0 %1310 }
 0x3dd   : > { %vm1338_vm10 = vcmp.lt.f32.partialorder %v4575_v39, %v1311_v36  ;;  %vm1346_vm4 = vcmp.eq.f32.partialorder %v4575_v39, %v1311_v36  ;;  %v1378_v9 = vsel %vm252_vm0, %v1370_v23, 0 }
 0x3de   : > { %vm1355_vm15 = vmand %vm1346_vm4, %vm1353_vm2  ;;  %v1380_v18 = vshrl.u32 %v1378_v9, 16  ;;  %v1379_v29 = vand.u32 65535, %v1378_v9 }
 0x3df   : > { %vm1363_vm9 = vmor %vm1338_vm10, %vm1355_vm15 }
 0x3e0   : > { %v1371_v6 = vsel %vm1363_vm9, 1, %v7466_v8  ;;  %v4911_v54 = vpop.permute.xlu1 %1036  ;;  %v4913_v48 = vpop.permute.xlu0 %1034  ;;  %v1382_v27 = vcvt.s32.f32 %v1380_v18  ;;  %v1381_v58 = vcvt.s32.f32 %v1379_v29 }
 0x3e1   : > { %v1391_v19 = vsel %vm252_vm0, %v1371_v6, 0 }
 0x3e2   : > { %1385 = vadd.xlane.f32.xlu1 %v1382_v27  ;;  %1383 = vadd.xlane.f32.xlu0 %v1381_v58  ;;  %v1392_v22 = vand.u32 65535, %v1391_v19  ;;  %v1393_v44 = vshrl.u32 %v1391_v19, 16 }
 0x3e4   : > { %v4916_v50 = vpop.permute.xlu1 %1038  ;;  %v4918_v47 = vpop.permute.xlu0 %1040  ;;  %v1394_v21 = vcvt.s32.f32 %v1392_v22  ;;  %v1395_v23 = vcvt.s32.f32 %v1393_v44 }
 0x3e6   : > { %1396 = vadd.xlane.f32.xlu0 %v1394_v21 }
 0x3e8   : > { %v4920_v36 = vpop.permute.xlu1 %1042  ;;  %v4922_v9 = vpop.permute.xlu0 %1044 }
 0x3ea   : > { %1398 = vadd.xlane.f32.xlu0 %v1395_v23 }
 0x3ec   : > { %v4924_v18 = vpop.permute.xlu1 %1046  ;;  %v1323_v29 = vpop.permute.xlu0 %1322 }
 0x3ed   : > { %vm1349_vm10 = vcmp.eq.f32.partialorder %v4604_v5, %v1323_v29  ;;  %vm1341_vm15 = vcmp.lt.f32.partialorder %v4604_v5, %v1323_v29 }
 0x3ee   : > { %vm1358_vm9 = vmand %vm1349_vm10, %vm1353_vm2 }
 0x3ef   : > { %vm1366_vm4 = vmor %vm1341_vm15, %vm1358_vm9 }
 0x3f0   : > { %v1315_v6 = vpop.permute.xlu1 %1314  ;;  %v1331_v27 = vpop.permute.xlu0 %1330  ;;  %v1374_v22 = vsel %vm1366_vm4, 1, %v7466_v8 }
 0x3f1   : > { %vm1339_vm13 = vcmp.lt.f32.partialorder %v4588_v2, %v1315_v6  ;;  %vm1347_vm3 = vcmp.eq.f32.partialorder %v4588_v2, %v1315_v6  ;;  %vm1351_vm8 = vcmp.eq.f32.partialorder %v4618_v63, %v1331_v27  ;;  %vm1343_vm12 = vcmp.lt.f32.partialorder %v4618_v63, %v1331_v27 }
 0x3f2   : > { %vm1356_vm1 = vmand %vm1347_vm3, %vm1353_vm2  ;;  %v1430_v24 = vsel %vm252_vm0, %v1374_v22, 0 }
 0x3f3   : > { %vm1364_vm14 = vmor %vm1339_vm13, %vm1356_vm1  ;;  %v1431_v4 = vand.u32 65535, %v1430_v24 }
 0x3f4   : > { %v1372_v58 = vsel %vm1364_vm14, 1, %v7466_v8  ;;  %v1319_v19 = vpop.permute.xlu1 %1318  ;;  %vm1360_vm10 = vmand %vm1351_vm8, %vm1353_vm2 }
 0x3f5   : > { %vm1340_vm15 = vcmp.lt.f32.partialorder %v4638_v53, %v1319_v19  ;;  %vm1348_vm9 = vcmp.eq.f32.partialorder %v4638_v53, %v1319_v19  ;;  %v1404_v44 = vsel %vm252_vm0, %v1372_v58, 0  ;;  %vm4947_vm4 = vmor %vm1343_vm12, %vm1360_vm10 }
 0x3f6   : > { %vm1357_vm3 = vmand %vm1348_vm9, %vm1353_vm2  ;;  %v1405_v21 = vand.u32 65535, %v1404_v44  ;;  %v1406_v23 = vshrl.u32 %v1404_v44, 16  ;;  %v1432_v44 = vshrl.u32 %v1430_v24, 16 }
 0x3f7   : > { %vm1365_vm14 = vmor %vm1340_vm15, %vm1357_vm3 }
 0x3f8   : > { %v1373_v29 = vsel %vm1365_vm14, 1, %v7466_v8  ;;  %v1327_v6 = vpop.permute.xlu1 %1326  ;;  %v1407_v55 = vcvt.s32.f32 %v1405_v21  ;;  %v1408_v62 = vcvt.s32.f32 %v1406_v23 }
 0x3f9   : > { %vm1342_vm13 = vcmp.lt.f32.partialorder %v4651_v12, %v1327_v6  ;;  %vm1350_vm1 = vcmp.eq.f32.partialorder %v4651_v12, %v1327_v6  ;;  %v1417_v27 = vsel %vm252_vm0, %v1373_v29, 0  ;;  %v1433_v6 = vcvt.s32.f32 %v1431_v4 }
 0x3fa   : > { %vm1359_vm8 = vmand %vm1350_vm1, %vm1353_vm2  ;;  %1409 = vadd.xlane.f32.xlu1 %v1407_v55  ;;  %1411 = vadd.xlane.f32.xlu0 %v1408_v62  ;;  %v1418_v58 = vand.u32 65535, %v1417_v27  ;;  %v1419_v19 = vshrl.u32 %v1417_v27, 16  ;;  %v1376_v62 = vsel %vm4947_vm4, 1, %v7466_v8  ;;  %v1434_v55 = vcvt.s32.f32 %v1432_v44 }
 0x3fb   : > { %vm1367_vm15 = vmor %vm1342_vm13, %vm1359_vm8 }
 0x3fc   : > { %v1375_v22 = vsel %vm1367_vm15, 1, %v7466_v8  ;;  %v1335_v21 = vpop.permute.xlu1 %1334  ;;  %v1420_v23 = vcvt.s32.f32 %v1418_v58  ;;  %v1421_v43 = vcvt.s32.f32 %v1419_v19  ;;  %v1456_v58 = vsel %vm252_vm0, %v1376_v62, 0 }
 0x3fd   : > { %vm1344_vm12 = vcmp.lt.f32.partialorder %v4661_v46, %v1335_v21  ;;  %vm1352_vm10 = vcmp.eq.f32.partialorder %v4661_v46, %v1335_v21  ;;  %v1443_v29 = vsel %vm252_vm0, %v1375_v22, 0  ;;  %v1458_v57 = vshrl.u32 %v1456_v58, 16 }
 0x3fe   : > { %vm1361_vm9 = vmand %vm1352_vm10, %vm1353_vm2  ;;  %1422 = vadd.xlane.f32.xlu1 %v1420_v23  ;;  %1424 = vadd.xlane.f32.xlu0 %v1421_v43  ;;  %v1445_v27 = vshrl.u32 %v1443_v29, 16  ;;  %v1444_v24 = vand.u32 65535, %v1443_v29  ;;  %v1457_v52 = vand.u32 65535, %v1456_v58  ;;  %v948_v58 = vcvt.f32.s32 %v4688_v32 }
 0x3ff   : > { %vm1369_vm3 = vmor %vm1344_vm12, %vm1361_vm9  ;;  %v1460_v43 = vcvt.s32.f32 %v1458_v57  ;;  %v947_v32 = vcvt.f32.s32 %v4678_v28  ;;  %v1013_v28 = vcvt.f32.s32 %v4708_v30  ;;  %vm1586_vm10 = vcmp.lt.s32.totalorder %v4234_v42, 6 }
 0x400   : > { %v1377_v19 = vsel %vm1369_vm3, 1, %v7466_v8  ;;  %v1447_v22 = vcvt.s32.f32 %v1445_v27  ;;  %v1446_v21 = vcvt.s32.f32 %v1444_v24  ;;  %v1459_v23 = vcvt.s32.f32 %v1457_v52 }
 0x401   : > { %v1469_v14 = vsel %vm252_vm0, %v1377_v19, 0  ;;  %v921_v19 = vcvt.f32.s32 %v4676_v31  ;;  %v961_v52 = vcvt.f32.s32 %v4692_v34  ;;  %v949_v57 = vshll.u32 %v948_v58, 16 }
 0x402   : > { %1437 = vadd.xlane.f32.xlu0 %v1434_v55  ;;  %1435 = vadd.xlane.f32.xlu1 %v1433_v6  ;;  %v1471_v44 = vshrl.u32 %v1469_v14, 16  ;;  %v1470_v4 = vand.u32 65535, %v1469_v14  ;;  %v922_v55 = vcvt.f32.s32 %v4674_v7  ;;  %v935_v6 = vcvt.f32.s32 %v4684_v26 }
 0x403   : > { %v934_v14 = vcvt.f32.s32 %v4680_v16  ;;  %v974_v7 = vcvt.f32.s32 %v4696_v49  ;;  %v962_v26 = vshll.u32 %v961_v52, 16  ;;  %v960_v31 = vcvt.f32.s32 %v4682_v3 }
 0x404   : > { %v1473_v29 = vcvt.s32.f32 %v1471_v44  ;;  %v1472_v62 = vcvt.s32.f32 %v1470_v4  ;;  %v923_v27 = vshll.u32 %v922_v55, 16  ;;  %v936_v24 = vshll.u32 %v935_v6, 16 }
 0x405   : > { %v4986_v16 = vadd.s32 %v949_v57, %v947_v32  ;;  %v975_v34 = vshll.u32 %v974_v7, 16  ;;  %v4990_v49 = vadd.s32 %v962_v26, %v960_v31  ;;  %v973_v44 = vcvt.f32.s32 %v4686_v56 }
 0x406   : > { %1450 = vadd.xlane.f32.xlu0 %v1447_v22  ;;  %1448 = vadd.xlane.f32.xlu1 %v1446_v21  ;;  %v4975_v22 = vadd.s32 %v923_v27, %v921_v19  ;;  %v4977_v21 = vadd.s32 %v936_v24, %v934_v14  ;;  %v7485_v24 = vld [vmem:[#allocation12_spill] sm:$0xff] }
 0x407   : > { %7479 = vst [vmem:[#allocation23_spill] sm:$0xff] %v4986_v16  ;;  %7480 = vst [vmem:[#allocation24_spill] sm:$0xff] %v4990_v49  ;;  %vm7315_vm4 = vcmp.eq.s32.totalorder %v4986_v16, 7  ;;  %vm7324_vm13 = vcmp.eq.s32.totalorder %v4990_v49, 7  ;;  %v1012_v58 = vcvt.f32.s32 %v7485_v24 }
 0x408   : > { %7477 = vst [vmem:[#allocation21_spill] sm:$0xff] %v4975_v22  ;;  %7478 = vst [vmem:[#allocation22_spill] sm:$0xff] %v4977_v21  ;;  %vm7316_vm2 = vcmp.eq.s32.totalorder %v4975_v22, 7  ;;  %vm7314_vm14 = vcmp.eq.s32.totalorder %v4977_v21, 7  ;;  %v1058_v56 = vsel %vm7315_vm4, %v4588_v2, %v4911_v54  ;;  %v1059_v27 = vsel %vm7324_vm13, %v4638_v53, %v4916_v50 }
 0x409   : > { %v1057_v3 = vsel %vm7314_vm14, %v4575_v39, %v4913_v48  ;;  %v1056_v4 = vsel %vm7316_vm2, %v4625_v1, %v4903_v33  ;;  %v1014_v48 = vshll.u32 %v1013_v28, 16  ;;  %v7484_v33 = vld [vmem:[#allocation11_spill] sm:$0xff] }
 0x40a   : > { %1463 = vadd.xlane.f32.xlu0 %v1460_v43  ;;  %1461 = vadd.xlane.f32.xlu1 %v1459_v23  ;;  %v987_v43 = vcvt.f32.s32 %v4700_v38  ;;  %v1000_v23 = vcvt.f32.s32 %v4704_v41  ;;  %v7481_v41 = vld [vmem:[#allocation10_spill] sm:$0xff]  ;;  %v999_v6 = vcvt.f32.s32 %v7484_v33 }
 0x40b   : > { %v5026_v54 = vadd.s32 %v1014_v48, %v1012_v58 }
 0x40c   : > { %v988_v38 = vshll.u32 %v987_v43, 16  ;;  %v1001_v30 = vshll.u32 %v1000_v23, 16 }
 0x40d   : > { %7487 = vst [vmem:[#allocation12_spill] sm:$0xff] %v5026_v54  ;;  %vm7317_vm12 = vcmp.eq.s32.totalorder %v5026_v54, 7 }
 0x40e   : > { %1476 = vadd.xlane.f32.xlu0 %v1473_v29  ;;  %1474 = vadd.xlane.f32.xlu1 %v1472_v62  ;;  %v986_v29 = vcvt.f32.s32 %v7481_v41  ;;  %v5005_v62 = vadd.s32 %v975_v34, %v973_v44  ;;  %v5023_v19 = vadd.s32 %v1001_v30, %v999_v6 }
 0x410   : > { %7482 = vst [vmem:[#allocation10_spill] sm:$0xff] %v5005_v62  ;;  %v5008_v55 = vadd.s32 %v988_v38, %v986_v29  ;;  %7486 = vst [vmem:[#allocation11_spill] sm:$0xff] %v5023_v19  ;;  %vm7313_vm1 = vcmp.eq.s32.totalorder %v5005_v62, 7  ;;  %vm7312_vm15 = vcmp.eq.s32.totalorder %v5023_v19, 7 }
 0x411   : > { %v1060_v52 = vsel %vm7313_vm1, %v4604_v5, %v4918_v47  ;;  %v1062_v14 = vsel %vm7312_vm15, %v4618_v63, %v4922_v9  ;;  %v1063_v47 = vsel %vm7317_vm12, %v4661_v46, %v4924_v18 }
 0x412   : > { %7483 = vst [vmem:[#allocation25_spill] sm:$0xff] %v5008_v55  ;;  %vm7318_vm8 = vcmp.eq.s32.totalorder %v5008_v55, 7 }
 0x413   : > { %v1061_v50 = vsel %vm7318_vm8, %v4651_v12, %v4920_v36  ;;  %v4134_v36 = vmov 7  }
 0x41f   : > { %1543 = vperm.xlu1 %4059, %v4575_v39  }
 0x423   : > { %1547 = vperm.xlu1 %4059, %v4588_v2  }
 0x424   : > { %1539 = vperm.xlu0 %4058, %v4625_v1  }
 0x427   : > { %1267 = vrot.lane.b32.xlu1 %v1057_v3, %s4130_s16 }
 0x428   : > { %1265 = vrot.lane.b32.xlu0 %v1056_v4, %s4130_s16 }
 0x42b   : > { %1269 = vrot.lane.b32.xlu1 %v1058_v56, %s4130_s16 }
 0x42c   : > { %1271 = vrot.lane.b32.xlu0 %v1059_v27, %s4130_s16 }
 0x42f   : > { %1273 = vrot.lane.b32.xlu1 %v1060_v52, %s4130_s16 }
 0x430   : > { %1275 = vrot.lane.b32.xlu0 %v1061_v50, %s4130_s16 }
 0x433   : > { %1277 = vrot.lane.b32.xlu1 %v1062_v14, %s4130_s16 }
 0x434   : > { %1279 = vrot.lane.b32.xlu0 %v1063_v47, %s4130_s16 }
 0x437   : > { %1555 = vperm.xlu1 %4059, %v4604_v5  }
 0x438   : > { %1551 = vperm.xlu0 %4058, %v4638_v53  }
 0x43b   : > { %1563 = vperm.xlu1 %4059, %v4618_v63  }
 0x43c   : > { %1559 = vperm.xlu0 %4058, %v4651_v12  }
 0x43f   : > { %4060 = vset.pattern.permute.xlu1 %v4134_v36 }
 0x440   : > { %1567 = vperm.xlu0 %4058, %v4661_v46  }
 0x444   : > { %4061 = vset.pattern.permute.xlu0 %v4134_v36 }
 0x46b   : > { %v5056_v9 = vpop.xlane.xlu0 %1383  ;;  %v5060_v57 = vpop.xlane.xlu1 %1385 }
 0x46f   : > { %v5058_v18 = vpop.xlane.xlu0 %1396 }
 0x473   : > { %v5062_v7 = vpop.xlane.xlu0 %1398 }
 0x483   : > { %v5064_v26 = vpop.xlane.xlu1 %1409  ;;  %v5066_v43 = vpop.xlane.xlu0 %1411 }
 0x487   : > { %v5068_v32 = vpop.xlane.xlu1 %1422  ;;  %v5070_v31 = vpop.xlane.xlu0 %1424 }
 0x48b   : > { %v5072_v34 = vpop.xlane.xlu1 %1435  ;;  %v5074_v23 = vpop.xlane.xlu0 %1437 }
 0x48f   : > { %v5076_v38 = vpop.xlane.xlu1 %1448  ;;  %v5078_v28 = vpop.xlane.xlu0 %1450 }
 0x493   : > { %v5080_v3 = vpop.xlane.xlu1 %1461  ;;  %v5082_v44 = vpop.xlane.xlu0 %1463 }
 0x497   : > { %v5084_v4 = vpop.xlane.xlu1 %1474  ;;  %v5087_v41 = vpop.xlane.xlu0 %1476 }
 0x49b   : > { %v1544_v29 = vpop.permute.xlu1 %1543 }
 0x49c   : > { %vm1579_vm9 = vcmp.eq.f32.partialorder %v4575_v39, %v1544_v29  ;;  %vm1571_vm3 = vcmp.lt.f32.partialorder %v4575_v39, %v1544_v29 }
 0x49d   : > { %vm1588_vm15 = vmand %vm1579_vm9, %vm1586_vm10 }
 0x49e   : > { %vm1596_vm1 = vmor %vm1571_vm3, %vm1588_vm15 }
 0x49f   : > { %v1548_v30 = vpop.permute.xlu1 %1547  ;;  %v1540_v48 = vpop.permute.xlu0 %1539  ;;  %v1604_v39 = vsel %vm1596_vm1, 1, %v7466_v8 }
 0x4a0   : > { %vm1572_vm14 = vcmp.lt.f32.partialorder %v4588_v2, %v1548_v30  ;;  %vm1580_vm4 = vcmp.eq.f32.partialorder %v4588_v2, %v1548_v30  ;;  %vm1578_vm2 = vcmp.eq.f32.partialorder %v4625_v1, %v1540_v48  ;;  %vm1570_vm8 = vcmp.lt.f32.partialorder %v4625_v1, %v1540_v48 }
 0x4a1   : > { %vm1589_vm12 = vmand %vm1580_vm4, %vm1586_vm10  ;;  %v1624_v27 = vsel %vm252_vm0, %v1604_v39, 0 }
 0x4a2   : > { %vm1597_vm7 = vmor %vm1572_vm14, %vm1589_vm12  ;;  %v1625_v36 = vand.u32 65535, %v1624_v27  ;;  %v1626_v29 = vshrl.u32 %v1624_v27, 16 }
 0x4a3   : > { %vm1587_vm9 = vmand %vm1578_vm2, %vm1586_vm10  ;;  %v5102_v56 = vpop.permute.xlu1 %1267  ;;  %v5104_v33 = vpop.permute.xlu0 %1265  ;;  %v1605_v24 = vsel %vm1597_vm7, 1, %v7466_v8 }
 0x4a4   : > { %vm1595_vm15 = vmor %vm1570_vm8, %vm1587_vm9  ;;  %v1637_v30 = vsel %vm252_vm0, %v1605_v24, 0  ;;  %v1627_v39 = vcvt.s32.f32 %v1625_v36  ;;  %v1628_v19 = vcvt.s32.f32 %v1626_v29 }
 0x4a5   : > { %v1603_v2 = vsel %vm1595_vm15, 1, %v7466_v8  ;;  %v1638_v62 = vand.u32 65535, %v1637_v30  ;;  %v1639_v21 = vshrl.u32 %v1637_v30, 16 }
 0x4a6   : > { %v1611_v6 = vsel %vm252_vm0, %v1603_v2, 0 }
 0x4a7   : > { %v5110_v1 = vpop.permute.xlu1 %1269  ;;  %v5112_v58 = vpop.permute.xlu0 %1271  ;;  %v1613_v52 = vshrl.u32 %v1611_v6, 16  ;;  %v1612_v50 = vand.u32 65535, %v1611_v6  ;;  %v1641_v27 = vcvt.s32.f32 %v1639_v21 }
 0x4a9   : > { %v1615_v14 = vcvt.s32.f32 %v1613_v52  ;;  %v1614_v47 = vcvt.s32.f32 %v1612_v50  ;;  %v1640_v52 = vcvt.s32.f32 %v1638_v62 }
 0x4ab   : > { %1618 = vadd.xlane.f32.xlu0 %v1615_v14  ;;  %1616 = vadd.xlane.f32.xlu1 %v1614_v47  ;;  %v5115_v48 = vpop.permute.xlu1 %1273  ;;  %v5117_v2 = vpop.permute.xlu0 %1275 }
 0x4af   : > { %1629 = vadd.xlane.f32.xlu0 %v1627_v39  ;;  %1631 = vadd.xlane.f32.xlu1 %v1628_v19  ;;  %v5119_v16 = vpop.permute.xlu1 %1277  ;;  %v5121_v6 = vpop.permute.xlu0 %1279 }
 0x4b3   : > { %1642 = vadd.xlane.f32.xlu0 %v1640_v52  ;;  %1644 = vadd.xlane.f32.xlu1 %v1641_v27  ;;  %v1556_v24 = vpop.permute.xlu1 %1555  ;;  %v1552_v50 = vpop.permute.xlu0 %1551 }
 0x4b4   : > { %vm1574_vm7 = vcmp.lt.f32.partialorder %v4604_v5, %v1556_v24  ;;  %vm1582_vm2 = vcmp.eq.f32.partialorder %v4604_v5, %v1556_v24  ;;  %vm1581_vm14 = vcmp.eq.f32.partialorder %v4638_v53, %v1552_v50  ;;  %vm1573_vm1 = vcmp.lt.f32.partialorder %v4638_v53, %v1552_v50 }
 0x4b5   : > { %vm1591_vm4 = vmand %vm1582_vm2, %vm1586_vm10 }
 0x4b6   : > { %vm1599_vm8 = vmor %vm1574_vm7, %vm1591_vm4 }
 0x4b7   : > { %v1607_v19 = vsel %vm1599_vm8, 1, %v7466_v8  ;;  %vm1590_vm12 = vmand %vm1581_vm14, %vm1586_vm10  ;;  %v1564_v21 = vpop.permute.xlu1 %1563  ;;  %v1560_v62 = vpop.permute.xlu0 %1559 }
 0x4b8   : > { %vm1598_vm3 = vmor %vm1573_vm1, %vm1590_vm12  ;;  %vm1576_vm9 = vcmp.lt.f32.partialorder %v4618_v63, %v1564_v21  ;;  %vm1584_vm15 = vcmp.eq.f32.partialorder %v4618_v63, %v1564_v21  ;;  %vm1583_vm13 = vcmp.eq.f32.partialorder %v4651_v12, %v1560_v62  ;;  %vm1575_vm7 = vcmp.lt.f32.partialorder %v4651_v12, %v1560_v62 }
 0x4b9   : > { %v1606_v5 = vsel %vm1598_vm3, 1, %v7466_v8  ;;  %vm1593_vm2 = vmand %vm1584_vm15, %vm1586_vm10  ;;  %v1663_v53 = vsel %vm252_vm0, %v1607_v19, 0 }
 0x4ba   : > { %vm5140_vm4 = vmor %vm1576_vm9, %vm1593_vm2  ;;  %v1650_v47 = vsel %vm252_vm0, %v1606_v5, 0  ;;  %v1665_v30 = vshrl.u32 %v1663_v53, 16  ;;  %v1664_v39 = vand.u32 65535, %v1663_v53 }
 0x4bb   : > { %vm1592_vm14 = vmand %vm1583_vm13, %vm1586_vm10  ;;  %v1568_v63 = vpop.permute.xlu0 %1567  ;;  %v1652_v36 = vshrl.u32 %v1650_v47, 16  ;;  %v1651_v29 = vand.u32 65535, %v1650_v47  ;;  %v1609_v50 = vsel %vm5140_vm4, 1, %v7466_v8 }
 0x4bc   : > { %vm1600_vm1 = vmor %vm1575_vm7, %vm1592_vm14  ;;  %vm1585_vm8 = vcmp.eq.f32.partialorder %v4661_v46, %v1568_v63  ;;  %vm1577_vm12 = vcmp.lt.f32.partialorder %v4661_v46, %v1568_v63  ;;  %v1667_v19 = vcvt.s32.f32 %v1665_v30  ;;  %v1666_v21 = vcvt.s32.f32 %v1664_v39 }
 0x4bd   : > { %v1608_v12 = vsel %vm1600_vm1, 1, %v7466_v8  ;;  %vm1594_vm3 = vmand %vm1585_vm8, %vm1586_vm10  ;;  %v1654_v52 = vcvt.s32.f32 %v1652_v36  ;;  %v1653_v27 = vcvt.s32.f32 %v1651_v29  ;;  %v1689_v46 = vsel %vm252_vm0, %v1609_v50, 0 }
 0x4be   : > { %v1676_v24 = vsel %vm252_vm0, %v1608_v12, 0  ;;  %vm1602_vm13 = vmor %vm1577_vm12, %vm1594_vm3  ;;  %v1691_v36 = vshrl.u32 %v1689_v46, 16  ;;  %v1690_v29 = vand.u32 65535, %v1689_v46  ;;  %v1155_v50 = vcvt.f32.s32 %v4867_v59 }
 0x4bf   : > { %1657 = vadd.xlane.f32.xlu1 %v1654_v52  ;;  %1655 = vadd.xlane.f32.xlu0 %v1653_v27  ;;  %v1678_v62 = vshrl.u32 %v1676_v24, 16  ;;  %v1677_v5 = vand.u32 65535, %v1676_v24  ;;  %v1610_v53 = vsel %vm1602_vm13, 1, %v7466_v8  ;;  %v1167_v59 = vcvt.f32.s32 %v4871_v51 }
 0x4c0   : > { %v1702_v14 = vsel %vm252_vm0, %v1610_v53, 0  ;;  %v1693_v12 = vcvt.s32.f32 %v1691_v36  ;;  %v1692_v30 = vcvt.s32.f32 %v1690_v29  ;;  %v1207_v53 = vcvt.f32.s32 %v4881_v15 }
 0x4c1   : > { %v1680_v47 = vcvt.s32.f32 %v1678_v62  ;;  %v1679_v63 = vcvt.s32.f32 %v1677_v5  ;;  %v1704_v39 = vshrl.u32 %v1702_v14, 16  ;;  %v1703_v52 = vand.u32 65535, %v1702_v14 }
 0x4c2   : > { %v1156_v62 = vshll.u32 %v1155_v50, 16  ;;  %v1181_v5 = vcvt.f32.s32 %v4873_v37  ;;  %v1194_v29 = vcvt.f32.s32 %v4877_v0  ;;  %v1208_v15 = vshll.u32 %v1207_v53, 16 }
 0x4c3   : > { %1670 = vadd.xlane.f32.xlu1 %v1667_v19  ;;  %1668 = vadd.xlane.f32.xlu0 %v1666_v21  ;;  %v1706_v27 = vcvt.s32.f32 %v1704_v39  ;;  %v1705_v24 = vcvt.s32.f32 %v1703_v52  ;;  %v1168_v19 = vcvt.f32.s32 %v4869_v35  ;;  %v5162_v21 = vld [vmem:[%s4175_s15] sm:$0xff]  ;;  %v5174_v35 = vld [vmem:[%s4175_s15 + $0x8] sm:$0xff]  ;;  %v1206_v51 = vcvt.f32.s32 %v4883_v40 }
 0x4c4   : > { %v1182_v37 = vshll.u32 %v1181_v5, 16  ;;  %v5190_v39 = vld [vmem:[%s4175_s15 + $0x20] sm:$0xff]  ;;  %v1195_v0 = vshll.u32 %v1194_v29, 16  ;;  %v1246_v5 = vcvt.f32.s32 %v4893_v13  ;;  %vm1819_vm8 = vcmp.lt.s32.totalorder %v4234_v42, 7 }
 0x4c5   : > { %v1169_v46 = vshll.u32 %v1168_v19, 16 }
 0x4c7   : > { %1683 = vadd.xlane.f32.xlu1 %v1680_v47  ;;  %1681 = vadd.xlane.f32.xlu0 %v1679_v63  ;;  %v1154_v47 = vcvt.f32.s32 %v4865_v60  ;;  %v5169_v63 = vld [vmem:[%s4175_s15 + $0x10] sm:$0xff]  ;;  %v5180_v14 = vadd.s32 %v1169_v46, %v1167_v59  ;;  %v1233_v60 = vcvt.f32.s32 %v4889_v11  ;;  %v5197_v11 = vadd.s32 %v1208_v15, %v1206_v51 }
 0x4c8   : > { %v1247_v46 = vshll.u32 %v1246_v5, 16 }
 0x4c9   : > { %v5177_v36 = vadd.s32 %v1156_v62, %v1154_v47  ;;  %7491 = vst [vmem:[#allocation27_spill] sm:$0xff] %v5180_v14  ;;  %7493 = vst [vmem:[#allocation29_spill] sm:$0xff] %v5197_v11  ;;  %vm7329_vm9 = vcmp.eq.s32.totalorder %v5180_v14, 7  ;;  %vm7326_vm2 = vcmp.eq.s32.totalorder %v5197_v11, 7 }
 0x4ca   : > { %v1290_v50 = vsel %vm7329_vm9, %v5174_v35, %v5102_v56 }
 0x4cb   : > { %1696 = vadd.xlane.f32.xlu1 %v1693_v12  ;;  %1694 = vadd.xlane.f32.xlu0 %v1692_v30  ;;  %7490 = vst [vmem:[#allocation26_spill] sm:$0xff] %v5177_v36  ;;  %v1180_v12 = vcvt.f32.s32 %v4875_v45  ;;  %v5185_v30 = vld [vmem:[%s4175_s15 + $0x18] sm:$0xff]  ;;  %vm7328_vm10 = vcmp.eq.s32.totalorder %v5177_v36, 7  ;;  %v1234_v45 = vshll.u32 %v1233_v60, 16 }
 0x4cc   : > { %v1289_v40 = vsel %vm7328_vm10, %v5162_v21, %v5104_v33  ;;  %v1293_v33 = vsel %vm7326_vm2, %v5190_v39, %v5115_v48  ;;  %v5240_v48 = vld [vmem:[%s4175_s15 + $0x30] sm:$0xff] }
 0x4cd   : > { %v5193_v52 = vadd.s32 %v1182_v37, %v1180_v12 }
 0x4cf   : > { %1709 = vadd.xlane.f32.xlu1 %v1706_v27  ;;  %1707 = vadd.xlane.f32.xlu0 %v1705_v24  ;;  %7492 = vst [vmem:[#allocation28_spill] sm:$0xff] %v5193_v52  ;;  %v1220_v27 = vcvt.f32.s32 %v4885_v10  ;;  %v1193_v24 = vcvt.f32.s32 %v4879_v61  ;;  %v1232_v10 = vcvt.f32.s32 %v4891_v20  ;;  %vm7327_vm15 = vcmp.eq.s32.totalorder %v5193_v52, 7 }
 0x4d0   : > { %v1291_v56 = vsel %vm7327_vm15, %v5169_v63, %v5110_v1  ;;  %v1219_v20 = vcvt.f32.s32 %v4887_v17  ;;  %v1245_v1 = vcvt.f32.s32 %v4896_v25 }
 0x4d1   : > { %v5212_v19 = vadd.s32 %v1195_v0, %v1193_v24  ;;  %v1221_v62 = vshll.u32 %v1220_v27, 16  ;;  %v5216_v61 = vadd.s32 %v1234_v45, %v1232_v10 }
 0x4d2   : > { %v5248_v47 = vadd.s32 %v1247_v46, %v1245_v1 }
 0x4d3   : > { %7494 = vst [vmem:[#allocation30_spill] sm:$0xff] %v5212_v19  ;;  %7495 = vst [vmem:[#allocation31_spill] sm:$0xff] %v5216_v61  ;;  %v5230_v13 = vadd.s32 %v1221_v62, %v1219_v20  ;;  %vm7332_vm7 = vcmp.eq.s32.totalorder %v5212_v19, 7  ;;  %vm7325_vm4 = vcmp.eq.s32.totalorder %v5216_v61, 7 }
 0x4d4   : > { %v1292_v17 = vsel %vm7332_vm7, %v5185_v30, %v5112_v58  ;;  %v1295_v53 = vsel %vm7325_vm4, %v5240_v48, %v5119_v16  ;;  %7497 = vst [vmem:[#allocation33_spill] sm:$0xff] %v5248_v47  ;;  %v5252_v58 = vld [vmem:[%s4175_s15 + $0x28] sm:$0xff]  ;;  %vm7330_vm1 = vcmp.eq.s32.totalorder %v5248_v47, 7  ;;  %v5262_v16 = vld [vmem:[%s4175_s15 + $0x38] sm:$0xff] }
 0x4d5   : > { %7496 = vst [vmem:[#allocation32_spill] sm:$0xff] %v5230_v13  ;;  %vm7331_vm14 = vcmp.eq.s32.totalorder %v5230_v13, 7  ;;  %v1296_v59 = vsel %vm7330_vm1, %v5262_v16, %v5121_v6 }
 0x4d6   : > { %v1294_v25 = vsel %vm7331_vm14, %v5252_v58, %v5117_v2  ;;  %v4135_v2 = vmov 8  }
 0x4e0   : > { %1772 = vperm.xlu1 %4060, %v5162_v21  }
 0x4e4   : > { %1780 = vperm.xlu1 %4060, %v5169_v63  }
 0x4e5   : > { %1776 = vperm.xlu0 %4061, %v5174_v35  }
 0x4e8   : > { %1784 = vperm.xlu1 %4060, %v5185_v30  }
 0x4e9   : > { %1788 = vperm.xlu0 %4061, %v5190_v39  }
 0x4ec   : > { %1498 = vrot.lane.b32.xlu1 %v1289_v40, %s4130_s16 }
 0x4ed   : > { %1500 = vrot.lane.b32.xlu0 %v1290_v50, %s4130_s16 }
 0x4f0   : > { %1502 = vrot.lane.b32.xlu1 %v1291_v56, %s4130_s16 }
 0x4f1   : > { %1506 = vrot.lane.b32.xlu0 %v1293_v33, %s4130_s16 }
 0x4f4   : > { %1504 = vrot.lane.b32.xlu1 %v1292_v17, %s4130_s16 }
 0x4f5   : > { %1510 = vrot.lane.b32.xlu0 %v1295_v53, %s4130_s16 }
 0x4f8   : > { %1508 = vrot.lane.b32.xlu1 %v1294_v25, %s4130_s16 }
 0x4f9   : > { %1796 = vperm.xlu0 %4061, %v5240_v48  }
 0x4fc   : > { %1512 = vrot.lane.b32.xlu1 %v1296_v59, %s4130_s16 }
 0x4fd   : > { %4062 = vset.pattern.permute.xlu0 %v4135_v2 }
 0x500   : > { %1792 = vperm.xlu1 %4060, %v5252_v58  }
 0x504   : > { %1800 = vperm.xlu1 %4060, %v5262_v16  }
 0x508   : > { %4063 = vset.pattern.permute.xlu1 %v4135_v2 }
 0x534   : > { %v5271_v37 = vpop.xlane.xlu1 %1616  ;;  %v5273_v29 = vpop.xlane.xlu0 %1618 }
 0x538   : > { %v5275_v15 = vpop.xlane.xlu1 %1631  ;;  %v5277_v60 = vpop.xlane.xlu0 %1629 }
 0x53c   : > { %v5279_v12 = vpop.xlane.xlu1 %1644  ;;  %v5281_v6 = vpop.xlane.xlu0 %1642 }
 0x548   : > { %v5283_v51 = vpop.xlane.xlu1 %1657  ;;  %v5285_v0 = vpop.xlane.xlu0 %1655 }
 0x54c   : > { %v5287_v27 = vpop.xlane.xlu1 %1670  ;;  %v5289_v45 = vpop.xlane.xlu0 %1668 }
 0x550   : > { %v5291_v40 = vpop.xlane.xlu1 %1683  ;;  %v5293_v24 = vpop.xlane.xlu0 %1681 }
 0x551   : > { %7498 = vst [vmem:[#allocation34_spill] sm:$0xff] %v5293_v24 }
 0x554   : > { %v5295_v50 = vpop.xlane.xlu1 %1696  ;;  %v5297_v10 = vpop.xlane.xlu0 %1694 }
 0x558   : > { %v5299_v62 = vpop.xlane.xlu1 %1709  ;;  %v5302_v5 = vpop.xlane.xlu0 %1707 }
 0x559   : > { %7499 = vst [vmem:[#allocation35_spill] sm:$0xff] %v5302_v5 }
 0x55c   : > { %v1773_v56 = vpop.permute.xlu1 %1772 }
 0x55d   : > { %vm1803_vm12 = vcmp.lt.f32.partialorder %v5162_v21, %v1773_v56  ;;  %vm1811_vm3 = vcmp.eq.f32.partialorder %v5162_v21, %v1773_v56 }
 0x55e   : > { %vm1820_vm13 = vmand %vm1811_vm3, %vm1819_vm8 }
 0x55f   : > { %vm1828_vm4 = vmor %vm1803_vm12, %vm1820_vm13 }
 0x560   : > { %v1836_v20 = vsel %vm1828_vm4, 1, %v7466_v8  ;;  %v1781_v33 = vpop.permute.xlu1 %1780  ;;  %v1777_v46 = vpop.permute.xlu0 %1776 }
 0x561   : > { %vm1805_vm2 = vcmp.lt.f32.partialorder %v5169_v63, %v1781_v33  ;;  %vm1813_vm15 = vcmp.eq.f32.partialorder %v5169_v63, %v1781_v33  ;;  %vm1812_vm10 = vcmp.eq.f32.partialorder %v5174_v35, %v1777_v46  ;;  %vm1804_vm1 = vcmp.lt.f32.partialorder %v5174_v35, %v1777_v46 }
 0x562   : > { %vm1822_vm9 = vmand %vm1813_vm15, %vm1819_vm8  ;;  %v1844_v17 = vsel %vm252_vm0, %v1836_v20, 0 }
 0x563   : > { %vm1830_vm14 = vmor %vm1805_vm2, %vm1822_vm9  ;;  %v1846_v1 = vshrl.u32 %v1844_v17, 16  ;;  %v1845_v53 = vand.u32 65535, %v1844_v17 }
 0x564   : > { %v1838_v25 = vsel %vm1830_vm14, 1, %v7466_v8  ;;  %vm1821_vm4 = vmand %vm1812_vm10, %vm1819_vm8  ;;  %v1785_v59 = vpop.permute.xlu1 %1784  ;;  %v1789_v2 = vpop.permute.xlu0 %1788 }
 0x565   : > { %vm1829_vm12 = vmor %vm1804_vm1, %vm1821_vm4  ;;  %vm1806_vm3 = vcmp.lt.f32.partialorder %v5185_v30, %v1785_v59  ;;  %vm1814_vm13 = vcmp.eq.f32.partialorder %v5185_v30, %v1785_v59  ;;  %vm1807_vm15 = vcmp.lt.f32.partialorder %v5190_v39, %v1789_v2  ;;  %vm1815_vm7 = vcmp.eq.f32.partialorder %v5190_v39, %v1789_v2 }
 0x566   : > { %v1837_v56 = vsel %vm1829_vm12, 1, %v7466_v8  ;;  %vm1823_vm9 = vmand %vm1814_vm13, %vm1819_vm8  ;;  %v1848_v20 = vcvt.s32.f32 %v1846_v1  ;;  %v1847_v33 = vcvt.s32.f32 %v1845_v53  ;;  %v1870_v46 = vsel %vm252_vm0, %v1838_v25, 0 }
 0x567   : > { %vm1831_vm10 = vmor %vm1806_vm3, %vm1823_vm9  ;;  %v1871_v17 = vand.u32 65535, %v1870_v46  ;;  %v1857_v61 = vsel %vm252_vm0, %v1837_v56, 0  ;;  %v1872_v2 = vshrl.u32 %v1870_v46, 16 }
 0x568   : > { %v1839_v11 = vsel %vm1831_vm10, 1, %v7466_v8  ;;  %vm1824_vm2 = vmand %vm1815_vm7, %vm1819_vm8  ;;  %1851 = vadd.xlane.f32.xlu1 %v1848_v20  ;;  %1849 = vadd.xlane.f32.xlu0 %v1847_v33  ;;  %v5331_v59 = vpop.permute.xlu1 %1498  ;;  %v5333_v52 = vpop.permute.xlu0 %1500  ;;  %v1858_v36 = vand.u32 65535, %v1857_v61  ;;  %v1859_v1 = vshrl.u32 %v1857_v61, 16 }
 0x569   : > { %vm1832_vm14 = vmor %vm1807_vm15, %vm1824_vm2  ;;  %v1873_v53 = vcvt.s32.f32 %v1871_v17  ;;  %v1883_v25 = vsel %vm252_vm0, %v1839_v11, 0  ;;  %v1874_v55 = vcvt.s32.f32 %v1872_v2 }
 0x56a   : > { %v1840_v56 = vsel %vm1832_vm14, 1, %v7466_v8  ;;  %v1860_v14 = vcvt.s32.f32 %v1858_v36  ;;  %v1884_v22 = vand.u32 65535, %v1883_v25  ;;  %v1861_v61 = vcvt.s32.f32 %v1859_v1 }
 0x56b   : > { %v1896_v47 = vsel %vm252_vm0, %v1840_v56, 0  ;;  %v1885_v19 = vshrl.u32 %v1883_v25, 16 }
 0x56c   : > { %1875 = vadd.xlane.f32.xlu1 %v1873_v53  ;;  %1862 = vadd.xlane.f32.xlu0 %v1860_v14  ;;  %v5340_v20 = vpop.permute.xlu1 %1502  ;;  %v5342_v33 = vpop.permute.xlu0 %1506  ;;  %v1886_v54 = vcvt.s32.f32 %v1884_v22  ;;  %v1897_v13 = vand.u32 65535, %v1896_v47  ;;  %v1898_v1 = vshrl.u32 %v1896_v47, 16 }
 0x56d   : > { %v1887_v22 = vcvt.s32.f32 %v1885_v19 }
 0x56e   : > { %v1899_v36 = vcvt.s32.f32 %v1897_v13  ;;  %v1900_v13 = vcvt.s32.f32 %v1898_v1 }
 0x570   : > { %1888 = vadd.xlane.f32.xlu1 %v1886_v54  ;;  %1864 = vadd.xlane.f32.xlu0 %v1861_v61  ;;  %v5344_v17 = vpop.permute.xlu1 %1504  ;;  %v5346_v11 = vpop.permute.xlu0 %1510 }
 0x574   : > { %1877 = vadd.xlane.f32.xlu0 %v1874_v55  ;;  %1901 = vadd.xlane.f32.xlu1 %v1899_v36  ;;  %v5348_v14 = vpop.permute.xlu1 %1508  ;;  %v1797_v53 = vpop.permute.xlu0 %1796 }
 0x575   : > { %vm1817_vm7 = vcmp.eq.f32.partialorder %v5240_v48, %v1797_v53  ;;  %vm1809_vm1 = vcmp.lt.f32.partialorder %v5240_v48, %v1797_v53 }
 0x576   : > { %vm1826_vm4 = vmand %vm1817_vm7, %vm1819_vm8 }
 0x577   : > { %vm1834_vm12 = vmor %vm1809_vm1, %vm1826_vm4 }
 0x578   : > { %1890 = vadd.xlane.f32.xlu0 %v1887_v22  ;;  %v5354_v54 = vpop.permute.xlu1 %1512  ;;  %v1842_v46 = vsel %vm1834_vm12, 1, %v7466_v8 }
 0x579   : > { %v1922_v25 = vsel %vm252_vm0, %v1842_v46, 0 }
 0x57a   : > { %v1924_v36 = vshrl.u32 %v1922_v25, 16 }
 0x57c   : > { %1903 = vadd.xlane.f32.xlu0 %v1900_v13  ;;  %v1793_v55 = vpop.permute.xlu1 %1792  ;;  %v1923_v13 = vand.u32 65535, %v1922_v25  ;;  %v1926_v46 = vcvt.s32.f32 %v1924_v36  ;;  %v1388_v25 = vcvt.f32.s32 %v5060_v57  ;;  %v1414_v36 = vcvt.f32.s32 %v5066_v43 }
 0x57d   : > { %vm1808_vm3 = vcmp.lt.f32.partialorder %v5252_v58, %v1793_v55  ;;  %vm1816_vm13 = vcmp.eq.f32.partialorder %v5252_v58, %v1793_v55  ;;  %v1427_v57 = vcvt.f32.s32 %v5070_v31  ;;  %v1439_v31 = vcvt.f32.s32 %v5072_v34 }
 0x57e   : > { %vm1825_vm15 = vmand %vm1816_vm13, %vm1819_vm8 }
 0x57f   : > { %vm1833_vm9 = vmor %vm1808_vm3, %vm1825_vm15 }
 0x580   : > { %v1841_v19 = vsel %vm1833_vm9, 1, %v7466_v8  ;;  %v1801_v47 = vpop.permute.xlu1 %1800 }
 0x581   : > { %vm1810_vm10 = vcmp.lt.f32.partialorder %v5262_v16, %v1801_v47  ;;  %vm1818_vm2 = vcmp.eq.f32.partialorder %v5262_v16, %v1801_v47  ;;  %v1909_v56 = vsel %vm252_vm0, %v1841_v19, 0  ;;  %v1925_v47 = vcvt.s32.f32 %v1923_v13 }
 0x582   : > { %vm1827_vm14 = vmand %vm1818_vm2, %vm1819_vm8  ;;  %v1911_v61 = vshrl.u32 %v1909_v56, 16  ;;  %v1910_v2 = vand.u32 65535, %v1909_v56  ;;  %v1401_v56 = vcvt.f32.s32 %v5062_v7  ;;  %v1440_v7 = vcvt.f32.s32 %v5074_v23 }
 0x583   : > { %vm1835_vm7 = vmor %vm1810_vm10, %vm1827_vm14  ;;  %v1466_v13 = vcvt.f32.s32 %v5082_v44  ;;  %v1428_v23 = vshll.u32 %v1427_v57, 16  ;;  %vm2052_vm10 = vcmp.lt.s32.totalorder %v4234_v42, 8 }
 0x584   : > { %v1843_v53 = vsel %vm1835_vm7, 1, %v7466_v8  ;;  %v1913_v22 = vcvt.s32.f32 %v1911_v61  ;;  %v1912_v1 = vcvt.s32.f32 %v1910_v2  ;;  %v1400_v61 = vcvt.f32.s32 %v5058_v18 }
 0x585   : > { %v1935_v55 = vsel %vm252_vm0, %v1843_v53, 0  ;;  %v1402_v2 = vshll.u32 %v1401_v56, 16  ;;  %v1387_v53 = vcvt.f32.s32 %v5056_v9  ;;  %v1453_v9 = vcvt.f32.s32 %v5078_v28 }
 0x586   : > { %1916 = vadd.xlane.f32.xlu0 %v1913_v22  ;;  %1914 = vadd.xlane.f32.xlu1 %v1912_v1  ;;  %v1937_v49 = vshrl.u32 %v1935_v55, 16  ;;  %v1936_v19 = vand.u32 65535, %v1935_v55  ;;  %v1413_v22 = vcvt.f32.s32 %v5064_v26  ;;  %v1441_v1 = vshll.u32 %v1440_v7, 16 }
 0x587   : > { %v1426_v55 = vcvt.f32.s32 %v5068_v32  ;;  %v1467_v44 = vshll.u32 %v1466_v13, 16  ;;  %v1465_v32 = vcvt.f32.s32 %v5080_v3  ;;  %v1452_v56 = vcvt.f32.s32 %v5076_v38 }
 0x588   : > { %v1939_v5 = vcvt.s32.f32 %v1937_v49  ;;  %v1938_v24 = vcvt.s32.f32 %v1936_v19  ;;  %v1389_v49 = vshll.u32 %v1388_v25, 16 }
 0x589   : > { %v5406_v28 = vadd.s32 %v1428_v23, %v1426_v55  ;;  %v5421_v25 = vadd.s32 %v1467_v44, %v1465_v32 }
 0x58a   : > { %1929 = vadd.xlane.f32.xlu0 %v1926_v46  ;;  %1927 = vadd.xlane.f32.xlu1 %v1925_v47  ;;  %v5386_v18 = vadd.s32 %v1389_v49, %v1387_v53  ;;  %v5402_v46 = vadd.s32 %v1441_v1, %v1439_v31  ;;  %v1454_v47 = vshll.u32 %v1453_v9, 16 }
 0x58b   : > { %7504 = vst [vmem:[#allocation40_spill] sm:$0xff] %v5421_v25  ;;  %vm7352_vm3 = vcmp.eq.s32.totalorder %v5406_v28, 7  ;;  %vm7345_vm13 = vcmp.eq.s32.totalorder %v5421_v25, 7 }
 0x58c   : > { %7501 = vst [vmem:[#allocation37_spill] sm:$0xff] %v5386_v18  ;;  %7503 = vst [vmem:[#allocation39_spill] sm:$0xff] %v5402_v46  ;;  %vm7349_vm1 = vcmp.eq.s32.totalorder %v5386_v18, 7  ;;  %vm7346_vm12 = vcmp.eq.s32.totalorder %v5402_v46, 7  ;;  %v1525_v38 = vsel %vm7352_vm3, %v5185_v30, %v5344_v17 }
 0x58d   : > { %v1522_v19 = vsel %vm7349_vm1, %v5162_v21, %v5331_v59  ;;  %v1526_v3 = vsel %vm7346_vm12, %v5190_v39, %v5342_v33  ;;  %v1478_v59 = vcvt.f32.s32 %v5084_v4  ;;  %v1528_v33 = vsel %vm7345_vm13, %v5240_v48, %v5346_v11 }
 0x58e   : > { %1942 = vadd.xlane.f32.xlu0 %v1939_v5  ;;  %1940 = vadd.xlane.f32.xlu1 %v1938_v24  ;;  %v5379_v24 = vadd.s32 %v1402_v2, %v1400_v61  ;;  %v1415_v5 = vshll.u32 %v1414_v36, 16  ;;  %v4136_v11 = vmov 9  }
 0x590   : > { %7500 = vst [vmem:[#allocation36_spill] sm:$0xff] %v5379_v24  ;;  %v5389_v43 = vadd.s32 %v1415_v5, %v1413_v22  ;;  %vm7348_vm8 = vcmp.eq.s32.totalorder %v5379_v24, 7 }
 0x591   : > { %v1523_v26 = vsel %vm7348_vm8, %v5174_v35, %v5333_v52  ;;  %v1479_v52 = vcvt.f32.s32 %v5087_v41  ;;  %v5424_v41 = vadd.s32 %v1454_v47, %v1452_v56 }
 0x592   : > { %7502 = vst [vmem:[#allocation38_spill] sm:$0xff] %v5389_v43  ;;  %vm7347_vm4 = vcmp.eq.s32.totalorder %v5389_v43, 7 }
 0x593   : > { %v1524_v34 = vsel %vm7347_vm4, %v5169_v63, %v5340_v20  ;;  %7505 = vst [vmem:[#allocation41_spill] sm:$0xff] %v5424_v41  ;;  %v1480_v20 = vshll.u32 %v1479_v52, 16  ;;  %vm7351_vm15 = vcmp.eq.s32.totalorder %v5424_v41, 7 }
 0x594   : > { %v1527_v17 = vsel %vm7351_vm15, %v5252_v58, %v5348_v14 }
 0x595   : > { %v5439_v61 = vadd.s32 %v1480_v20, %v1478_v59 }
 0x597   : > { %7506 = vst [vmem:[#allocation42_spill] sm:$0xff] %v5439_v61  ;;  %vm7350_vm9 = vcmp.eq.s32.totalorder %v5439_v61, 7 }
 0x598   : > { %v1529_v4 = vsel %vm7350_vm9, %v5262_v16, %v5354_v54 }
 0x59f   : > { %2009 = vperm.xlu1 %4063, %v5174_v35  }
 0x5a3   : > { %2013 = vperm.xlu1 %4063, %v5169_v63  }
 0x5a4   : > { %2005 = vperm.xlu0 %4062, %v5162_v21  }
 0x5a7   : > { %2021 = vperm.xlu1 %4063, %v5190_v39  }
 0x5a8   : > { %2017 = vperm.xlu0 %4062, %v5185_v30  }
 0x5ab   : > { %2029 = vperm.xlu1 %4063, %v5240_v48  }
 0x5ac   : > { %2025 = vperm.xlu0 %4062, %v5252_v58  }
 0x5af   : > { %1733 = vrot.lane.b32.xlu1 %v1523_v26, %s4130_s16 }
 0x5b0   : > { %2033 = vperm.xlu0 %4062, %v5262_v16   ;;  %4064 = vset.pattern.permute.xlu1 %v4136_v11 }
 0x5b3   : > { %1735 = vrot.lane.b32.xlu1 %v1524_v34, %s4130_s16 }
 0x5b4   : > { %1731 = vrot.lane.b32.xlu0 %v1522_v19, %s4130_s16 }
 0x5b5   : > { %4065 = vset.pattern.permute.xlu0 %v4136_v11 }
 0x5b7   : > { %1739 = vrot.lane.b32.xlu1 %v1526_v3, %s4130_s16 }
 0x5b8   : > { %1737 = vrot.lane.b32.xlu0 %v1525_v38, %s4130_s16 }
 0x5bb   : > { %1743 = vrot.lane.b32.xlu1 %v1528_v33, %s4130_s16 }
 0x5bc   : > { %1741 = vrot.lane.b32.xlu0 %v1527_v17, %s4130_s16 }
 0x5c0   : > { %1745 = vrot.lane.b32.xlu0 %v1529_v4, %s4130_s16 }
 0x5f1   : > { %v5458_v2 = vpop.xlane.xlu0 %1849  ;;  %v5462_v14 = vpop.xlane.xlu1 %1851 }
 0x5f5   : > { %v5460_v36 = vpop.xlane.xlu0 %1862  ;;  %v5466_v5 = vpop.xlane.xlu1 %1875 }
 0x5f9   : > { %v5464_v49 = vpop.xlane.xlu0 %1864  ;;  %v5470_v53 = vpop.xlane.xlu1 %1888 }
 0x5fd   : > { %v5468_v7 = vpop.xlane.xlu0 %1877  ;;  %v5474_v57 = vpop.xlane.xlu1 %1901 }
 0x601   : > { %v5472_v54 = vpop.xlane.xlu0 %1890 }
 0x605   : > { %v5476_v22 = vpop.xlane.xlu0 %1903 }
 0x60f   : > { %v5478_v1 = vpop.xlane.xlu1 %1914  ;;  %v5480_v13 = vpop.xlane.xlu0 %1916 }
 0x613   : > { %v5482_v23 = vpop.xlane.xlu1 %1927  ;;  %v5484_v9 = vpop.xlane.xlu0 %1929 }
 0x617   : > { %v5486_v26 = vpop.xlane.xlu1 %1940  ;;  %v5488_v31 = vpop.xlane.xlu0 %1942 }
 0x61b   : > { %v2010_v55 = vpop.permute.xlu1 %2009 }
 0x61c   : > { %vm2037_vm2 = vcmp.lt.f32.partialorder %v5174_v35, %v2010_v55  ;;  %vm2045_vm14 = vcmp.eq.f32.partialorder %v5174_v35, %v2010_v55 }
 0x61d   : > { %vm2054_vm7 = vmand %vm2045_vm14, %vm2052_vm10 }
 0x61e   : > { %vm2062_vm13 = vmor %vm2037_vm2, %vm2054_vm7 }
 0x61f   : > { %v2014_v44 = vpop.permute.xlu1 %2013  ;;  %v2006_v47 = vpop.permute.xlu0 %2005  ;;  %v2070_v52 = vsel %vm2062_vm13, 1, %v7466_v8 }
 0x620   : > { %vm2038_vm12 = vcmp.lt.f32.partialorder %v5169_v63, %v2014_v44  ;;  %vm2046_vm4 = vcmp.eq.f32.partialorder %v5169_v63, %v2014_v44  ;;  %vm2044_vm8 = vcmp.eq.f32.partialorder %v5162_v21, %v2006_v47  ;;  %vm2036_vm9 = vcmp.lt.f32.partialorder %v5162_v21, %v2006_v47 }
 0x621   : > { %vm2055_vm1 = vmand %vm2046_vm4, %vm2052_vm10  ;;  %v2090_v19 = vsel %vm252_vm0, %v2070_v52, 0 }
 0x622   : > { %vm2063_vm15 = vmor %vm2038_vm12, %vm2055_vm1  ;;  %v2091_v17 = vand.u32 65535, %v2090_v19  ;;  %v2092_v4 = vshrl.u32 %v2090_v19, 16 }
 0x623   : > { %vm2053_vm14 = vmand %vm2044_vm8, %vm2052_vm10  ;;  %v2022_v34 = vpop.permute.xlu1 %2021  ;;  %v2018_v32 = vpop.permute.xlu0 %2017  ;;  %v2071_v20 = vsel %vm2063_vm15, 1, %v7466_v8 }
 0x624   : > { %vm2061_vm2 = vmor %vm2036_vm9, %vm2053_vm14  ;;  %vm2048_vm7 = vcmp.eq.f32.partialorder %v5190_v39, %v2022_v34  ;;  %vm2047_vm3 = vcmp.eq.f32.partialorder %v5185_v30, %v2018_v32  ;;  %vm2039_vm13 = vcmp.lt.f32.partialorder %v5185_v30, %v2018_v32  ;;  %vm2040_vm4 = vcmp.lt.f32.partialorder %v5190_v39, %v2022_v34 }
 0x625   : > { %v2069_v56 = vsel %vm2061_vm2, 1, %v7466_v8  ;;  %vm2057_vm1 = vmand %vm2048_vm7, %vm2052_vm10  ;;  %v2103_v44 = vsel %vm252_vm0, %v2071_v20, 0  ;;  %v2093_v32 = vcvt.s32.f32 %v2091_v17 }
 0x626   : > { %v2077_v3 = vsel %vm252_vm0, %v2069_v56, 0  ;;  %vm2056_vm8 = vmand %vm2047_vm3, %vm2052_vm10  ;;  %v2094_v56 = vcvt.s32.f32 %v2092_v4  ;;  %v2105_v34 = vshrl.u32 %v2103_v44, 16 }
 0x627   : > { %v2026_v38 = vpop.permute.xlu0 %2025  ;;  %v2079_v59 = vshrl.u32 %v2077_v3, 16  ;;  %v2078_v33 = vand.u32 65535, %v2077_v3  ;;  %vm2064_vm12 = vmor %vm2039_vm13, %vm2056_vm8  ;;  %v2030_v52 = vpop.permute.xlu1 %2029  ;;  %v2104_v3 = vand.u32 65535, %v2103_v44 }
 0x628   : > { %vm2049_vm15 = vcmp.eq.f32.partialorder %v5252_v58, %v2026_v38  ;;  %vm2065_vm9 = vmor %vm2040_vm4, %vm2057_vm1  ;;  %v2072_v47 = vsel %vm2064_vm12, 1, %v7466_v8  ;;  %vm2041_vm3 = vcmp.lt.f32.partialorder %v5252_v58, %v2026_v38  ;;  %vm2050_vm2 = vcmp.eq.f32.partialorder %v5240_v48, %v2030_v52 }
 0x629   : > { %v2081_v11 = vcvt.s32.f32 %v2079_v59  ;;  %v2080_v55 = vcvt.s32.f32 %v2078_v33  ;;  %vm2058_vm14 = vmand %vm2049_vm15, %vm2052_vm10  ;;  %v2073_v19 = vsel %vm2065_vm9, 1, %v7466_v8  ;;  %v2116_v20 = vsel %vm252_vm0, %v2072_v47, 0 }
 0x62a   : > { %vm2042_vm7 = vcmp.lt.f32.partialorder %v5240_v48, %v2030_v52  ;;  %vm2066_vm13 = vmor %vm2041_vm3, %vm2058_vm14  ;;  %v2106_v33 = vcvt.s32.f32 %v2104_v3  ;;  %v2107_v38 = vcvt.s32.f32 %v2105_v34  ;;  %v2118_v17 = vshrl.u32 %v2116_v20, 16 }
 0x62b   : > { %2084 = vadd.xlane.f32.xlu0 %v2081_v11  ;;  %2082 = vadd.xlane.f32.xlu1 %v2080_v55  ;;  %v2034_v59 = vpop.permute.xlu0 %2033  ;;  %vm2059_vm1 = vmand %vm2050_vm2, %vm2052_vm10  ;;  %v2117_v4 = vand.u32 65535, %v2116_v20  ;;  %v2129_v11 = vsel %vm252_vm0, %v2073_v19, 0  ;;  %v2074_v55 = vsel %vm2066_vm13, 1, %v7466_v8 }
 0x62c   : > { %vm2051_vm8 = vcmp.eq.f32.partialorder %v5262_v16, %v2034_v59  ;;  %vm2067_vm4 = vmor %vm2042_vm7, %vm2059_vm1  ;;  %v2131_v44 = vshrl.u32 %v2129_v11, 16  ;;  %vm2043_vm12 = vcmp.lt.f32.partialorder %v5262_v16, %v2034_v59  ;;  %v2120_v47 = vcvt.s32.f32 %v2118_v17 }
 0x62d   : > { %vm2060_vm15 = vmand %vm2051_vm8, %vm2052_vm10  ;;  %v2119_v52 = vcvt.s32.f32 %v2117_v4  ;;  %v2075_v3 = vsel %vm2067_vm4, 1, %v7466_v8  ;;  %vm2285_vm4 = vcmp.lt.s32.totalorder %v4234_v42, 9 }
 0x62e   : > { %vm2068_vm9 = vmor %vm2043_vm12, %vm2060_vm15  ;;  %v2133_v34 = vcvt.s32.f32 %v2131_v44 }
 0x62f   : > { %2095 = vadd.xlane.f32.xlu0 %v2093_v32  ;;  %2097 = vadd.xlane.f32.xlu1 %v2094_v56  ;;  %v2130_v32 = vand.u32 65535, %v2129_v11  ;;  %v2142_v56 = vsel %vm252_vm0, %v2074_v55, 0  ;;  %v2076_v59 = vsel %vm2068_vm9, 1, %v7466_v8 }
 0x630   : > { %v2144_v20 = vshrl.u32 %v2142_v56, 16  ;;  %v2168_v55 = vsel %vm252_vm0, %v2076_v59, 0 }
 0x631   : > { %v2132_v19 = vcvt.s32.f32 %v2130_v32  ;;  %v2170_v44 = vshrl.u32 %v2168_v55, 16  ;;  %v2169_v32 = vand.u32 65535, %v2168_v55  ;;  %v1699_v55 = vcvt.f32.s32 %v5295_v50 }
 0x632   : > { %v2146_v17 = vcvt.s32.f32 %v2144_v20  ;;  %v1621_v20 = vcvt.f32.s32 %v5273_v29  ;;  %v1620_v29 = vcvt.f32.s32 %v5271_v37  ;;  %v1646_v37 = vcvt.f32.s32 %v5281_v6 }
 0x633   : > { %2108 = vadd.xlane.f32.xlu0 %v2106_v33  ;;  %2110 = vadd.xlane.f32.xlu1 %v2107_v38  ;;  %v2143_v33 = vand.u32 65535, %v2142_v56  ;;  %v2155_v38 = vsel %vm252_vm0, %v2075_v3, 0  ;;  %v2172_v56 = vcvt.s32.f32 %v2170_v44  ;;  %v2171_v3 = vcvt.s32.f32 %v2169_v32  ;;  %v1732_v44 = vpop.permute.xlu0 %1731 }
 0x634   : > { %v2157_v11 = vshrl.u32 %v2155_v38, 16  ;;  %v2156_v25 = vand.u32 65535, %v2155_v38  ;;  %v1633_v38 = vcvt.f32.s32 %v5277_v60  ;;  %v1700_v32 = vshll.u32 %v1699_v55, 16 }
 0x635   : > { %v2145_v4 = vcvt.s32.f32 %v2143_v33  ;;  %v1673_v33 = vcvt.f32.s32 %v5287_v27  ;;  %v1672_v27 = vcvt.f32.s32 %v5289_v45 }
 0x637   : > { %2123 = vadd.xlane.f32.xlu1 %v2120_v47  ;;  %2121 = vadd.xlane.f32.xlu0 %v2119_v52  ;;  %v2159_v47 = vcvt.s32.f32 %v2157_v11  ;;  %v2158_v52 = vcvt.s32.f32 %v2156_v25  ;;  %v1674_v11 = vshll.u32 %v1673_v33, 16 }
 0x63b   : > { %2136 = vadd.xlane.f32.xlu1 %v2133_v34  ;;  %2134 = vadd.xlane.f32.xlu0 %v2132_v19  ;;  %v1634_v34 = vcvt.f32.s32 %v5275_v15  ;;  %v1734_v19 = vpop.permute.xlu1 %1733  ;;  %v1647_v15 = vcvt.f32.s32 %v5279_v12  ;;  %v5559_v12 = vadd.s32 %v1674_v11, %v1672_v27 }
 0x63d   : > { %v1635_v25 = vshll.u32 %v1634_v34, 16  ;;  %7509 = vst [vmem:[#allocation45_spill] sm:$0xff] %v5559_v12  ;;  %v1686_v34 = vcvt.f32.s32 %v5291_v40  ;;  %vm7355_vm14 = vcmp.eq.s32.totalorder %v5559_v12, 7 }
 0x63f   : > { %2149 = vadd.xlane.f32.xlu1 %v2146_v17  ;;  %2147 = vadd.xlane.f32.xlu0 %v2145_v4  ;;  %v1736_v59 = vpop.permute.xlu1 %1735  ;;  %v1622_v17 = vshll.u32 %v1621_v20, 16  ;;  %v5549_v4 = vadd.s32 %v1635_v25, %v1633_v38  ;;  %v1738_v25 = vpop.permute.xlu0 %1737  ;;  %v1687_v38 = vshll.u32 %v1686_v34, 16 }
 0x641   : > { %7507 = vst [vmem:[#allocation43_spill] sm:$0xff] %v5549_v4  ;;  %v5556_v60 = vadd.s32 %v1622_v17, %v1620_v29  ;;  %vm7358_vm10 = vcmp.eq.s32.totalorder %v5549_v4, 7  ;;  %v1712_v17 = vcvt.f32.s32 %v5299_v62 }
 0x642   : > { %v1756_v45 = vsel %vm7358_vm10, %v5174_v35, %v1734_v19  ;;  %v1659_v19 = vcvt.f32.s32 %v5285_v0 }
 0x643   : > { %2162 = vadd.xlane.f32.xlu1 %v2159_v47  ;;  %2160 = vadd.xlane.f32.xlu0 %v2158_v52  ;;  %7508 = vst [vmem:[#allocation44_spill] sm:$0xff] %v5556_v60  ;;  %v1648_v47 = vshll.u32 %v1647_v15, 16  ;;  %v1660_v52 = vcvt.f32.s32 %v5283_v51  ;;  %v1740_v50 = vpop.permute.xlu1 %1739  ;;  %vm7357_vm3 = vcmp.eq.s32.totalorder %v5556_v60, 7  ;;  %v7512_v15 = vld [vmem:[#allocation34_spill] sm:$0xff]  ;;  %v1713_v62 = vshll.u32 %v1712_v17, 16  ;;  %v1742_v27 = vpop.permute.xlu0 %1741 }
 0x644   : > { %v1755_v6 = vsel %vm7357_vm3, %v5162_v21, %v1732_v44  ;;  %v1685_v11 = vcvt.f32.s32 %v7512_v15 }
 0x645   : > { %v5569_v51 = vadd.s32 %v1648_v47, %v1646_v37  ;;  %v7514_v47 = vld [vmem:[#allocation35_spill] sm:$0xff] }
 0x646   : > { %v5599_v29 = vadd.s32 %v1687_v38, %v1685_v11 }
 0x647   : > { %2175 = vadd.xlane.f32.xlu1 %v2172_v56  ;;  %2173 = vadd.xlane.f32.xlu0 %v2171_v3  ;;  %v1698_v56 = vcvt.f32.s32 %v5297_v10  ;;  %7510 = vst [vmem:[#allocation46_spill] sm:$0xff] %v5569_v51  ;;  %v1661_v3 = vshll.u32 %v1660_v52, 16  ;;  %v1759_v10 = vsel %vm7355_vm14, %v5190_v39, %v1740_v50  ;;  %v1744_v40 = vpop.permute.xlu1 %1743  ;;  %vm7356_vm2 = vcmp.eq.s32.totalorder %v5569_v51, 7  ;;  %v1746_v50 = vpop.permute.xlu0 %1745 }
 0x648   : > { %v1757_v0 = vsel %vm7356_vm2, %v5169_v63, %v1736_v59  ;;  %7513 = vst [vmem:[#allocation34_spill] sm:$0xff] %v5599_v29  ;;  %v1711_v52 = vcvt.f32.s32 %v7514_v47  ;;  %vm7360_vm1 = vcmp.eq.s32.totalorder %v5599_v29, 7 }
 0x649   : > { %v5573_v20 = vadd.s32 %v1700_v32, %v1698_v56  ;;  %v5585_v33 = vadd.s32 %v1661_v3, %v1659_v19  ;;  %v1760_v32 = vsel %vm7360_vm1, %v5252_v58, %v1742_v27 }
 0x64a   : > { %v5607_v44 = vadd.s32 %v1713_v62, %v1711_v52 }
 0x64b   : > { %7511 = vst [vmem:[#allocation47_spill] sm:$0xff] %v5573_v20  ;;  %vm7354_vm7 = vcmp.eq.s32.totalorder %v5573_v20, 7  ;;  %vm7362_vm13 = vcmp.eq.s32.totalorder %v5585_v33, 7 }
 0x64c   : > { %v1761_v55 = vsel %vm7354_vm7, %v5240_v48, %v1744_v40  ;;  %v1758_v59 = vsel %vm7362_vm13, %v5185_v30, %v1738_v25  ;;  %7515 = vst [vmem:[#allocation35_spill] sm:$0xff] %v5607_v44  ;;  %vm7359_vm8 = vcmp.eq.s32.totalorder %v5607_v44, 7 }
 0x64d   : > { %v1762_v37 = vsel %vm7359_vm8, %v5262_v16, %v1746_v50 }
 0x658   : > { %2238 = vperm.xlu1 %4064, %v5162_v21  }
 0x65c   : > { %2246 = vperm.xlu1 %4064, %v5169_v63  }
 0x65d   : > { %2242 = vperm.xlu0 %4065, %v5174_v35  }
 0x660   : > { %2250 = vperm.xlu1 %4064, %v5185_v30  }
 0x661   : > { %2254 = vperm.xlu0 %4065, %v5190_v39  }
 0x664   : > { %2258 = vperm.xlu1 %4064, %v5252_v58  }
 0x665   : > { %2262 = vperm.xlu0 %4065, %v5240_v48  }
 0x668   : > { %2266 = vperm.xlu1 %4064, %v5262_v16  }
 0x669   : > { %1966 = vrot.lane.b32.xlu0 %v1756_v45, %s4130_s16  ;;  %v4137_v45 = vmov 10  }
 0x66a   : > { %4066 = vset.pattern.permute.xlu0 %v4137_v45 }
 0x66c   : > { %1964 = vrot.lane.b32.xlu1 %v1755_v6, %s4130_s16 }
 0x66d   : > { %1972 = vrot.lane.b32.xlu0 %v1759_v10, %s4130_s16  ;;  %4067 = vset.pattern.permute.xlu1 %v4137_v45 }
 0x670   : > { %1968 = vrot.lane.b32.xlu1 %v1757_v0, %s4130_s16 }
 0x671   : > { %1976 = vrot.lane.b32.xlu0 %v1761_v55, %s4130_s16 }
 0x674   : > { %1970 = vrot.lane.b32.xlu1 %v1758_v59, %s4130_s16 }
 0x678   : > { %1974 = vrot.lane.b32.xlu1 %v1760_v32, %s4130_s16 }
 0x67c   : > { %1978 = vrot.lane.b32.xlu1 %v1762_v37, %s4130_s16 }
 0x6b4   : > { %v5619_v56 = vpop.xlane.xlu1 %2082  ;;  %v5621_v3 = vpop.xlane.xlu0 %2084 }
 0x6b8   : > { %v5623_v34 = vpop.xlane.xlu1 %2097  ;;  %v5625_v6 = vpop.xlane.xlu0 %2095 }
 0x6bc   : > { %v5627_v19 = vpop.xlane.xlu1 %2110  ;;  %v5629_v10 = vpop.xlane.xlu0 %2108 }
 0x6c0   : > { %v5631_v25 = vpop.xlane.xlu1 %2123  ;;  %v5633_v40 = vpop.xlane.xlu0 %2121 }
 0x6c4   : > { %v5635_v38 = vpop.xlane.xlu1 %2136  ;;  %v5637_v17 = vpop.xlane.xlu0 %2134 }
 0x6c8   : > { %v5639_v0 = vpop.xlane.xlu1 %2149  ;;  %v5641_v15 = vpop.xlane.xlu0 %2147 }
 0x6cc   : > { %v5643_v11 = vpop.xlane.xlu1 %2162  ;;  %v5645_v55 = vpop.xlane.xlu0 %2160 }
 0x6d0   : > { %v5647_v62 = vpop.xlane.xlu1 %2175  ;;  %v5650_v27 = vpop.xlane.xlu0 %2173 }
 0x6d4   : > { %v2239_v59 = vpop.permute.xlu1 %2238 }
 0x6d5   : > { %vm2269_vm12 = vcmp.lt.f32.partialorder %v5162_v21, %v2239_v59  ;;  %vm2277_vm15 = vcmp.eq.f32.partialorder %v5162_v21, %v2239_v59 }
 0x6d6   : > { %vm2286_vm9 = vmand %vm2277_vm15, %vm2285_vm4 }
 0x6d7   : > { %vm2294_vm7 = vmor %vm2269_vm12, %vm2286_vm9 }
 0x6d8   : > { %v2302_v47 = vsel %vm2294_vm7, 1, %v7466_v8  ;;  %v2247_v52 = vpop.permute.xlu1 %2246  ;;  %v2243_v32 = vpop.permute.xlu0 %2242 }
 0x6d9   : > { %vm2271_vm14 = vcmp.lt.f32.partialorder %v5169_v63, %v2247_v52  ;;  %vm2279_vm2 = vcmp.eq.f32.partialorder %v5169_v63, %v2247_v52  ;;  %vm2278_vm3 = vcmp.eq.f32.partialorder %v5174_v35, %v2243_v32  ;;  %vm2270_vm8 = vcmp.lt.f32.partialorder %v5174_v35, %v2243_v32 }
 0x6da   : > { %vm2288_vm10 = vmand %vm2279_vm2, %vm2285_vm4  ;;  %v2310_v21 = vsel %vm252_vm0, %v2302_v47, 0 }
 0x6db   : > { %vm2296_vm1 = vmor %vm2271_vm14, %vm2288_vm10  ;;  %v2311_v50 = vand.u32 65535, %v2310_v21  ;;  %v2312_v37 = vshrl.u32 %v2310_v21, 16 }
 0x6dc   : > { %v2304_v45 = vsel %vm2296_vm1, 1, %v7466_v8  ;;  %vm2287_vm7 = vmand %vm2278_vm3, %vm2285_vm4  ;;  %v2251_v59 = vpop.permute.xlu1 %2250  ;;  %v2255_v20 = vpop.permute.xlu0 %2254 }
 0x6dd   : > { %vm2295_vm12 = vmor %vm2270_vm8, %vm2287_vm7  ;;  %vm2272_vm15 = vcmp.lt.f32.partialorder %v5185_v30, %v2251_v59  ;;  %vm2280_vm9 = vcmp.eq.f32.partialorder %v5185_v30, %v2251_v59  ;;  %vm2273_vm2 = vcmp.lt.f32.partialorder %v5190_v39, %v2255_v20  ;;  %vm2281_vm13 = vcmp.eq.f32.partialorder %v5190_v39, %v2255_v20 }
 0x6de   : > { %v2303_v63 = vsel %vm2295_vm12, 1, %v7466_v8  ;;  %vm2289_vm10 = vmand %vm2280_vm9, %vm2285_vm4  ;;  %v2313_v35 = vcvt.s32.f32 %v2311_v50  ;;  %v2314_v47 = vcvt.s32.f32 %v2312_v37  ;;  %v2336_v52 = vsel %vm252_vm0, %v2304_v45, 0 }
 0x6df   : > { %vm2297_vm3 = vmor %vm2272_vm15, %vm2289_vm10  ;;  %v2337_v32 = vand.u32 65535, %v2336_v52  ;;  %v2323_v21 = vsel %vm252_vm0, %v2303_v63, 0 }
 0x6e0   : > { %v2305_v12 = vsel %vm2297_vm3, 1, %v7466_v8  ;;  %vm2290_vm14 = vmand %vm2281_vm13, %vm2285_vm4  ;;  %2315 = vadd.xlane.f32.xlu0 %v2313_v35  ;;  %2317 = vadd.xlane.f32.xlu1 %v2314_v47  ;;  %v2259_v30 = vpop.permute.xlu1 %2258  ;;  %v2263_v59 = vpop.permute.xlu0 %2262  ;;  %v2324_v51 = vand.u32 65535, %v2323_v21  ;;  %v2325_v60 = vshrl.u32 %v2323_v21, 16  ;;  %v2338_v47 = vshrl.u32 %v2336_v52, 16 }
 0x6e1   : > { %vm2298_vm1 = vmor %vm2273_vm2, %vm2290_vm14  ;;  %vm2274_vm8 = vcmp.lt.f32.partialorder %v5252_v58, %v2259_v30  ;;  %vm2282_vm7 = vcmp.eq.f32.partialorder %v5252_v58, %v2259_v30  ;;  %vm2275_vm12 = vcmp.lt.f32.partialorder %v5240_v48, %v2263_v59  ;;  %vm2283_vm15 = vcmp.eq.f32.partialorder %v5240_v48, %v2263_v59 }
 0x6e2   : > { %v2306_v50 = vsel %vm2298_vm1, 1, %v7466_v8  ;;  %vm2291_vm13 = vmand %vm2282_vm7, %vm2285_vm4  ;;  %v2339_v37 = vcvt.s32.f32 %v2337_v32  ;;  %v2326_v45 = vcvt.s32.f32 %v2324_v51  ;;  %v2349_v63 = vsel %vm252_vm0, %v2305_v12, 0 }
 0x6e3   : > { %vm2299_vm9 = vmor %vm2274_vm8, %vm2291_vm13  ;;  %v2350_v39 = vand.u32 65535, %v2349_v63  ;;  %v2362_v20 = vsel %vm252_vm0, %v2306_v50, 0  ;;  %v2327_v12 = vcvt.s32.f32 %v2325_v60  ;;  %v2340_v48 = vcvt.s32.f32 %v2338_v47 }
 0x6e4   : > { %v2307_v35 = vsel %vm2299_vm9, 1, %v7466_v8  ;;  %vm2292_vm2 = vmand %vm2283_vm15, %vm2285_vm4  ;;  %2341 = vadd.xlane.f32.xlu1 %v2339_v37  ;;  %2328 = vadd.xlane.f32.xlu0 %v2326_v45  ;;  %v2267_v58 = vpop.permute.xlu1 %2266  ;;  %v2363_v32 = vand.u32 65535, %v2362_v20  ;;  %v2351_v50 = vshrl.u32 %v2349_v63, 16 }
 0x6e5   : > { %vm2300_vm10 = vmor %vm2275_vm12, %vm2292_vm2  ;;  %vm2284_vm3 = vcmp.eq.f32.partialorder %v5262_v16, %v2267_v58  ;;  %v2352_v51 = vcvt.s32.f32 %v2350_v39  ;;  %vm2276_vm14 = vcmp.lt.f32.partialorder %v5262_v16, %v2267_v58  ;;  %v2375_v21 = vsel %vm252_vm0, %v2307_v35, 0 }
 0x6e6   : > { %vm2293_vm1 = vmand %vm2284_vm3, %vm2285_vm4  ;;  %v2308_v30 = vsel %vm2300_vm10, 1, %v7466_v8  ;;  %v2365_v59 = vcvt.s32.f32 %v2363_v32  ;;  %v2376_v37 = vand.u32 65535, %v2375_v21  ;;  %v2353_v60 = vcvt.s32.f32 %v2351_v50 }
 0x6e7   : > { %vm2301_vm8 = vmor %vm2276_vm14, %vm2293_vm1  ;;  %v2388_v45 = vsel %vm252_vm0, %v2308_v30, 0  ;;  %v2364_v39 = vshrl.u32 %v2362_v20, 16  ;;  %v2377_v47 = vshrl.u32 %v2375_v21, 16  ;;  %v1867_v21 = vcvt.f32.s32 %v5464_v49 }
 0x6e8   : > { %2354 = vadd.xlane.f32.xlu1 %v2352_v51  ;;  %2330 = vadd.xlane.f32.xlu0 %v2327_v12  ;;  %v2309_v16 = vsel %vm2301_vm8, 1, %v7466_v8  ;;  %v2378_v52 = vcvt.s32.f32 %v2376_v37  ;;  %v2389_v58 = vand.u32 65535, %v2388_v45  ;;  %v5705_v37 = vld [vmem:[%s4175_s15 + $0x8] sm:$0xff]  ;;  %v1965_v49 = vpop.permute.xlu1 %1964  ;;  %vm2518_vm14 = vcmp.lt.s32.totalorder %v4234_v42, 10 }
 0x6e9   : > { %v2401_v35 = vsel %vm252_vm0, %v2309_v16, 0  ;;  %v2366_v51 = vcvt.s32.f32 %v2364_v39  ;;  %v2379_v32 = vcvt.s32.f32 %v2377_v47  ;;  %v5710_v16 = vld [vmem:[%s4175_s15 + $0x10] sm:$0xff]  ;;  %v5716_v39 = vld [vmem:[%s4175_s15 + $0x20] sm:$0xff]  ;;  %v1967_v47 = vpop.permute.xlu0 %1966 }
 0x6ea   : > { %v2391_v12 = vcvt.s32.f32 %v2389_v58  ;;  %v2402_v63 = vand.u32 65535, %v2401_v35 }
 0x6ec   : > { %2343 = vadd.xlane.f32.xlu0 %v2340_v48  ;;  %2367 = vadd.xlane.f32.xlu1 %v2365_v59  ;;  %v2404_v30 = vcvt.s32.f32 %v2402_v63  ;;  %v2390_v48 = vshrl.u32 %v2388_v45, 16  ;;  %v2403_v59 = vshrl.u32 %v2401_v35, 16  ;;  %v1866_v45 = vcvt.f32.s32 %v5460_v36  ;;  %v5724_v63 = vld [vmem:[%s4175_s15 + $0x30] sm:$0xff] }
 0x6ed   : > { %v1854_v36 = vcvt.f32.s32 %v5462_v14  ;;  %v5742_v14 = vld [vmem:[%s4175_s15 + $0x18] sm:$0xff] }
 0x6ee   : > { %v2392_v20 = vcvt.s32.f32 %v2390_v48  ;;  %v2405_v50 = vcvt.s32.f32 %v2403_v59  ;;  %v1905_v48 = vcvt.f32.s32 %v5474_v57 }
 0x6ef   : > { %v1855_v59 = vshll.u32 %v1854_v36, 16  ;;  %v1892_v36 = vcvt.f32.s32 %v5470_v53 }
 0x6f0   : > { %2356 = vadd.xlane.f32.xlu0 %v2353_v60  ;;  %2380 = vadd.xlane.f32.xlu1 %v2378_v52  ;;  %v1868_v60 = vshll.u32 %v1867_v21, 16  ;;  %v1880_v52 = vcvt.f32.s32 %v5468_v7  ;;  %v5729_v7 = vld [vmem:[%s4175_s15] sm:$0xff]  ;;  %v1973_v21 = vpop.permute.xlu0 %1972 }
 0x6f2   : > { %v5719_v58 = vadd.s32 %v1868_v60, %v1866_v45  ;;  %v1881_v35 = vshll.u32 %v1880_v52, 16  ;;  %v1893_v45 = vcvt.f32.s32 %v5472_v54  ;;  %v1853_v60 = vcvt.f32.s32 %v5458_v2 }
 0x6f3   : > { %v1931_v52 = vcvt.f32.s32 %v5482_v23 }
 0x6f4   : > { %2369 = vadd.xlane.f32.xlu0 %v2366_v51  ;;  %2393 = vadd.xlane.f32.xlu1 %v2391_v12  ;;  %7516 = vst [vmem:[#allocation48_spill] sm:$0xff] %v5719_v58  ;;  %v1906_v51 = vcvt.f32.s32 %v5476_v22  ;;  %v1879_v12 = vcvt.f32.s32 %v5466_v5  ;;  %v1932_v22 = vcvt.f32.s32 %v5484_v9  ;;  %vm7369_vm4 = vcmp.eq.s32.totalorder %v5719_v58, 7  ;;  %v1977_v23 = vpop.permute.xlu0 %1976 }
 0x6f5   : > { %v1989_v5 = vsel %vm7369_vm4, %v5705_v37, %v1967_v47  ;;  %v1894_v54 = vshll.u32 %v1893_v45, 16  ;;  %v1919_v47 = vcvt.f32.s32 %v5480_v13 }
 0x6f6   : > { %v1933_v9 = vshll.u32 %v1932_v22, 16  ;;  %v5771_v22 = vld [vmem:[%s4175_s15 + $0x38] sm:$0xff] }
 0x6f7   : > { %v1920_v13 = vshll.u32 %v1919_v47, 16 }
 0x6f8   : > { %2382 = vadd.xlane.f32.xlu0 %v2379_v32  ;;  %2406 = vadd.xlane.f32.xlu1 %v2404_v30  ;;  %v5732_v32 = vadd.s32 %v1881_v35, %v1879_v12  ;;  %v1907_v30 = vshll.u32 %v1906_v51, 16  ;;  %v5756_v35 = vld [vmem:[%s4175_s15 + $0x28] sm:$0xff]  ;;  %v5759_v51 = vadd.s32 %v1855_v59, %v1853_v60  ;;  %v5761_v12 = vadd.s32 %v1933_v9, %v1931_v52 }
 0x6f9   : > { %v1918_v59 = vcvt.f32.s32 %v5478_v1 }
 0x6fa   : > { %7517 = vst [vmem:[#allocation49_spill] sm:$0xff] %v5732_v32  ;;  %vm7367_vm7 = vcmp.eq.s32.totalorder %v5732_v32, 7  ;;  %7519 = vst [vmem:[#allocation51_spill] sm:$0xff] %v5759_v51  ;;  %vm7370_vm15 = vcmp.eq.s32.totalorder %v5759_v51, 7  ;;  %vm7366_vm13 = vcmp.eq.s32.totalorder %v5761_v12, 7 }
 0x6fb   : > { %7520 = vst [vmem:[#allocation52_spill] sm:$0xff] %v5761_v12  ;;  %v1988_v53 = vsel %vm7370_vm15, %v5729_v7, %v1965_v49  ;;  %v5788_v9 = vadd.s32 %v1920_v13, %v1918_v59 }
 0x6fc   : > { %2395 = vadd.xlane.f32.xlu0 %v2392_v20  ;;  %v1969_v20 = vpop.permute.xlu1 %1968 }
 0x6fd   : > { %v1990_v57 = vsel %vm7367_vm7, %v5710_v16, %v1969_v20  ;;  %v1994_v20 = vsel %vm7366_vm13, %v5724_v63, %v1977_v23  ;;  %7522 = vst [vmem:[#allocation54_spill] sm:$0xff] %v5788_v9  ;;  %vm7373_vm2 = vcmp.eq.s32.totalorder %v5788_v9, 7 }
 0x700   : > { %2408 = vadd.xlane.f32.xlu0 %v2405_v50  ;;  %v5745_v50 = vadd.s32 %v1907_v30, %v1905_v48  ;;  %v1971_v30 = vpop.permute.xlu1 %1970  ;;  %v1945_v48 = vcvt.f32.s32 %v5488_v31 }
 0x702   : > { %7518 = vst [vmem:[#allocation50_spill] sm:$0xff] %v5745_v50  ;;  %vm7368_vm12 = vcmp.eq.s32.totalorder %v5745_v50, 7 }
 0x703   : > { %v1992_v2 = vsel %vm7368_vm12, %v5716_v39, %v1973_v21  ;;  %v1946_v21 = vshll.u32 %v1945_v48, 16 }
 0x704   : > { %v1975_v31 = vpop.permute.xlu1 %1974 }
 0x705   : > { %v1993_v1 = vsel %vm7373_vm2, %v5756_v35, %v1975_v31 }
 0x708   : > { %v1979_v60 = vpop.permute.xlu1 %1978 }
 0x709   : > { %2475 = vperm.xlu1 %4067, %v5705_v37  }
 0x70d   : > { %2479 = vperm.xlu1 %4067, %v5710_v16  }
 0x711   : > { %2487 = vperm.xlu1 %4067, %v5716_v39  }
 0x715   : > { %2495 = vperm.xlu1 %4067, %v5724_v63  }
 0x716   : > { %2471 = vperm.xlu0 %4066, %v5729_v7  }
 0x719   : > { %2199 = vrot.lane.b32.xlu1 %v1989_v5, %s4130_s16  ;;  %v5776_v5 = vadd.s32 %v1894_v54, %v1892_v36 }
 0x71a   : > { %2483 = vperm.xlu0 %4066, %v5742_v14  }
 0x71b   : > { %7521 = vst [vmem:[#allocation53_spill] sm:$0xff] %v5776_v5  ;;  %vm7375_vm9 = vcmp.eq.s32.totalorder %v5776_v5, 7 }
 0x71c   : > { %v1991_v45 = vsel %vm7375_vm9, %v5742_v14, %v1971_v30 }
 0x71d   : > { %2201 = vrot.lane.b32.xlu1 %v1990_v57, %s4130_s16  ;;  %v1944_v57 = vcvt.f32.s32 %v5486_v26  ;;  %v4138_v26 = vmov 11  }
 0x71e   : > { %2491 = vperm.xlu0 %4066, %v5756_v35   ;;  %4068 = vset.pattern.permute.xlu1 %v4138_v26 }
 0x71f   : > { %v5796_v49 = vadd.s32 %v1946_v21, %v1944_v57 }
 0x721   : > { %2205 = vrot.lane.b32.xlu1 %v1992_v2, %s4130_s16  ;;  %7523 = vst [vmem:[#allocation55_spill] sm:$0xff] %v5796_v49  ;;  %vm7372_vm10 = vcmp.eq.s32.totalorder %v5796_v49, 7 }
 0x722   : > { %2499 = vperm.xlu0 %4066, %v5771_v22   ;;  %v1995_v52 = vsel %vm7372_vm10, %v5771_v22, %v1979_v60 }
 0x725   : > { %2209 = vrot.lane.b32.xlu1 %v1994_v20, %s4130_s16 }
 0x726   : > { %2197 = vrot.lane.b32.xlu0 %v1988_v53, %s4130_s16 }
 0x727   : > { %4069 = vset.pattern.permute.xlu0 %v4138_v26 }
 0x72a   : > { %2203 = vrot.lane.b32.xlu0 %v1991_v45, %s4130_s16 }
 0x72e   : > { %2207 = vrot.lane.b32.xlu0 %v1993_v1, %s4130_s16 }
 0x732   : > { %2211 = vrot.lane.b32.xlu0 %v1995_v52, %s4130_s16 }
 0x769   : > { %v5808_v54 = vpop.xlane.xlu1 %2317  ;;  %v5810_v47 = vpop.xlane.xlu0 %2315 }
 0x76d   : > { %v5812_v2 = vpop.xlane.xlu1 %2341  ;;  %v5814_v23 = vpop.xlane.xlu0 %2328 }
 0x771   : > { %v5816_v36 = vpop.xlane.xlu1 %2354  ;;  %v5818_v30 = vpop.xlane.xlu0 %2330 }
 0x775   : > { %v5820_v13 = vpop.xlane.xlu1 %2367  ;;  %v5822_v48 = vpop.xlane.xlu0 %2343 }
 0x779   : > { %v5824_v20 = vpop.xlane.xlu1 %2380  ;;  %v5826_v53 = vpop.xlane.xlu0 %2356 }
 0x77d   : > { %v5828_v59 = vpop.xlane.xlu1 %2393  ;;  %v5830_v21 = vpop.xlane.xlu0 %2369 }
 0x781   : > { %v5832_v31 = vpop.xlane.xlu1 %2406  ;;  %v5834_v45 = vpop.xlane.xlu0 %2382 }
 0x785   : > { %v2476_v57 = vpop.permute.xlu1 %2475  ;;  %v5836_v1 = vpop.xlane.xlu0 %2395 }
 0x786   : > { %vm2511_vm3 = vcmp.eq.f32.partialorder %v5705_v37, %v2476_v57  ;;  %vm2503_vm1 = vcmp.lt.f32.partialorder %v5705_v37, %v2476_v57 }
 0x787   : > { %vm2520_vm8 = vmand %vm2511_vm3, %vm2518_vm14 }
 0x788   : > { %vm2528_vm7 = vmor %vm2503_vm1, %vm2520_vm8 }
 0x789   : > { %v2480_v60 = vpop.permute.xlu1 %2479  ;;  %v5843_v52 = vpop.xlane.xlu0 %2408  ;;  %v2536_v12 = vsel %vm2528_vm7, 1, %v7466_v8 }
 0x78a   : > { %vm2512_vm13 = vcmp.eq.f32.partialorder %v5710_v16, %v2480_v60  ;;  %vm2504_vm12 = vcmp.lt.f32.partialorder %v5710_v16, %v2480_v60  ;;  %v2556_v60 = vsel %vm252_vm0, %v2536_v12, 0 }
 0x78b   : > { %vm2521_vm4 = vmand %vm2512_vm13, %vm2518_vm14  ;;  %v2557_v43 = vand.u32 65535, %v2556_v60  ;;  %v2558_v24 = vshrl.u32 %v2556_v60, 16 }
 0x78c   : > { %vm2529_vm2 = vmor %vm2504_vm12, %vm2521_vm4 }
 0x78d   : > { %v2488_v57 = vpop.permute.xlu1 %2487  ;;  %v2559_v49 = vcvt.s32.f32 %v2557_v43  ;;  %v2560_v44 = vcvt.s32.f32 %v2558_v24 }
 0x78e   : > { %vm2514_vm1 = vcmp.eq.f32.partialorder %v5716_v39, %v2488_v57  ;;  %vm2506_vm12 = vcmp.lt.f32.partialorder %v5716_v39, %v2488_v57 }
 0x78f   : > { %vm2523_vm4 = vmand %vm2514_vm1, %vm2518_vm14 }
 0x791   : > { %v2472_v26 = vpop.permute.xlu0 %2471 }
 0x792   : > { %vm2510_vm15 = vcmp.eq.f32.partialorder %v5729_v7, %v2472_v26  ;;  %vm2502_vm10 = vcmp.lt.f32.partialorder %v5729_v7, %v2472_v26  ;;  %v2537_v26 = vsel %vm2529_vm2, 1, %v7466_v8  ;;  %vm2531_vm2 = vmor %vm2506_vm12, %vm2523_vm4 }
 0x793   : > { %vm2519_vm3 = vmand %vm2510_vm15, %vm2518_vm14  ;;  %v2569_v18 = vsel %vm252_vm0, %v2537_v26, 0 }
 0x794   : > { %vm2527_vm8 = vmor %vm2502_vm10, %vm2519_vm3  ;;  %v2570_v9 = vand.u32 65535, %v2569_v18 }
 0x795   : > { %v2484_v32 = vpop.permute.xlu0 %2483  ;;  %v2535_v50 = vsel %vm2527_vm8, 1, %v7466_v8 }
 0x796   : > { %vm2513_vm9 = vcmp.eq.f32.partialorder %v5742_v14, %v2484_v32  ;;  %vm2505_vm13 = vcmp.lt.f32.partialorder %v5742_v14, %v2484_v32  ;;  %v2543_v58 = vsel %vm252_vm0, %v2535_v50, 0  ;;  %v2572_v24 = vcvt.s32.f32 %v2570_v9 }
 0x797   : > { %vm2522_vm7 = vmand %vm2513_vm9, %vm2518_vm14  ;;  %v2545_v4 = vshrl.u32 %v2543_v58, 16  ;;  %v2544_v46 = vand.u32 65535, %v2543_v58  ;;  %v2496_v58 = vpop.permute.xlu1 %2495 }
 0x798   : > { %vm2530_vm15 = vmor %vm2505_vm13, %vm2522_vm7  ;;  %vm2516_vm1 = vcmp.eq.f32.partialorder %v5724_v63, %v2496_v58  ;;  %vm2508_vm8 = vcmp.lt.f32.partialorder %v5724_v63, %v2496_v58 }
 0x799   : > { %v2492_v51 = vpop.permute.xlu0 %2491  ;;  %v2547_v12 = vcvt.s32.f32 %v2545_v4  ;;  %v2546_v32 = vcvt.s32.f32 %v2544_v46  ;;  %v2538_v50 = vsel %vm2530_vm15, 1, %v7466_v8  ;;  %v2571_v4 = vshrl.u32 %v2569_v18, 16  ;;  %vm2525_vm7 = vmand %vm2516_vm1, %vm2518_vm14 }
 0x79a   : > { %vm2515_vm9 = vcmp.eq.f32.partialorder %v5756_v35, %v2492_v51  ;;  %vm2507_vm10 = vcmp.lt.f32.partialorder %v5756_v35, %v2492_v51  ;;  %v2539_v46 = vsel %vm2531_vm2, 1, %v7466_v8  ;;  %v2582_v57 = vsel %vm252_vm0, %v2538_v50, 0  ;;  %vm2533_vm12 = vmor %vm2508_vm8, %vm2525_vm7 }
 0x79b   : > { %2550 = vadd.xlane.f32.xlu0 %v2547_v12  ;;  %2548 = vadd.xlane.f32.xlu1 %v2546_v32  ;;  %vm2524_vm3 = vmand %vm2515_vm9, %vm2518_vm14  ;;  %v2573_v43 = vcvt.s32.f32 %v2571_v4  ;;  %v2584_v51 = vshrl.u32 %v2582_v57, 16  ;;  %v2583_v26 = vand.u32 65535, %v2582_v57  ;;  %v2595_v18 = vsel %vm252_vm0, %v2539_v46, 0 }
 0x79c   : > { %vm2532_vm13 = vmor %vm2507_vm10, %vm2524_vm3  ;;  %v2596_v32 = vand.u32 65535, %v2595_v18  ;;  %v2541_v58 = vsel %vm2533_vm12, 1, %v7466_v8  ;;  %vm2751_vm12 = vcmp.lt.s32.totalorder %v4234_v42, 11 }
 0x79d   : > { %v2500_v60 = vpop.permute.xlu0 %2499  ;;  %v2540_v12 = vsel %vm2532_vm13, 1, %v7466_v8  ;;  %v2586_v9 = vcvt.s32.f32 %v2584_v51 }
 0x79e   : > { %vm2517_vm4 = vcmp.eq.f32.partialorder %v5771_v22, %v2500_v60  ;;  %vm2509_vm15 = vcmp.lt.f32.partialorder %v5771_v22, %v2500_v60  ;;  %v2608_v50 = vsel %vm252_vm0, %v2540_v12, 0  ;;  %v2598_v46 = vcvt.s32.f32 %v2596_v32 }
 0x79f   : > { %2561 = vadd.xlane.f32.xlu0 %v2559_v49  ;;  %2563 = vadd.xlane.f32.xlu1 %v2560_v44  ;;  %v2597_v44 = vshrl.u32 %v2595_v18, 16  ;;  %vm2526_vm9 = vmand %vm2517_vm4, %vm2518_vm14  ;;  %v2585_v49 = vcvt.s32.f32 %v2583_v26  ;;  %v2610_v57 = vshrl.u32 %v2608_v50, 16 }
 0x7a0   : > { %vm2534_vm2 = vmor %vm2509_vm15, %vm2526_vm9 }
 0x7a1   : > { %v2599_v4 = vcvt.s32.f32 %v2597_v44  ;;  %v2542_v60 = vsel %vm2534_vm2, 1, %v7466_v8  ;;  %v2612_v51 = vcvt.s32.f32 %v2610_v57  ;;  %v2087_v57 = vcvt.f32.s32 %v5621_v3 }
 0x7a2   : > { %v2634_v12 = vsel %vm252_vm0, %v2542_v60, 0  ;;  %v2086_v3 = vcvt.f32.s32 %v5619_v56  ;;  %v2112_v56 = vcvt.f32.s32 %v5629_v10 }
 0x7a3   : > { %2574 = vadd.xlane.f32.xlu0 %v2572_v24  ;;  %2576 = vadd.xlane.f32.xlu1 %v2573_v43  ;;  %v2609_v24 = vand.u32 65535, %v2608_v50  ;;  %v2621_v43 = vsel %vm252_vm0, %v2541_v58, 0  ;;  %v2636_v44 = vshrl.u32 %v2634_v12, 16  ;;  %v2635_v32 = vand.u32 65535, %v2634_v12 }
 0x7a4   : > { %v2623_v18 = vshrl.u32 %v2621_v43, 16  ;;  %v2622_v61 = vand.u32 65535, %v2621_v43  ;;  %v2099_v43 = vcvt.f32.s32 %v5625_v6  ;;  %v2165_v12 = vcvt.f32.s32 %v5643_v11 }
 0x7a5   : > { %v2611_v26 = vcvt.s32.f32 %v2609_v24  ;;  %v2638_v50 = vcvt.s32.f32 %v2636_v44  ;;  %v2637_v58 = vcvt.s32.f32 %v2635_v32  ;;  %v2139_v24 = vcvt.f32.s32 %v5635_v38  ;;  %v2198_v44 = vpop.permute.xlu0 %2197 }
 0x7a6   : > { %v2138_v38 = vcvt.f32.s32 %v5637_v17  ;;  %v2166_v32 = vshll.u32 %v2165_v12, 16 }
 0x7a7   : > { %2589 = vadd.xlane.f32.xlu1 %v2586_v9  ;;  %2587 = vadd.xlane.f32.xlu0 %v2585_v49  ;;  %v2625_v9 = vcvt.s32.f32 %v2623_v18  ;;  %v2624_v49 = vcvt.s32.f32 %v2622_v61  ;;  %v2140_v18 = vshll.u32 %v2139_v24, 16 }
 0x7ab   : > { %2602 = vadd.xlane.f32.xlu1 %v2599_v4  ;;  %2600 = vadd.xlane.f32.xlu0 %v2598_v46  ;;  %v2100_v4 = vcvt.f32.s32 %v5623_v34  ;;  %v2200_v46 = vpop.permute.xlu1 %2199  ;;  %v2113_v34 = vcvt.f32.s32 %v5627_v19  ;;  %v5909_v19 = vadd.s32 %v2140_v18, %v2138_v38 }
 0x7ad   : > { %v2101_v61 = vshll.u32 %v2100_v4, 16  ;;  %7526 = vst [vmem:[#allocation58_spill] sm:$0xff] %v5909_v19  ;;  %v2152_v4 = vcvt.f32.s32 %v5639_v0  ;;  %vm7389_vm3 = vcmp.eq.s32.totalorder %v5909_v19, 7 }
 0x7af   : > { %2615 = vadd.xlane.f32.xlu1 %v2612_v51  ;;  %2613 = vadd.xlane.f32.xlu0 %v2611_v26  ;;  %v2202_v60 = vpop.permute.xlu1 %2201  ;;  %v2088_v51 = vshll.u32 %v2087_v57, 16  ;;  %v5899_v26 = vadd.s32 %v2101_v61, %v2099_v43  ;;  %v2204_v61 = vpop.permute.xlu0 %2203  ;;  %v2153_v43 = vshll.u32 %v2152_v4, 16 }
 0x7b1   : > { %7524 = vst [vmem:[#allocation56_spill] sm:$0xff] %v5899_v26  ;;  %v5906_v6 = vadd.s32 %v2088_v51, %v2086_v3  ;;  %vm7392_vm14 = vcmp.eq.s32.totalorder %v5899_v26, 7  ;;  %v2178_v51 = vcvt.f32.s32 %v5647_v62 }
 0x7b2   : > { %v2222_v17 = vsel %vm7392_vm14, %v5705_v37, %v2200_v46  ;;  %v2125_v46 = vcvt.f32.s32 %v5633_v40 }
 0x7b3   : > { %2628 = vadd.xlane.f32.xlu1 %v2625_v9  ;;  %2626 = vadd.xlane.f32.xlu0 %v2624_v49  ;;  %7525 = vst [vmem:[#allocation57_spill] sm:$0xff] %v5906_v6  ;;  %v2114_v9 = vshll.u32 %v2113_v34, 16  ;;  %v2126_v49 = vcvt.f32.s32 %v5631_v25  ;;  %v2206_v11 = vpop.permute.xlu1 %2205  ;;  %vm7390_vm10 = vcmp.eq.s32.totalorder %v5906_v6, 7  ;;  %v2151_v34 = vcvt.f32.s32 %v5641_v15  ;;  %v2208_v3 = vpop.permute.xlu0 %2207 }
 0x7b4   : > { %v2221_v10 = vsel %vm7390_vm10, %v5729_v7, %v2198_v44  ;;  %v2179_v62 = vshll.u32 %v2178_v51, 16  ;;  %v2177_v15 = vcvt.f32.s32 %v5650_v27  ;;  %v4139_v27 = vmov 12  }
 0x7b5   : > { %v5919_v25 = vadd.s32 %v2114_v9, %v2112_v56  ;;  %v5949_v12 = vadd.s32 %v2153_v43, %v2151_v34 }
 0x7b6   : > { %v5957_v38 = vadd.s32 %v2179_v62, %v2177_v15 }
 0x7b7   : > { %2641 = vadd.xlane.f32.xlu1 %v2638_v50  ;;  %2639 = vadd.xlane.f32.xlu0 %v2637_v58  ;;  %v2164_v50 = vcvt.f32.s32 %v5645_v55  ;;  %7527 = vst [vmem:[#allocation59_spill] sm:$0xff] %v5919_v25  ;;  %v2127_v58 = vshll.u32 %v2126_v49, 16  ;;  %v2225_v55 = vsel %vm7389_vm3, %v5716_v39, %v2206_v11  ;;  %v2210_v0 = vpop.permute.xlu1 %2209  ;;  %vm7391_vm1 = vcmp.eq.s32.totalorder %v5919_v25, 7  ;;  %7530 = vst [vmem:[#allocation62_spill] sm:$0xff] %v5949_v12  ;;  %v2212_v49 = vpop.permute.xlu0 %2211 }
 0x7b8   : > { %v2223_v40 = vsel %vm7391_vm1, %v5710_v16, %v2202_v60  ;;  %7531 = vst [vmem:[#allocation63_spill] sm:$0xff] %v5957_v38  ;;  %vm7394_vm7 = vcmp.eq.s32.totalorder %v5949_v12, 7  ;;  %vm7393_vm4 = vcmp.eq.s32.totalorder %v5957_v38, 7 }
 0x7b9   : > { %v5923_v57 = vadd.s32 %v2166_v32, %v2164_v50  ;;  %v5935_v24 = vadd.s32 %v2127_v58, %v2125_v46  ;;  %v2226_v9 = vsel %vm7394_vm7, %v5756_v35, %v2208_v3  ;;  %v2228_v44 = vsel %vm7393_vm4, %v5771_v22, %v2212_v49 }
 0x7bb   : > { %7528 = vst [vmem:[#allocation60_spill] sm:$0xff] %v5923_v57  ;;  %7529 = vst [vmem:[#allocation61_spill] sm:$0xff] %v5935_v24  ;;  %vm7388_vm8 = vcmp.eq.s32.totalorder %v5923_v57, 7  ;;  %vm7395_vm13 = vcmp.eq.s32.totalorder %v5935_v24, 7 }
 0x7bc   : > { %v2227_v18 = vsel %vm7388_vm8, %v5724_v63, %v2210_v0  ;;  %v2224_v60 = vsel %vm7395_vm13, %v5742_v14, %v2204_v61 }
 0x7c8   : > { %2704 = vperm.xlu1 %4068, %v5729_v7  }
 0x7cc   : > { %2712 = vperm.xlu1 %4068, %v5710_v16  }
 0x7cd   : > { %2708 = vperm.xlu0 %4069, %v5705_v37  }
 0x7d0   : > { %2716 = vperm.xlu1 %4068, %v5742_v14  }
 0x7d1   : > { %2720 = vperm.xlu0 %4069, %v5716_v39  }
 0x7d4   : > { %2724 = vperm.xlu1 %4068, %v5756_v35  }
 0x7d5   : > { %2728 = vperm.xlu0 %4069, %v5724_v63  }
 0x7d8   : > { %2732 = vperm.xlu1 %4068, %v5771_v22  }
 0x7d9   : > { %2432 = vrot.lane.b32.xlu0 %v2222_v17, %s4130_s16 }
 0x7da   : > { %4070 = vset.pattern.permute.xlu0 %v4139_v27 }
 0x7dc   : > { %2430 = vrot.lane.b32.xlu1 %v2221_v10, %s4130_s16 }
 0x7dd   : > { %2438 = vrot.lane.b32.xlu0 %v2225_v55, %s4130_s16  ;;  %4071 = vset.pattern.permute.xlu1 %v4139_v27 }
 0x7e0   : > { %2434 = vrot.lane.b32.xlu1 %v2223_v40, %s4130_s16 }
 0x7e1   : > { %2442 = vrot.lane.b32.xlu0 %v2227_v18, %s4130_s16 }
 0x7e4   : > { %2436 = vrot.lane.b32.xlu1 %v2224_v60, %s4130_s16 }
 0x7e8   : > { %2440 = vrot.lane.b32.xlu1 %v2226_v9, %s4130_s16 }
 0x7ec   : > { %2444 = vrot.lane.b32.xlu1 %v2228_v44, %s4130_s16 }
 0x824   : > { %v5969_v32 = vpop.xlane.xlu1 %2548  ;;  %v5971_v11 = vpop.xlane.xlu0 %2550 }
 0x828   : > { %v5973_v56 = vpop.xlane.xlu1 %2563  ;;  %v5975_v17 = vpop.xlane.xlu0 %2561 }
 0x82c   : > { %v5977_v50 = vpop.xlane.xlu1 %2576  ;;  %v5979_v58 = vpop.xlane.xlu0 %2574 }
 0x830   : > { %v5981_v4 = vpop.xlane.xlu1 %2589  ;;  %v5983_v10 = vpop.xlane.xlu0 %2587 }
 0x834   : > { %v5985_v46 = vpop.xlane.xlu1 %2602  ;;  %v5987_v55 = vpop.xlane.xlu0 %2600 }
 0x838   : > { %v5989_v61 = vpop.xlane.xlu1 %2615  ;;  %v5991_v0 = vpop.xlane.xlu0 %2613 }
 0x83c   : > { %v5993_v43 = vpop.xlane.xlu1 %2628  ;;  %v5995_v51 = vpop.xlane.xlu0 %2626 }
 0x840   : > { %v5997_v40 = vpop.xlane.xlu1 %2641  ;;  %v6000_v34 = vpop.xlane.xlu0 %2639 }
 0x844   : > { %v2705_v18 = vpop.permute.xlu1 %2704 }
 0x845   : > { %vm2735_vm15 = vcmp.lt.f32.partialorder %v5729_v7, %v2705_v18  ;;  %vm2743_vm9 = vcmp.eq.f32.partialorder %v5729_v7, %v2705_v18 }
 0x846   : > { %vm2752_vm2 = vmand %vm2743_vm9, %vm2751_vm12 }
 0x847   : > { %vm2760_vm8 = vmor %vm2735_vm15, %vm2752_vm2 }
 0x848   : > { %v2768_v62 = vsel %vm2760_vm8, 1, %v7466_v8  ;;  %v2713_v3 = vpop.permute.xlu1 %2712  ;;  %v2709_v60 = vpop.permute.xlu0 %2708 }
 0x849   : > { %vm2737_vm3 = vcmp.lt.f32.partialorder %v5710_v16, %v2713_v3  ;;  %vm2745_vm10 = vcmp.eq.f32.partialorder %v5710_v16, %v2713_v3  ;;  %vm2744_vm1 = vcmp.eq.f32.partialorder %v5705_v37, %v2709_v60  ;;  %vm2736_vm4 = vcmp.lt.f32.partialorder %v5705_v37, %v2709_v60 }
 0x84a   : > { %vm2754_vm14 = vmand %vm2745_vm10, %vm2751_vm12  ;;  %v2776_v15 = vsel %vm252_vm0, %v2768_v62, 0 }
 0x84b   : > { %vm2762_vm7 = vmor %vm2737_vm3, %vm2754_vm14  ;;  %v2777_v9 = vand.u32 65535, %v2776_v15  ;;  %v2778_v49 = vshrl.u32 %v2776_v15, 16 }
 0x84c   : > { %v2770_v44 = vsel %vm2762_vm7, 1, %v7466_v8  ;;  %vm2753_vm8 = vmand %vm2744_vm1, %vm2751_vm12  ;;  %v2717_v27 = vpop.permute.xlu1 %2716  ;;  %v2721_v18 = vpop.permute.xlu0 %2720 }
 0x84d   : > { %vm2761_vm15 = vmor %vm2736_vm4, %vm2753_vm8  ;;  %vm2738_vm9 = vcmp.lt.f32.partialorder %v5742_v14, %v2717_v27  ;;  %vm2746_vm2 = vcmp.eq.f32.partialorder %v5742_v14, %v2717_v27  ;;  %vm2739_vm10 = vcmp.lt.f32.partialorder %v5716_v39, %v2721_v18  ;;  %vm2747_vm13 = vcmp.eq.f32.partialorder %v5716_v39, %v2721_v18 }
 0x84e   : > { %v2769_v62 = vsel %vm2761_vm15, 1, %v7466_v8  ;;  %vm2755_vm14 = vmand %vm2746_vm2, %vm2751_vm12  ;;  %v2779_v3 = vcvt.s32.f32 %v2777_v9  ;;  %v2780_v60 = vcvt.s32.f32 %v2778_v49  ;;  %v2802_v15 = vsel %vm252_vm0, %v2770_v44, 0 }
 0x84f   : > { %vm2763_vm3 = vmor %vm2738_vm9, %vm2755_vm14  ;;  %v2803_v57 = vand.u32 65535, %v2802_v15  ;;  %v2789_v19 = vsel %vm252_vm0, %v2769_v62, 0 }
 0x850   : > { %v2771_v6 = vsel %vm2763_vm3, 1, %v7466_v8  ;;  %vm2756_vm1 = vmand %vm2747_vm13, %vm2751_vm12  ;;  %2781 = vadd.xlane.f32.xlu0 %v2779_v3  ;;  %2783 = vadd.xlane.f32.xlu1 %v2780_v60  ;;  %v2725_v27 = vpop.permute.xlu1 %2724  ;;  %v2729_v25 = vpop.permute.xlu0 %2728  ;;  %v2790_v26 = vand.u32 65535, %v2789_v19  ;;  %v2791_v38 = vshrl.u32 %v2789_v19, 16 }
 0x851   : > { %vm2764_vm7 = vmor %vm2739_vm10, %vm2756_vm1  ;;  %vm2740_vm4 = vcmp.lt.f32.partialorder %v5756_v35, %v2725_v27  ;;  %vm2748_vm8 = vcmp.eq.f32.partialorder %v5756_v35, %v2725_v27  ;;  %vm2741_vm15 = vcmp.lt.f32.partialorder %v5724_v63, %v2729_v25  ;;  %vm2749_vm9 = vcmp.eq.f32.partialorder %v5724_v63, %v2729_v25 }
 0x852   : > { %v2772_v9 = vsel %vm2764_vm7, 1, %v7466_v8  ;;  %vm2757_vm13 = vmand %vm2748_vm8, %vm2751_vm12  ;;  %v2805_v49 = vcvt.s32.f32 %v2803_v57  ;;  %v2792_v44 = vcvt.s32.f32 %v2790_v26  ;;  %v2815_v19 = vsel %vm252_vm0, %v2771_v6, 0 }
 0x853   : > { %vm2765_vm2 = vmor %vm2740_vm4, %vm2757_vm13  ;;  %v2816_v18 = vand.u32 65535, %v2815_v19  ;;  %v2828_v62 = vsel %vm252_vm0, %v2772_v9, 0  ;;  %v2793_v6 = vcvt.s32.f32 %v2791_v38  ;;  %v2804_v57 = vshrl.u32 %v2802_v15, 16 }
 0x854   : > { %v2773_v3 = vsel %vm2765_vm2, 1, %v7466_v8  ;;  %vm2758_vm10 = vmand %vm2749_vm9, %vm2751_vm12  ;;  %2807 = vadd.xlane.f32.xlu1 %v2805_v49  ;;  %2794 = vadd.xlane.f32.xlu0 %v2792_v44  ;;  %v2733_v60 = vpop.permute.xlu1 %2732  ;;  %v2829_v27 = vand.u32 65535, %v2828_v62  ;;  %v2817_v12 = vshrl.u32 %v2815_v19, 16  ;;  %v2830_v24 = vshrl.u32 %v2828_v62, 16 }
 0x855   : > { %vm2766_vm14 = vmor %vm2741_vm15, %vm2758_vm10  ;;  %vm2750_vm3 = vcmp.eq.f32.partialorder %v5771_v22, %v2733_v60  ;;  %v2818_v26 = vcvt.s32.f32 %v2816_v18  ;;  %vm2742_vm1 = vcmp.lt.f32.partialorder %v5771_v22, %v2733_v60  ;;  %v2841_v9 = vsel %vm252_vm0, %v2773_v3, 0 }
 0x856   : > { %vm2759_vm7 = vmand %vm2750_vm3, %vm2751_vm12  ;;  %v2774_v49 = vsel %vm2766_vm14, 1, %v7466_v8  ;;  %v2806_v25 = vcvt.s32.f32 %v2804_v57  ;;  %v2831_v44 = vcvt.s32.f32 %v2829_v27  ;;  %v2842_v29 = vand.u32 65535, %v2841_v9 }
 0x857   : > { %vm2767_vm4 = vmor %vm2742_vm1, %vm2759_vm7  ;;  %v2854_v18 = vsel %vm252_vm0, %v2774_v49, 0  ;;  %v2819_v38 = vcvt.s32.f32 %v2817_v12  ;;  %v2843_v57 = vshrl.u32 %v2841_v9, 16  ;;  %v2333_v62 = vcvt.f32.s32 %v5818_v30 }
 0x858   : > { %2820 = vadd.xlane.f32.xlu1 %v2818_v26  ;;  %2796 = vadd.xlane.f32.xlu0 %v2793_v6  ;;  %v2775_v60 = vsel %vm2767_vm4, 1, %v7466_v8  ;;  %v2844_v15 = vcvt.s32.f32 %v2842_v29  ;;  %v2855_v41 = vand.u32 65535, %v2854_v18  ;;  %v2832_v26 = vcvt.s32.f32 %v2830_v24 }
 0x859   : > { %v2867_v3 = vsel %vm252_vm0, %v2775_v60, 0  ;;  %v2845_v19 = vcvt.s32.f32 %v2843_v57  ;;  %v2856_v5 = vshrl.u32 %v2854_v18, 16  ;;  %v2346_v24 = vcvt.f32.s32 %v5822_v48  ;;  %v2431_v60 = vpop.permute.xlu1 %2430 }
 0x85a   : > { %v2857_v6 = vcvt.s32.f32 %v2855_v41  ;;  %v2868_v27 = vand.u32 65535, %v2867_v3  ;;  %v2869_v12 = vshrl.u32 %v2867_v3, 16  ;;  %v2334_v41 = vshll.u32 %v2333_v62, 16 }
 0x85b   : > { %v2332_v9 = vcvt.f32.s32 %v5814_v23  ;;  %v2372_v18 = vcvt.f32.s32 %v5830_v21  ;;  %v2320_v30 = vcvt.f32.s32 %v5808_v54  ;;  %v2398_v3 = vcvt.f32.s32 %v5836_v1 }
 0x85c   : > { %2809 = vadd.xlane.f32.xlu0 %v2806_v25  ;;  %2833 = vadd.xlane.f32.xlu1 %v2831_v44  ;;  %v2870_v49 = vcvt.s32.f32 %v2868_v27  ;;  %v2858_v25 = vcvt.s32.f32 %v2856_v5  ;;  %v2871_v29 = vcvt.s32.f32 %v2869_v12  ;;  %v2347_v5 = vshll.u32 %v2346_v24, 16 }
 0x85d   : > { %v6060_v44 = vadd.s32 %v2334_v41, %v2332_v9  ;;  %v2373_v23 = vshll.u32 %v2372_v18, 16  ;;  %v2321_v54 = vshll.u32 %v2320_v30, 16  ;;  %v2399_v57 = vshll.u32 %v2398_v3, 16 }
 0x85e   : > { %v2359_v1 = vcvt.f32.s32 %v5826_v53  ;;  %v2385_v53 = vcvt.f32.s32 %v5834_v45  ;;  %v2411_v45 = vcvt.f32.s32 %v5843_v52  ;;  %v2384_v18 = vcvt.f32.s32 %v5824_v20 }
 0x85f   : > { %7532 = vst [vmem:[#allocation64_spill] sm:$0xff] %v6060_v44  ;;  %vm7410_vm12 = vcmp.eq.s32.totalorder %v6060_v44, 7  ;;  %v2410_v30 = vcvt.f32.s32 %v5832_v31  ;;  %v4140_v31 = vmov 13   ;;  %vm2984_vm1 = vcmp.lt.s32.totalorder %v4234_v42, 12 }
 0x860   : > { %2822 = vadd.xlane.f32.xlu0 %v2819_v38  ;;  %2846 = vadd.xlane.f32.xlu1 %v2844_v15  ;;  %v2345_v38 = vcvt.f32.s32 %v5812_v2  ;;  %v2433_v15 = vpop.permute.xlu0 %2432  ;;  %v2371_v2 = vcvt.f32.s32 %v5820_v13  ;;  %v2319_v13 = vcvt.f32.s32 %v5810_v47  ;;  %v2386_v9 = vshll.u32 %v2385_v53, 16 }
 0x861   : > { %v2455_v21 = vsel %vm7410_vm12, %v5705_v37, %v2433_v15  ;;  %v2412_v15 = vshll.u32 %v2411_v45, 16 }
 0x862   : > { %v6067_v48 = vadd.s32 %v2347_v5, %v2345_v38  ;;  %v6114_v38 = vadd.s32 %v2386_v9, %v2384_v18 }
 0x864   : > { %2835 = vadd.xlane.f32.xlu0 %v2832_v26  ;;  %2859 = vadd.xlane.f32.xlu1 %v2857_v6  ;;  %7533 = vst [vmem:[#allocation65_spill] sm:$0xff] %v6067_v48  ;;  %v2435_v26 = vpop.permute.xlu1 %2434  ;;  %v6077_v6 = vadd.s32 %v2373_v23, %v2371_v2  ;;  %v2439_v27 = vpop.permute.xlu0 %2438  ;;  %vm7408_vm8 = vcmp.eq.s32.totalorder %v6067_v48, 7  ;;  %7537 = vst [vmem:[#allocation69_spill] sm:$0xff] %v6114_v38  ;;  %vm7413_vm10 = vcmp.eq.s32.totalorder %v6114_v38, 7 }
 0x866   : > { %7534 = vst [vmem:[#allocation66_spill] sm:$0xff] %v6077_v6  ;;  %vm7409_vm15 = vcmp.eq.s32.totalorder %v6077_v6, 7 }
 0x867   : > { %v2458_v62 = vsel %vm7409_vm15, %v5716_v39, %v2439_v27 }
 0x868   : > { %2848 = vadd.xlane.f32.xlu0 %v2845_v19  ;;  %2872 = vadd.xlane.f32.xlu1 %v2870_v49  ;;  %v2456_v19 = vsel %vm7408_vm8, %v5710_v16, %v2435_v26  ;;  %v2397_v49 = vcvt.f32.s32 %v5828_v59  ;;  %v2443_v47 = vpop.permute.xlu0 %2442  ;;  %v2358_v59 = vcvt.f32.s32 %v5816_v36  ;;  %v2437_v41 = vpop.permute.xlu1 %2436 }
 0x86a   : > { %v6090_v12 = vadd.s32 %v2399_v57, %v2397_v49 }
 0x86c   : > { %2861 = vadd.xlane.f32.xlu0 %v2858_v25  ;;  %v6088_v25 = vadd.s32 %v2321_v54, %v2319_v13  ;;  %7536 = vst [vmem:[#allocation68_spill] sm:$0xff] %v6090_v12  ;;  %vm7407_vm13 = vcmp.eq.s32.totalorder %v6090_v12, 7  ;;  %v2441_v52 = vpop.permute.xlu1 %2440 }
 0x86d   : > { %v2460_v5 = vsel %vm7407_vm13, %v5724_v63, %v2443_v47  ;;  %v2459_v20 = vsel %vm7413_vm10, %v5756_v35, %v2441_v52 }
 0x86e   : > { %7535 = vst [vmem:[#allocation67_spill] sm:$0xff] %v6088_v25  ;;  %vm7411_vm9 = vcmp.eq.s32.totalorder %v6088_v25, 7 }
 0x86f   : > { %v2454_v36 = vsel %vm7411_vm9, %v5729_v7, %v2431_v60  ;;  %v6122_v60 = vadd.s32 %v2412_v15, %v2410_v30 }
 0x870   : > { %2874 = vadd.xlane.f32.xlu0 %v2871_v29  ;;  %v2360_v29 = vshll.u32 %v2359_v1, 16  ;;  %v2445_v23 = vpop.permute.xlu1 %2444 }
 0x871   : > { %7538 = vst [vmem:[#allocation70_spill] sm:$0xff] %v6122_v60  ;;  %vm7412_vm14 = vcmp.eq.s32.totalorder %v6122_v60, 7 }
 0x872   : > { %v6102_v24 = vadd.s32 %v2360_v29, %v2358_v59  ;;  %v2461_v3 = vsel %vm7412_vm14, %v5771_v22, %v2445_v23 }
 0x874   : > { %vm7414_vm2 = vcmp.eq.s32.totalorder %v6102_v24, 7 }
 0x879   : > { %2941 = vperm.xlu1 %4071, %v5705_v37  }
 0x87d   : > { %2945 = vperm.xlu1 %4071, %v5710_v16  }
 0x881   : > { %2953 = vperm.xlu1 %4071, %v5716_v39  }
 0x885   : > { %2961 = vperm.xlu1 %4071, %v5724_v63   ;;  %v2457_v63 = vsel %vm7414_vm2, %v5742_v14, %v2437_v41 }
 0x886   : > { %2937 = vperm.xlu0 %4070, %v5729_v7  }
 0x889   : > { %2665 = vrot.lane.b32.xlu1 %v2455_v21, %s4130_s16 }
 0x88a   : > { %2949 = vperm.xlu0 %4070, %v5742_v14   ;;  %4072 = vset.pattern.permute.xlu1 %v4140_v31 }
 0x88d   : > { %2667 = vrot.lane.b32.xlu1 %v2456_v19, %s4130_s16 }
 0x88e   : > { %2957 = vperm.xlu0 %4070, %v5756_v35  }
 0x891   : > { %2671 = vrot.lane.b32.xlu1 %v2458_v62, %s4130_s16 }
 0x892   : > { %2965 = vperm.xlu0 %4070, %v5771_v22  }
 0x895   : > { %2675 = vrot.lane.b32.xlu1 %v2460_v5, %s4130_s16 }
 0x896   : > { %2663 = vrot.lane.b32.xlu0 %v2454_v36, %s4130_s16 }
 0x897   : > { %4073 = vset.pattern.permute.xlu0 %v4140_v31 }
 0x89a   : > { %2669 = vrot.lane.b32.xlu0 %v2457_v63, %s4130_s16 }
 0x89e   : > { %2673 = vrot.lane.b32.xlu0 %v2459_v20, %s4130_s16 }
 0x8a2   : > { %2677 = vrot.lane.b32.xlu0 %v2461_v3, %s4130_s16 }
 0x8d9   : > { %v6134_v21 = vpop.xlane.xlu1 %2783  ;;  %v6136_v2 = vpop.xlane.xlu0 %2781 }
 0x8dd   : > { %v6138_v26 = vpop.xlane.xlu1 %2807  ;;  %v6140_v54 = vpop.xlane.xlu0 %2794 }
 0x8e1   : > { %v6142_v57 = vpop.xlane.xlu1 %2820  ;;  %v6144_v27 = vpop.xlane.xlu0 %2796 }
 0x8e5   : > { %v6146_v1 = vpop.xlane.xlu1 %2833  ;;  %v6148_v19 = vpop.xlane.xlu0 %2809 }
 0x8e9   : > { %v6150_v13 = vpop.xlane.xlu1 %2846  ;;  %v6152_v49 = vpop.xlane.xlu0 %2822 }
 0x8ed   : > { %v6154_v29 = vpop.xlane.xlu1 %2859  ;;  %v6156_v53 = vpop.xlane.xlu0 %2835 }
 0x8f1   : > { %v6158_v62 = vpop.xlane.xlu1 %2872  ;;  %v6160_v47 = vpop.xlane.xlu0 %2848 }
 0x8f5   : > { %v2942_v59 = vpop.permute.xlu1 %2941  ;;  %v6162_v41 = vpop.xlane.xlu0 %2861 }
 0x8f6   : > { %vm2977_vm3 = vcmp.eq.f32.partialorder %v5705_v37, %v2942_v59  ;;  %vm2969_vm7 = vcmp.lt.f32.partialorder %v5705_v37, %v2942_v59 }
 0x8f7   : > { %vm2986_vm4 = vmand %vm2977_vm3, %vm2984_vm1 }
 0x8f8   : > { %vm2994_vm8 = vmor %vm2969_vm7, %vm2986_vm4 }
 0x8f9   : > { %v2946_v9 = vpop.permute.xlu1 %2945  ;;  %v6169_v45 = vpop.xlane.xlu0 %2874  ;;  %v3002_v36 = vsel %vm2994_vm8, 1, %v7466_v8 }
 0x8fa   : > { %vm2978_vm13 = vcmp.eq.f32.partialorder %v5710_v16, %v2946_v9  ;;  %vm2970_vm15 = vcmp.lt.f32.partialorder %v5710_v16, %v2946_v9  ;;  %v3022_v16 = vsel %vm252_vm0, %v3002_v36, 0 }
 0x8fb   : > { %vm2987_vm12 = vmand %vm2978_vm13, %vm2984_vm1  ;;  %v3023_v23 = vand.u32 65535, %v3022_v16  ;;  %v3024_v3 = vshrl.u32 %v3022_v16, 16  ;;  %v6200_v16 = vld [vmem:[%s4175_s15 + $0x30] sm:$0xff] }
 0x8fc   : > { %vm2995_vm10 = vmor %vm2970_vm15, %vm2987_vm12 }
 0x8fd   : > { %v2954_v37 = vpop.permute.xlu1 %2953  ;;  %v3026_v36 = vcvt.s32.f32 %v3024_v3 }
 0x8fe   : > { %vm2980_vm7 = vcmp.eq.f32.partialorder %v5716_v39, %v2954_v37  ;;  %vm2972_vm15 = vcmp.lt.f32.partialorder %v5716_v39, %v2954_v37 }
 0x8ff   : > { %vm2989_vm12 = vmand %vm2980_vm7, %vm2984_vm1 }
 0x901   : > { %v2938_v5 = vpop.permute.xlu0 %2937 }
 0x902   : > { %vm2976_vm9 = vcmp.eq.f32.partialorder %v5729_v7, %v2938_v5  ;;  %vm2968_vm14 = vcmp.lt.f32.partialorder %v5729_v7, %v2938_v5  ;;  %v3003_v7 = vsel %vm2995_vm10, 1, %v7466_v8  ;;  %vm2997_vm10 = vmor %vm2972_vm15, %vm2989_vm12  ;;  %v3025_v5 = vcvt.s32.f32 %v3023_v23 }
 0x903   : > { %vm2985_vm3 = vmand %vm2976_vm9, %vm2984_vm1  ;;  %v3035_v59 = vsel %vm252_vm0, %v3003_v7, 0  ;;  %v3005_v37 = vsel %vm2997_vm10, 1, %v7466_v8 }
 0x904   : > { %vm2993_vm4 = vmor %vm2968_vm14, %vm2985_vm3  ;;  %v3037_v39 = vshrl.u32 %v3035_v59, 16  ;;  %v3061_v23 = vsel %vm252_vm0, %v3005_v37, 0 }
 0x905   : > { %v2950_v18 = vpop.permute.xlu0 %2949  ;;  %v3001_v15 = vsel %vm2993_vm4, 1, %v7466_v8 }
 0x906   : > { %vm2979_vm2 = vcmp.eq.f32.partialorder %v5742_v14, %v2950_v18  ;;  %vm2971_vm13 = vcmp.lt.f32.partialorder %v5742_v14, %v2950_v18  ;;  %v3009_v52 = vsel %vm252_vm0, %v3001_v15, 0  ;;  %v3036_v18 = vand.u32 65535, %v3035_v59  ;;  %v2962_v15 = vpop.permute.xlu1 %2961 }
 0x907   : > { %vm2988_vm8 = vmand %vm2979_vm2, %vm2984_vm1  ;;  %v3011_v30 = vshrl.u32 %v3009_v52, 16  ;;  %v3010_v20 = vand.u32 65535, %v3009_v52  ;;  %vm2982_vm7 = vcmp.eq.f32.partialorder %v6200_v16, %v2962_v15  ;;  %vm2974_vm4 = vcmp.lt.f32.partialorder %v6200_v16, %v2962_v15 }
 0x908   : > { %vm2996_vm9 = vmor %vm2971_vm13, %vm2988_vm8 }
 0x909   : > { %v2958_v63 = vpop.permute.xlu0 %2957  ;;  %v3013_v31 = vcvt.s32.f32 %v3011_v30  ;;  %v3012_v14 = vcvt.s32.f32 %v3010_v20  ;;  %v3004_v9 = vsel %vm2996_vm9, 1, %v7466_v8  ;;  %v3038_v30 = vcvt.s32.f32 %v3036_v18  ;;  %vm2991_vm8 = vmand %vm2982_vm7, %vm2984_vm1 }
 0x90a   : > { %vm2981_vm2 = vcmp.eq.f32.partialorder %v5756_v35, %v2958_v63  ;;  %vm2973_vm14 = vcmp.lt.f32.partialorder %v5756_v35, %v2958_v63  ;;  %v3048_v7 = vsel %vm252_vm0, %v3004_v9, 0  ;;  %v3039_v35 = vcvt.s32.f32 %v3037_v39  ;;  %vm2999_vm15 = vmor %vm2974_vm4, %vm2991_vm8 }
 0x90b   : > { %3016 = vadd.xlane.f32.xlu0 %v3013_v31  ;;  %3014 = vadd.xlane.f32.xlu1 %v3012_v14  ;;  %vm2990_vm3 = vmand %vm2981_vm2, %vm2984_vm1  ;;  %v3050_v63 = vshrl.u32 %v3048_v7, 16  ;;  %v3049_v20 = vand.u32 65535, %v3048_v7  ;;  %v3063_v31 = vshrl.u32 %v3061_v23, 16  ;;  %v3062_v9 = vand.u32 65535, %v3061_v23 }
 0x90c   : > { %vm2998_vm13 = vmor %vm2973_vm14, %vm2990_vm3 }
 0x90d   : > { %v2966_v52 = vpop.permute.xlu0 %2965  ;;  %v3006_v3 = vsel %vm2998_vm13, 1, %v7466_v8  ;;  %v3052_v14 = vcvt.s32.f32 %v3050_v63  ;;  %v3051_v59 = vcvt.s32.f32 %v3049_v20  ;;  %v3065_v18 = vcvt.s32.f32 %v3063_v31 }
 0x90e   : > { %vm2983_vm12 = vcmp.eq.f32.partialorder %v5771_v22, %v2966_v52  ;;  %vm2975_vm9 = vcmp.lt.f32.partialorder %v5771_v22, %v2966_v52  ;;  %v3064_v15 = vcvt.s32.f32 %v3062_v9  ;;  %vm3217_vm13 = vcmp.lt.s32.totalorder %v4234_v42, 13 }
 0x90f   : > { %3027 = vadd.xlane.f32.xlu0 %v3025_v5  ;;  %3029 = vadd.xlane.f32.xlu1 %v3026_v36  ;;  %vm2992_vm2 = vmand %vm2983_vm12, %vm2984_vm1  ;;  %v3074_v5 = vsel %vm252_vm0, %v3006_v3, 0  ;;  %v3007_v36 = vsel %vm2999_vm15, 1, %v7466_v8 }
 0x910   : > { %vm3000_vm10 = vmor %vm2975_vm9, %vm2992_vm2  ;;  %v3076_v39 = vshrl.u32 %v3074_v5, 16  ;;  %v3075_v37 = vand.u32 65535, %v3074_v5  ;;  %v3087_v7 = vsel %vm252_vm0, %v3007_v36, 0  ;;  %v6219_v5 = vld [vmem:[%s4175_s15] sm:$0xff]  ;;  %v6223_v36 = vld [vmem:[%s4175_s15 + $0x10] sm:$0xff] }
 0x911   : > { %v3008_v22 = vsel %vm3000_vm10, 1, %v7466_v8  ;;  %v3088_v63 = vand.u32 65535, %v3087_v7 }
 0x912   : > { %v3078_v52 = vcvt.s32.f32 %v3076_v39  ;;  %v3100_v20 = vsel %vm252_vm0, %v3008_v22, 0  ;;  %v6232_v39 = vld [vmem:[%s4175_s15 + $0x18] sm:$0xff]  ;;  %v2579_v22 = vcvt.f32.s32 %v5977_v50 }
 0x913   : > { %3040 = vadd.xlane.f32.xlu0 %v3038_v30  ;;  %3042 = vadd.xlane.f32.xlu1 %v3039_v35  ;;  %v3077_v30 = vcvt.s32.f32 %v3075_v37  ;;  %v3089_v35 = vshrl.u32 %v3087_v7, 16  ;;  %v3090_v3 = vcvt.s32.f32 %v3088_v63  ;;  %v3102_v31 = vshrl.u32 %v3100_v20, 16  ;;  %v6236_v37 = vld [vmem:[%s4175_s15 + $0x20] sm:$0xff] }
 0x914   : > { %v2592_v63 = vcvt.f32.s32 %v5981_v4 }
 0x915   : > { %v3091_v23 = vcvt.s32.f32 %v3089_v35  ;;  %v2580_v35 = vshll.u32 %v2579_v22, 16  ;;  %v2644_v22 = vcvt.f32.s32 %v5997_v40 }
 0x916   : > { %v2593_v50 = vshll.u32 %v2592_v63, 16 }
 0x917   : > { %3055 = vadd.xlane.f32.xlu1 %v3052_v14  ;;  %3053 = vadd.xlane.f32.xlu0 %v3051_v59  ;;  %v3101_v14 = vand.u32 65535, %v3100_v20  ;;  %v3104_v59 = vcvt.s32.f32 %v3102_v31  ;;  %v6249_v20 = vpop.permute.xlu1 %2665  ;;  %v6253_v31 = vld [vmem:[%s4175_s15 + $0x38] sm:$0xff] }
 0x919   : > { %v3103_v9 = vcvt.s32.f32 %v3101_v14  ;;  %v2618_v14 = vcvt.f32.s32 %v5989_v61 }
 0x91b   : > { %3068 = vadd.xlane.f32.xlu1 %v3065_v18  ;;  %3066 = vadd.xlane.f32.xlu0 %v3064_v15  ;;  %v6227_v18 = vld [vmem:[%s4175_s15 + $0x8] sm:$0xff]  ;;  %v2553_v15 = vcvt.f32.s32 %v5971_v11 }
 0x91d   : > { %v2554_v7 = vshll.u32 %v2553_v15, 16 }
 0x91f   : > { %3081 = vadd.xlane.f32.xlu1 %v3078_v52  ;;  %3079 = vadd.xlane.f32.xlu0 %v3077_v30  ;;  %v2552_v52 = vcvt.f32.s32 %v5969_v32  ;;  %v6242_v30 = vld [vmem:[%s4175_s15 + $0x28] sm:$0xff] }
 0x921   : > { %v6246_v11 = vadd.s32 %v2554_v7, %v2552_v52  ;;  %v2619_v7 = vshll.u32 %v2618_v14, 16  ;;  %v2617_v52 = vcvt.f32.s32 %v5991_v0 }
 0x923   : > { %3094 = vadd.xlane.f32.xlu1 %v3091_v23  ;;  %3092 = vadd.xlane.f32.xlu0 %v3090_v3  ;;  %7539 = vst [vmem:[#allocation71_spill] sm:$0xff] %v6246_v11  ;;  %v2664_v23 = vpop.permute.xlu0 %2663  ;;  %v2578_v3 = vcvt.f32.s32 %v5979_v58  ;;  %vm7417_vm1 = vcmp.eq.s32.totalorder %v6246_v11, 7 }
 0x924   : > { %v2687_v4 = vsel %vm7417_vm1, %v6219_v5, %v2664_v23  ;;  %v2643_v23 = vcvt.f32.s32 %v6000_v34  ;;  %v4141_v34 = vmov 14  }
 0x925   : > { %v6256_v32 = vadd.s32 %v2580_v35, %v2578_v3  ;;  %v2645_v35 = vshll.u32 %v2644_v22, 16 }
 0x927   : > { %3107 = vadd.xlane.f32.xlu1 %v3104_v59  ;;  %3105 = vadd.xlane.f32.xlu0 %v3103_v9  ;;  %7540 = vst [vmem:[#allocation72_spill] sm:$0xff] %v6256_v32  ;;  %v2591_v59 = vcvt.f32.s32 %v5983_v10  ;;  %v2668_v9 = vpop.permute.xlu1 %2667  ;;  %v2670_v15 = vpop.permute.xlu0 %2669  ;;  %vm7415_vm14 = vcmp.eq.s32.totalorder %v6256_v32, 7  ;;  %v6274_v10 = vadd.s32 %v2619_v7, %v2617_v52  ;;  %v6282_v3 = vadd.s32 %v2645_v35, %v2643_v23 }
 0x928   : > { %v2689_v61 = vsel %vm7415_vm14, %v6223_v36, %v2668_v9 }
 0x929   : > { %v6265_v58 = vadd.s32 %v2593_v50, %v2591_v59  ;;  %7541 = vst [vmem:[#allocation73_spill] sm:$0xff] %v6274_v10  ;;  %7542 = vst [vmem:[#allocation74_spill] sm:$0xff] %v6282_v3  ;;  %vm7437_vm7 = vcmp.eq.s32.totalorder %v6274_v10, 7  ;;  %vm7434_vm4 = vcmp.eq.s32.totalorder %v6282_v3, 7  ;;  %v2566_v3 = vcvt.f32.s32 %v5973_v56 }
 0x92b   : > { %vm7439_vm3 = vcmp.eq.s32.totalorder %v6265_v58, 7  ;;  %v2674_v63 = vpop.permute.xlu0 %2673  ;;  %v2567_v60 = vshll.u32 %v2566_v3, 16  ;;  %v4142_v3 = vmov 15  }
 0x92c   : > { %v2690_v40 = vsel %vm7439_vm3, %v6232_v39, %v2670_v15  ;;  %v2692_v0 = vsel %vm7437_vm7, %v6242_v30, %v2674_v63 }
 0x92f   : > { %v2678_v50 = vpop.permute.xlu0 %2677 }
 0x930   : > { %v2694_v14 = vsel %vm7434_vm4, %v6253_v31, %v2678_v50 }
 0x938   : > { %3170 = vperm.xlu1 %4072, %v6219_v5  }
 0x93c   : > { %3178 = vperm.xlu1 %4072, %v6223_v36  }
 0x93d   : > { %3174 = vperm.xlu0 %4073, %v6227_v18  }
 0x940   : > { %3182 = vperm.xlu1 %4072, %v6232_v39  }
 0x941   : > { %3186 = vperm.xlu0 %4073, %v6236_v37  }
 0x944   : > { %3190 = vperm.xlu1 %4072, %v6242_v30  }
 0x945   : > { %3194 = vperm.xlu0 %4073, %v6200_v16  }
 0x948   : > { %3198 = vperm.xlu1 %4072, %v6253_v31  }
 0x949   : > { %4075 = vset.pattern.permute.xlu0 %v4141_v34 }
 0x94c   : > { %2896 = vrot.lane.b32.xlu1 %v2687_v4, %s4130_s16  ;;  %v2672_v4 = vpop.permute.xlu1 %2671 }
 0x94d   : > { %4074 = vset.pattern.permute.xlu1 %v4141_v34 }
 0x950   : > { %2900 = vrot.lane.b32.xlu1 %v2689_v61, %s4130_s16  ;;  %v2676_v59 = vpop.permute.xlu1 %2675 }
 0x954   : > { %2902 = vrot.lane.b32.xlu1 %v2690_v40, %s4130_s16 }
 0x958   : > { %2906 = vrot.lane.b32.xlu1 %v2692_v0, %s4130_s16 }
 0x95c   : > { %2910 = vrot.lane.b32.xlu1 %v2694_v14, %s4130_s16 }
 0x994   : > { %v6294_v9 = vpop.xlane.xlu1 %3014  ;;  %v6310_v40 = vpop.xlane.xlu0 %3016 }
 0x998   : > { %v6296_v15 = vpop.xlane.xlu1 %3029  ;;  %v6318_v14 = vpop.xlane.xlu0 %3027 }
 0x99c   : > { %v6298_v7 = vpop.xlane.xlu1 %3042  ;;  %v6327_v25 = vpop.xlane.xlu0 %3040 }
 0x9a0   : > { %v6300_v22 = vpop.xlane.xlu1 %3055 }
 0x9a4   : > { %v6302_v61 = vpop.xlane.xlu1 %3068 }
 0x9a8   : > { %v6304_v52 = vpop.xlane.xlu1 %3081 }
 0x9ac   : > { %v6306_v35 = vpop.xlane.xlu1 %3094 }
 0x9b0   : > { %v6308_v63 = vpop.xlane.xlu1 %3107 }
 0x9b4   : > { %v3171_v23 = vpop.permute.xlu1 %3170 }
 0x9b5   : > { %vm3201_vm8 = vcmp.lt.f32.partialorder %v6219_v5, %v3171_v23  ;;  %vm3209_vm12 = vcmp.eq.f32.partialorder %v6219_v5, %v3171_v23 }
 0x9b6   : > { %vm3218_vm15 = vmand %vm3209_vm12, %vm3217_vm13 }
 0x9b7   : > { %vm3226_vm9 = vmor %vm3201_vm8, %vm3218_vm15 }
 0x9b8   : > { %v3234_v0 = vsel %vm3226_vm9, 1, %v7466_v8  ;;  %v3179_v50 = vpop.permute.xlu1 %3178 }
 0x9b9   : > { %vm3203_vm2 = vcmp.lt.f32.partialorder %v6223_v36, %v3179_v50  ;;  %vm3211_vm10 = vcmp.eq.f32.partialorder %v6223_v36, %v3179_v50  ;;  %v3242_v34 = vsel %vm252_vm0, %v3234_v0, 0  ;;  %v6329_v0 = vpop.xlane.xlu0 %3053 }
 0x9ba   : > { %vm3220_vm14 = vmand %vm3211_vm10, %vm3217_vm13  ;;  %v3243_v12 = vand.u32 65535, %v3242_v34  ;;  %v3244_v23 = vshrl.u32 %v3242_v34, 16  ;;  %v2605_v34 = vcvt.f32.s32 %v5985_v46 }
 0x9bb   : > { %vm3228_vm1 = vmor %vm3203_vm2, %vm3220_vm14 }
 0x9bc   : > { %v3236_v32 = vsel %vm3228_vm1, 1, %v7466_v8  ;;  %v3245_v11 = vcvt.s32.f32 %v3243_v12  ;;  %v3246_v48 = vcvt.s32.f32 %v3244_v23  ;;  %v2565_v12 = vcvt.f32.s32 %v5975_v17 }
 0x9bd   : > { %v3268_v6 = vsel %vm252_vm0, %v3236_v32, 0  ;;  %v6333_v10 = vpop.xlane.xlu0 %3066  ;;  %v2604_v32 = vcvt.f32.s32 %v5987_v55  ;;  %v2630_v17 = vcvt.f32.s32 %v5995_v51 }
 0x9be   : > { %3247 = vadd.xlane.f32.xlu0 %v3245_v11  ;;  %3249 = vadd.xlane.f32.xlu1 %v3246_v48  ;;  %v3269_v44 = vand.u32 65535, %v3268_v6  ;;  %v6336_v23 = vadd.s32 %v2567_v60, %v2565_v12  ;;  %v2606_v11 = vshll.u32 %v2605_v34, 16  ;;  %v2631_v48 = vcvt.f32.s32 %v5993_v43 }
 0x9c0   : > { %v3271_v50 = vcvt.s32.f32 %v3269_v44  ;;  %v2632_v38 = vshll.u32 %v2631_v48, 16  ;;  %vm7433_vm1 = vcmp.eq.s32.totalorder %v6336_v23, 7 }
 0x9c1   : > { %v6340_v44 = vpop.xlane.xlu0 %3079  ;;  %v2688_v56 = vsel %vm7433_vm1, %v6227_v18, %v6249_v20 }
 0x9c2   : > { %3273 = vadd.xlane.f32.xlu1 %v3271_v50  ;;  %v6342_v50 = vadd.s32 %v2606_v11, %v2604_v32  ;;  %v6352_v46 = vadd.s32 %v2632_v38, %v2630_v17  ;;  %v6380_v11 = vpop.permute.xlu1 %3182  ;;  %v3270_v32 = vshrl.u32 %v3268_v6, 16  ;;  %v2851_v6 = vcvt.f32.s32 %v6160_v47 }
 0x9c4   : > { %7543 = vst [vmem:[#allocation75_spill] sm:$0xff] %v6342_v50  ;;  %7544 = vst [vmem:[#allocation76_spill] sm:$0xff] %v6352_v46  ;;  %vm7431_vm14 = vcmp.eq.s32.totalorder %v6342_v50, 7  ;;  %vm7430_vm8 = vcmp.eq.s32.totalorder %v6352_v46, 7  ;;  %v3272_v17 = vcvt.s32.f32 %v3270_v32  ;;  %v2825_v50 = vcvt.f32.s32 %v6152_v49 }
 0x9c5   : > { %v2691_v55 = vsel %vm7431_vm14, %v6236_v37, %v2672_v4  ;;  %v6358_v43 = vpop.xlane.xlu0 %3092  ;;  %v2693_v51 = vsel %vm7430_vm8, %v6200_v16, %v2676_v59  ;;  %v2850_v49 = vcvt.f32.s32 %v6150_v13 }
 0x9c9   : > { %v6368_v38 = vpop.xlane.xlu0 %3105 }
 0x9cd   : > { %v3175_v60 = vpop.permute.xlu0 %3174 }
 0x9ce   : > { %vm3210_vm12 = vcmp.eq.f32.partialorder %v6227_v18, %v3175_v60  ;;  %vm3202_vm15 = vcmp.lt.f32.partialorder %v6227_v18, %v3175_v60  ;;  %v2786_v60 = vcvt.f32.s32 %v6134_v21  ;;  %v2852_v21 = vshll.u32 %v2851_v6, 16 }
 0x9cf   : > { %vm3219_vm9 = vmand %vm3210_vm12, %vm3217_vm13 }
 0x9d0   : > { %vm3227_vm2 = vmor %vm3202_vm15, %vm3219_vm9  ;;  %v2787_v46 = vshll.u32 %v2786_v60, 16 }
 0x9d1   : > { %v3235_v20 = vsel %vm3227_vm2, 1, %v7466_v8 }
 0x9d2   : > { %v3255_v4 = vsel %vm252_vm0, %v3235_v20, 0 }
 0x9d3   : > { %3403 = vperm.xlu1 %4074, %v6219_v5   ;;  %v3256_v59 = vand.u32 65535, %v3255_v4  ;;  %v3257_v12 = vshrl.u32 %v3255_v4, 16  ;;  %v2785_v4 = vcvt.f32.s32 %v6136_v2 }
 0x9d4   : > { %2898 = vrot.lane.b32.xlu0 %v2688_v56, %s4130_s16  ;;  %v3191_v56 = vpop.permute.xlu1 %3190 }
 0x9d5   : > { %v3258_v34 = vcvt.s32.f32 %v3256_v59  ;;  %v3259_v48 = vcvt.s32.f32 %v3257_v12  ;;  %v6387_v59 = vadd.s32 %v2787_v46, %v2785_v4  ;;  %v2824_v12 = vcvt.f32.s32 %v6142_v57 }
 0x9d6   : > { %v6401_v57 = vadd.s32 %v2852_v21, %v2850_v49  ;;  %v2876_v46 = vcvt.f32.s32 %v6158_v62  ;;  %v3187_v62 = vpop.permute.xlu0 %3186  ;;  %vm3206_vm4 = vcmp.lt.f32.partialorder %v6242_v30, %v3191_v56  ;;  %v2798_v49 = vcvt.f32.s32 %v6140_v54 }
 0x9d7   : > { %3411 = vperm.xlu1 %4074, %v6223_v36   ;;  %vm7432_vm10 = vcmp.eq.s32.totalorder %v6387_v59, 7  ;;  %vm3213_vm2 = vcmp.eq.f32.partialorder %v6236_v37, %v3187_v62  ;;  %vm3205_vm8 = vcmp.lt.f32.partialorder %v6236_v37, %v3187_v62  ;;  %v2811_v54 = vcvt.f32.s32 %v6138_v26 }
 0x9d8   : > { %2904 = vrot.lane.b32.xlu0 %v2691_v55, %s4130_s16  ;;  %v3199_v55 = vpop.permute.xlu1 %3198  ;;  %vm7435_vm15 = vcmp.eq.s32.totalorder %v6401_v57, 7  ;;  %vm3222_vm14 = vmand %vm3213_vm2, %vm3217_vm13  ;;  %v2837_v26 = vcvt.f32.s32 %v6146_v1  ;;  %v2863_v1 = vcvt.f32.s32 %v6154_v29  ;;  %vm3204_vm2 = vcmp.lt.f32.partialorder %v6232_v39, %v6380_v11 }
 0x9d9   : > { %vm3230_vm1 = vmor %vm3205_vm8, %vm3222_vm14 }
 0x9da   : > { %v3238_v4 = vsel %vm3230_vm1, 1, %v7466_v8 }
 0x9db   : > { %3415 = vperm.xlu1 %4074, %v6232_v39   ;;  %v3294_v6 = vsel %vm252_vm0, %v3238_v4, 0 }
 0x9dc   : > { %2908 = vrot.lane.b32.xlu0 %v2693_v51, %s4130_s16  ;;  %v2897_v51 = vpop.permute.xlu1 %2896 }
 0x9dd   : > { %v2920_v2 = vsel %vm7432_vm10, %v6219_v5, %v2897_v51  ;;  %vm3214_vm10 = vcmp.eq.f32.partialorder %v6242_v30, %v3191_v56  ;;  %v3195_v56 = vpop.permute.xlu0 %3194 }
 0x9de   : > { %vm3215_vm1 = vcmp.eq.f32.partialorder %v6200_v16, %v3195_v56 }
 0x9df   : > { %3419 = vperm.xlu1 %4074, %v6236_v37  }
 0x9e0   : > { %v6384_v20 = vpop.permute.xlu1 %2900 }
 0x9e3   : > { %3423 = vperm.xlu1 %4074, %v6242_v30  }
 0x9e7   : > { %3427 = vperm.xlu1 %4074, %v6200_v16  }
 0x9eb   : > { %3431 = vperm.xlu1 %4074, %v6253_v31  }
 0x9ef   : > { %4076 = vset.pattern.permute.xlu1 %v4142_v3 }
 0x9fb   : > { %3260 = vadd.xlane.f32.xlu0 %v3258_v34  ;;  %v2826_v34 = vshll.u32 %v2825_v50, 16 }
 0x9fd   : > { %v6392_v32 = vadd.s32 %v2826_v34, %v2824_v12  ;;  %v2799_v34 = vcvt.f32.s32 %v6144_v27 }
 0x9ff   : > { %3262 = vadd.xlane.f32.xlu0 %v3259_v48  ;;  %v2903_v48 = vpop.permute.xlu1 %2902  ;;  %vm7438_vm12 = vcmp.eq.s32.totalorder %v6392_v32, 7  ;;  %v2800_v21 = vshll.u32 %v2799_v34, 16  ;;  %v2864_v34 = vcvt.f32.s32 %v6162_v41 }
 0xa03   : > { %3275 = vadd.xlane.f32.xlu0 %v3272_v17  ;;  %v2877_v17 = vcvt.f32.s32 %v6169_v45  ;;  %v2907_v50 = vpop.permute.xlu1 %2906  ;;  %v2923_v45 = vsel %vm7438_vm12, %v6232_v39, %v2903_v48  ;;  %vm3208_vm12 = vcmp.lt.f32.partialorder %v6253_v31, %v3199_v55  ;;  %v3296_v48 = vshrl.u32 %v3294_v6, 16 }
 0xa04   : > { %v2925_v13 = vsel %vm7435_vm15, %v6242_v30, %v2907_v50  ;;  %vm3223_vm15 = vmand %vm3214_vm10, %vm3217_vm13  ;;  %v6448_v50 = vadd.s32 %v2800_v21, %v2798_v49  ;;  %v3295_v21 = vand.u32 65535, %v3294_v6 }
 0xa05   : > { %v2878_v47 = vshll.u32 %v2877_v17, 16  ;;  %vm3231_vm7 = vmor %vm3206_vm4, %vm3223_vm15  ;;  %v2812_v17 = vcvt.f32.s32 %v6148_v19  ;;  %vm3207_vm4 = vcmp.lt.f32.partialorder %v6200_v16, %v3195_v56  ;;  %v3298_v27 = vcvt.s32.f32 %v3296_v48 }
 0xa06   : > { %v3239_v12 = vsel %vm3231_vm7, 1, %v7466_v8  ;;  %vm3224_vm7 = vmand %vm3215_vm1, %vm3217_vm13  ;;  %vm7444_vm8 = vcmp.eq.s32.totalorder %v6448_v50, 7 }
 0xa07   : > { %v6409_v51 = vadd.s32 %v2878_v47, %v2876_v46  ;;  %v2813_v19 = vshll.u32 %v2812_v17, 16 }
 0xa09   : > { %vm7436_vm9 = vcmp.eq.s32.totalorder %v6409_v51, 7  ;;  %v6458_v62 = vadd.s32 %v2813_v19, %v2811_v54 }
 0xa0b   : > { %vm7443_vm10 = vcmp.eq.s32.totalorder %v6458_v62, 7 }
 0xa19   : > { %3407 = vperm.xlu0 %4075, %v6227_v18  }
 0xa1d   : > { %3129 = vrot.lane.b32.xlu0 %v2920_v2, %s4130_s16  ;;  %v6440_v2 = vsel %vm252_vm0, %v3239_v12, 0 }
 0xa1e   : > { %4077 = vset.pattern.permute.xlu0 %v4142_v3  ;;  %v2911_v3 = vpop.permute.xlu1 %2910  ;;  %v3309_v47 = vshrl.u32 %v6440_v2, 16 }
 0xa1f   : > { %v2927_v60 = vsel %vm7436_vm9, %v6253_v31, %v2911_v3  ;;  %vm3216_vm9 = vcmp.eq.f32.partialorder %v6253_v31, %v3199_v55 }
 0xa20   : > { %vm3225_vm3 = vmand %vm3216_vm9, %vm3217_vm13  ;;  %v3311_v3 = vcvt.s32.f32 %v3309_v47  ;;  %v3297_v47 = vcvt.s32.f32 %v3295_v21  ;;  %vm3212_vm9 = vcmp.eq.f32.partialorder %v6232_v39, %v6380_v11 }
 0xa21   : > { %3135 = vrot.lane.b32.xlu0 %v2923_v45, %s4130_s16  ;;  %vm3233_vm14 = vmor %vm3208_vm12, %vm3225_vm3  ;;  %v2838_v45 = vcvt.f32.s32 %v6156_v53 }
 0xa22   : > { %v3241_v55 = vsel %vm3233_vm14, 1, %v7466_v8  ;;  %vm3232_vm3 = vmor %vm3207_vm4, %vm3224_vm7 }
 0xa23   : > { %v2839_v4 = vshll.u32 %v2838_v45, 16  ;;  %v3240_v12 = vsel %vm3232_vm3, 1, %v7466_v8  ;;  %vm3221_vm14 = vmand %vm3212_vm9, %vm3217_vm13  ;;  %vm3450_vm13 = vcmp.lt.s32.totalorder %v4234_v42, 14 }
 0xa24   : > { %v3320_v49 = vsel %vm252_vm0, %v3240_v12, 0  ;;  %vm3229_vm1 = vmor %vm3204_vm2, %vm3221_vm14 }
 0xa25   : > { %3139 = vrot.lane.b32.xlu0 %v2925_v13, %s4130_s16  ;;  %v6454_v13 = vsel %vm252_vm0, %v3241_v55, 0  ;;  %v6468_v17 = vadd.s32 %v2839_v4, %v2837_v26  ;;  %v2865_v55 = vshll.u32 %v2864_v34, 16  ;;  %v3321_v6 = vand.u32 65535, %v3320_v49 }
 0xa26   : > { %v3237_v34 = vsel %vm3229_vm1, 1, %v7466_v8  ;;  %v3322_v26 = vshrl.u32 %v3320_v49, 16  ;;  %v3308_v49 = vand.u32 65535, %v6440_v2 }
 0xa27   : > { %v6478_v19 = vadd.s32 %v2865_v55, %v2863_v1  ;;  %vm7441_vm12 = vcmp.eq.s32.totalorder %v6468_v17, 7 }
 0xa28   : > { %v3324_v21 = vcvt.s32.f32 %v3322_v26 }
 0xa29   : > { %3143 = vrot.lane.b32.xlu0 %v2927_v60, %s4130_s16  ;;  %v3335_v60 = vshrl.u32 %v6454_v13, 16  ;;  %vm7440_vm15 = vcmp.eq.s32.totalorder %v6478_v19, 7 }
 0xa2b   : > { %v3337_v48 = vcvt.s32.f32 %v3335_v60 }
 0xa47   : > { %v6451_v46 = vpop.xlane.xlu0 %3247 }
 0xa48   : > { %3301 = vadd.xlane.f32.xlu0 %v3298_v27  ;;  %v2922_v27 = vsel %vm7443_vm10, %v6223_v36, %v6384_v20  ;;  %v3323_v20 = vcvt.s32.f32 %v3321_v6  ;;  %v3310_v6 = vcvt.s32.f32 %v3308_v49 }
 0xa4b   : > { %v2899_v53 = vpop.permute.xlu0 %2898 }
 0xa4c   : > { %v2921_v56 = vsel %vm7444_vm8, %v6227_v18, %v2899_v53  ;;  %3314 = vadd.xlane.f32.xlu0 %v3311_v3  ;;  %v6490_v3 = vpop.xlane.xlu1 %3249  ;;  %v3281_v53 = vsel %vm252_vm0, %v3237_v34, 0 }
 0xa4d   : > { %3131 = vrot.lane.b32.xlu1 %v2921_v56, %s4130_s16  ;;  %v3283_v56 = vshrl.u32 %v3281_v53, 16  ;;  %v3282_v55 = vand.u32 65535, %v3281_v53 }
 0xa4f   : > { %v2905_v41 = vpop.permute.xlu0 %2904  ;;  %v3285_v11 = vcvt.s32.f32 %v3283_v56 }
 0xa50   : > { %3340 = vadd.xlane.f32.xlu0 %v3337_v48  ;;  %v2924_v45 = vsel %vm7441_vm12, %v6236_v37, %v2905_v41  ;;  %v6498_v60 = vpop.xlane.xlu1 %3273 }
 0xa51   : > { %3133 = vrot.lane.b32.xlu1 %v2922_v27, %s4130_s16  ;;  %v3284_v27 = vcvt.s32.f32 %v3282_v55 }
 0xa53   : > { %v2909_v54 = vpop.permute.xlu0 %2908 }
 0xa54   : > { %3299 = vadd.xlane.f32.xlu0 %v3297_v47  ;;  %v2926_v29 = vsel %vm7440_vm15, %v6200_v16, %v2909_v54  ;;  %v3404_v4 = vpop.permute.xlu1 %3403 }
 0xa55   : > { %3137 = vrot.lane.b32.xlu1 %v2924_v45, %s4130_s16  ;;  %vm3442_vm4 = vcmp.eq.f32.partialorder %v6219_v5, %v3404_v4  ;;  %vm3434_vm7 = vcmp.lt.f32.partialorder %v6219_v5, %v3404_v4  ;;  %v3334_v45 = vand.u32 65535, %v6454_v13 }
 0xa56   : > { %vm3451_vm3 = vmand %vm3442_vm4, %vm3450_vm13 }
 0xa57   : > { %vm3459_vm2 = vmor %vm3434_vm7, %vm3451_vm3  ;;  %v3336_v13 = vcvt.s32.f32 %v3334_v45 }
 0xa58   : > { %3325 = vadd.xlane.f32.xlu0 %v3323_v20  ;;  %v3412_v12 = vpop.permute.xlu1 %3411  ;;  %v3467_v47 = vsel %vm3459_vm2, 1, %v7466_v8 }
 0xa59   : > { %3141 = vrot.lane.b32.xlu1 %v2926_v29, %s4130_s16  ;;  %vm3444_vm9 = vcmp.eq.f32.partialorder %v6223_v36, %v3412_v12  ;;  %vm3436_vm14 = vcmp.lt.f32.partialorder %v6223_v36, %v3412_v12  ;;  %v6524_v4 = vsel %vm252_vm0, %v3467_v47, 0 }
 0xa5a   : > { %vm3453_vm1 = vmand %vm3444_vm9, %vm3450_vm13  ;;  %v3477_v56 = vshrl.u32 %v6524_v4, 16 }
 0xa5b   : > { %vm3461_vm4 = vmor %vm3436_vm14, %vm3453_vm1 }
 0xa5c   : > { %v3416_v48 = vpop.permute.xlu1 %3415  ;;  %v3469_v53 = vsel %vm3461_vm4, 1, %v7466_v8 }
 0xa5d   : > { %vm3445_vm15 = vcmp.eq.f32.partialorder %v6232_v39, %v3416_v48  ;;  %vm3437_vm7 = vcmp.lt.f32.partialorder %v6232_v39, %v3416_v48  ;;  %v3479_v48 = vcvt.s32.f32 %v3477_v56  ;;  %v3018_v56 = vcvt.f32.s32 %v6294_v9 }
 0xa5e   : > { %vm3454_vm3 = vmand %vm3445_vm15, %vm3450_vm13  ;;  %v3083_v9 = vcvt.f32.s32 %v6340_v44 }
 0xa5f   : > { %vm3462_vm2 = vmor %vm3437_vm7, %vm3454_vm3 }
 0xa60   : > { %v6510_v41 = vpop.permute.xlu1 %3419  ;;  %v3470_v26 = vsel %vm3462_vm2, 1, %v7466_v8 }
 0xa61   : > { %v6540_v55 = vsel %vm252_vm0, %v3470_v26, 0 }
 0xa64   : > { %v3424_v54 = vpop.permute.xlu1 %3423 }
 0xa65   : > { %vm3447_vm9 = vcmp.eq.f32.partialorder %v6242_v30, %v3424_v54  ;;  %vm3439_vm14 = vcmp.lt.f32.partialorder %v6242_v30, %v3424_v54 }
 0xa66   : > { %vm3456_vm15 = vmand %vm3447_vm9, %vm3450_vm13 }
 0xa67   : > { %vm3464_vm1 = vmor %vm3439_vm14, %vm3456_vm15  ;;  %vm3446_vm15 = vcmp.eq.f32.partialorder %v6236_v37, %v6510_v41 }
 0xa6e   : > { %3640 = vperm.xlu0 %4077, %v6227_v18  }
 0xa72   : > { %3652 = vperm.xlu0 %4077, %v6236_v37  }
 0xa76   : > { %3660 = vperm.xlu0 %4077, %v6200_v16  }
 0xa7d   : > { %3288 = vadd.xlane.f32.xlu1 %v3285_v11  ;;  %v6535_v11 = vsel %vm252_vm0, %v3469_v53, 0  ;;  %v3058_v53 = vcvt.f32.s32 %v6300_v22 }
 0xa81   : > { %3327 = vadd.xlane.f32.xlu1 %v3324_v21  ;;  %v3503_v21 = vshrl.u32 %v6535_v11, 16 }
 0xa83   : > { %v3505_v49 = vcvt.s32.f32 %v3503_v21  ;;  %v3084_v21 = vcvt.f32.s32 %v6304_v52 }
 0xa84   : > { %v3261_v1 = vpop.xlane.xlu0 %3260 }
 0xa85   : > { %3286 = vadd.xlane.f32.xlu1 %v3284_v27  ;;  %v3264_v29 = vcvt.f32.s32 %v3261_v1  ;;  %v3472_v27 = vsel %vm3464_vm1, 1, %v7466_v8  ;;  %v3516_v1 = vshrl.u32 %v6540_v55, 16 }
 0xa86   : > { %v6545_v47 = vsel %vm252_vm0, %v3472_v27, 0  ;;  %v3057_v27 = vcvt.f32.s32 %v6329_v0 }
 0xa87   : > { %v3542_v45 = vshrl.u32 %v6545_v47, 16 }
 0xa88   : > { %v3263_v20 = vpop.xlane.xlu0 %3262 }
 0xa89   : > { %v3265_v2 = vcvt.f32.s32 %v3263_v20  ;;  %3312 = vadd.xlane.f32.xlu1 %v3310_v6  ;;  %v3518_v6 = vcvt.s32.f32 %v3516_v1  ;;  %v3544_v54 = vcvt.s32.f32 %v3542_v45 }
 0xa8b   : > { %v3266_v34 = vshll.u32 %v3265_v2, 16  ;;  %v3019_v2 = vcvt.f32.s32 %v6310_v40  ;;  %v3085_v40 = vshll.u32 %v3084_v21, 16 }
 0xa8c   : > { %v6550_v20 = vpop.xlane.xlu0 %3275 }
 0xa8d   : > { %v6528_v12 = vadd.s32 %v3266_v34, %v3264_v29  ;;  %3338 = vadd.xlane.f32.xlu1 %v3336_v13  ;;  %v3020_v34 = vshll.u32 %v3019_v2, 16  ;;  %v6571_v45 = vadd.s32 %v3085_v40, %v3083_v9 }
 0xa8f   : > { %v6558_v26 = vadd.s32 %v3020_v34, %v3018_v56  ;;  %vm3118_vm9 = vcmp.eq.s32.totalorder %v6571_v45, 7 }
 0xa91   : > { %vm7442_vm4 = vcmp.eq.s32.totalorder %v6558_v26, 7 }
 0xa94   : > { %v3408_v29 = vpop.permute.xlu0 %3407 }
 0xa95   : > { %3482 = vadd.xlane.f32.xlu0 %v3479_v48  ;;  %v3059_v48 = vshll.u32 %v3058_v53, 16  ;;  %vm3443_vm3 = vcmp.eq.f32.partialorder %v6227_v18, %v3408_v29  ;;  %vm3435_vm2 = vcmp.lt.f32.partialorder %v6227_v18, %v3408_v29  ;;  %v3428_v29 = vpop.permute.xlu1 %3427 }
 0xa96   : > { %vm3452_vm14 = vmand %vm3443_vm3, %vm3450_vm13  ;;  %vm3438_vm3 = vcmp.lt.f32.partialorder %v6236_v37, %v6510_v41  ;;  %vm3448_vm10 = vcmp.eq.f32.partialorder %v6200_v16, %v3428_v29 }
 0xa97   : > { %v6562_v1 = vadd.s32 %v3059_v48, %v3057_v27  ;;  %vm3460_vm1 = vmor %vm3435_vm2, %vm3452_vm14  ;;  %vm3440_vm14 = vcmp.lt.f32.partialorder %v6200_v16, %v3428_v29 }
 0xa98   : > { %v3130_v13 = vpop.permute.xlu0 %3129  ;;  %vm3457_vm8 = vmand %vm3448_vm10, %vm3450_vm13 }
 0xa99   : > { %3508 = vadd.xlane.f32.xlu0 %v3505_v49  ;;  %v3153_v22 = vsel %vm7442_vm4, %v6219_v5, %v3130_v13  ;;  %vm3116_vm7 = vcmp.eq.s32.totalorder %v6562_v1, 7  ;;  %vm3455_vm4 = vmand %vm3446_vm15, %vm3450_vm13  ;;  %v3432_v13 = vpop.permute.xlu1 %3431 }
 0xa9a   : > { %vm3463_vm2 = vmor %vm3438_vm3, %vm3455_vm4  ;;  %vm3449_vm15 = vcmp.eq.f32.partialorder %v6253_v31, %v3432_v13  ;;  %vm3441_vm4 = vcmp.lt.f32.partialorder %v6253_v31, %v3432_v13 }
 0xa9b   : > { %v3471_v53 = vsel %vm3463_vm2, 1, %v7466_v8 }
 0xa9c   : > { %v3136_v49 = vpop.permute.xlu0 %3135  ;;  %v6610_v56 = vsel %vm252_vm0, %v3471_v53, 0 }
 0xa9d   : > { %3521 = vadd.xlane.f32.xlu0 %v3518_v6  ;;  %v3110_v6 = vcvt.f32.s32 %v6308_v63  ;;  %v3156_v63 = vsel %vm3116_vm7, %v6232_v39, %v3136_v49  ;;  %v3529_v27 = vshrl.u32 %v6610_v56, 16 }
 0xa9e   : > { %3636 = vperm.xlu1 %4076, %v6219_v5  }
 0xa9f   : > { %v3111_v52 = vshll.u32 %v3110_v6, 16  ;;  %v3531_v6 = vcvt.s32.f32 %v3529_v27 }
 0xaa0   : > { %v3140_v0 = vpop.permute.xlu0 %3139 }
 0xaa1   : > { %3547 = vadd.xlane.f32.xlu0 %v3544_v54  ;;  %v3109_v54 = vcvt.f32.s32 %v6368_v38  ;;  %v3158_v44 = vsel %vm3118_vm9, %v6242_v30, %v3140_v0 }
 0xaa2   : > { %3644 = vperm.xlu1 %4076, %v6223_v36  }
 0xaa3   : > { %v6580_v2 = vadd.s32 %v3111_v52, %v3109_v54 }
 0xaa5   : > { %vm7445_vm12 = vcmp.eq.s32.totalorder %v6580_v2, 7 }
 0xaa6   : > { %3648 = vperm.xlu1 %4076, %v6232_v39   ;;  %v3144_v39 = vpop.permute.xlu0 %3143 }
 0xaa7   : > { %v3160_v38 = vsel %vm7445_vm12, %v6253_v31, %v3144_v39  ;;  %vm3465_vm12 = vmor %vm3440_vm14, %vm3457_vm8  ;;  %v3032_v39 = vcvt.f32.s32 %v6296_v15  ;;  %vm3683_vm14 = vcmp.lt.s32.totalorder %v4234_v42, 15 }
 0xaa8   : > { %v3473_v48 = vsel %vm3465_vm12, 1, %v7466_v8 }
 0xaa9   : > { %v6618_v49 = vsel %vm252_vm0, %v3473_v48, 0  ;;  %v3033_v48 = vshll.u32 %v3032_v39, 16  ;;  %v3541_v39 = vand.u32 65535, %v6545_v47 }
 0xaaa   : > { %3656 = vperm.xlu1 %4076, %v6242_v30   ;;  %v3468_v30 = vsel %vm3460_vm1, 1, %v7466_v8  ;;  %vm3458_vm1 = vmand %vm3449_vm15, %vm3450_vm13 }
 0xaab   : > { %v3488_v34 = vsel %vm252_vm0, %v3468_v30, 0  ;;  %vm3466_vm8 = vmor %vm3441_vm4, %vm3458_vm1 }
 0xaac   : > { %v3490_v41 = vshrl.u32 %v3488_v34, 16  ;;  %v3474_v52 = vsel %vm3466_vm8, 1, %v7466_v8 }
 0xaad   : > { %v3566_v0 = vsel %vm252_vm0, %v3474_v52, 0 }
 0xaae   : > { %3664 = vperm.xlu1 %4076, %v6253_v31   ;;  %v3492_v21 = vcvt.s32.f32 %v3490_v41  ;;  %v3489_v41 = vand.u32 65535, %v3488_v34 }
 0xab7   : > { %3362 = vrot.lane.b32.xlu0 %v3153_v22, %s4130_s16  ;;  %v3555_v22 = vshrl.u32 %v6618_v49, 16 }
 0xab9   : > { %v3557_v31 = vcvt.s32.f32 %v3555_v22  ;;  %v3491_v22 = vcvt.s32.f32 %v3489_v41  ;;  %v3096_v41 = vcvt.f32.s32 %v6358_v43 }
 0xabb   : > { %3368 = vrot.lane.b32.xlu0 %v3156_v63, %s4130_s16 }
 0xabf   : > { %3372 = vrot.lane.b32.xlu0 %v3158_v44, %s4130_s16  ;;  %v3568_v44 = vshrl.u32 %v3566_v0, 16  ;;  %v3132_v27 = vpop.permute.xlu1 %3131 }
 0xac1   : > { %v3570_v13 = vcvt.s32.f32 %v3568_v44 }
 0xac3   : > { %3376 = vrot.lane.b32.xlu0 %v3160_v38, %s4130_s16  ;;  %v3134_v44 = vpop.permute.xlu1 %3133 }
 0xad1   : > { %v3302_v40 = vpop.xlane.xlu0 %3301 }
 0xad2   : > { %3495 = vadd.xlane.f32.xlu1 %v3492_v21  ;;  %v3304_v54 = vcvt.f32.s32 %v3302_v40  ;;  %v3045_v21 = vcvt.f32.s32 %v6298_v7  ;;  %v3515_v40 = vand.u32 65535, %v6540_v55 }
 0xad4   : > { %v3305_v30 = vshll.u32 %v3304_v54, 16  ;;  %v3046_v15 = vshll.u32 %v3045_v21, 16  ;;  %v3044_v54 = vcvt.f32.s32 %v6327_v25  ;;  %v3517_v34 = vcvt.s32.f32 %v3515_v40 }
 0xad5   : > { %v6621_v9 = vpop.xlane.xlu0 %3314  ;;  %v3543_v25 = vcvt.s32.f32 %v3541_v39 }
 0xad6   : > { %3534 = vadd.xlane.f32.xlu1 %v3531_v6  ;;  %v3031_v6 = vcvt.f32.s32 %v6318_v14  ;;  %v6638_v7 = vadd.s32 %v3046_v15, %v3044_v54  ;;  %v3097_v14 = vcvt.f32.s32 %v6306_v35 }
 0xad8   : > { %v6633_v52 = vadd.s32 %v3033_v48, %v3031_v6  ;;  %v3098_v47 = vshll.u32 %v3097_v14, 16  ;;  %vm7448_vm12 = vcmp.eq.s32.totalorder %v6638_v7, 7 }
 0xad9   : > { %v6625_v63 = vpop.xlane.xlu0 %3340  ;;  %v3155_v35 = vsel %vm7448_vm12, %v6223_v36, %v3134_v44 }
 0xada   : > { %3560 = vadd.xlane.f32.xlu1 %v3557_v31  ;;  %v3071_v31 = vcvt.f32.s32 %v6302_v61  ;;  %vm7449_vm10 = vcmp.eq.s32.totalorder %v6633_v52, 7  ;;  %v3070_v61 = vcvt.f32.s32 %v6333_v10  ;;  %v6655_v48 = vadd.s32 %v3098_v47, %v3096_v41 }
 0xadb   : > { %v3154_v55 = vsel %vm7449_vm10, %v6227_v18, %v3132_v27 }
 0xadc   : > { %7545 = vst [vmem:[#allocation77_spill] sm:$0xff] %v6655_v48  ;;  %vm7446_vm3 = vcmp.eq.s32.totalorder %v6655_v48, 7 }
 0xadd   : > { %v3300_v38 = vpop.xlane.xlu0 %3299 }
 0xade   : > { %v3303_v29 = vcvt.f32.s32 %v3300_v38  ;;  %v3072_v38 = vshll.u32 %v3071_v31, 16 }
 0xae0   : > { %v6628_v53 = vadd.s32 %v3305_v30, %v3303_v29  ;;  %v3567_v30 = vand.u32 65535, %v3566_v0  ;;  %v6647_v29 = vadd.s32 %v3072_v38, %v3070_v61 }
 0xae1   : > { %v3326_v6 = vpop.xlane.xlu0 %3325 }
 0xae2   : > { %3573 = vadd.xlane.f32.xlu0 %v3570_v13  ;;  %v3138_v13 = vpop.permute.xlu1 %3137  ;;  %v3569_v10 = vcvt.s32.f32 %v3567_v30  ;;  %vm7447_vm13 = vcmp.eq.s32.totalorder %v6647_v29, 7  ;;  %v3329_v31 = vcvt.f32.s32 %v3326_v6  ;;  %v3343_v30 = vcvt.f32.s32 %v6625_v63  ;;  %v6694_v6 = vld [vmem:[%s4175_s15 + $0x30] sm:$0xff] }
 0xae3   : > { %v3157_v0 = vsel %vm7447_vm13, %v6236_v37, %v3138_v13 }
 0xae6   : > { %3493 = vadd.xlane.f32.xlu0 %v3491_v22  ;;  %v3142_v21 = vpop.permute.xlu1 %3141 }
 0xae7   : > { %v3159_v43 = vsel %vm7446_vm3, %v6200_v16, %v3142_v21 }
 0xaea   : > { %3519 = vadd.xlane.f32.xlu0 %v3517_v34  ;;  %v3317_v34 = vcvt.f32.s32 %v6621_v9  ;;  %v3476_v9 = vand.u32 65535, %v6524_v4 }
 0xaeb   : > { %3364 = vrot.lane.b32.xlu1 %v3154_v55, %s4130_s16  ;;  %v3641_v55 = vpop.permute.xlu0 %3640 }
 0xaec   : > { %vm3676_vm2 = vcmp.eq.f32.partialorder %v6227_v18, %v3641_v55  ;;  %vm3668_vm15 = vcmp.lt.f32.partialorder %v6227_v18, %v3641_v55  ;;  %v3478_v21 = vcvt.s32.f32 %v3476_v9 }
 0xaed   : > { %vm3685_vm4 = vmand %vm3676_vm2, %vm3683_vm14 }
 0xaee   : > { %3545 = vadd.xlane.f32.xlu0 %v3543_v25  ;;  %v3318_v25 = vshll.u32 %v3317_v34, 16  ;;  %vm3693_vm8 = vmor %vm3668_vm15, %vm3685_vm4  ;;  %v3554_v34 = vand.u32 65535, %v6618_v49 }
 0xaef   : > { %3366 = vrot.lane.b32.xlu1 %v3155_v35, %s4130_s16  ;;  %v3653_v35 = vpop.permute.xlu0 %3652  ;;  %v3701_v4 = vsel %vm3693_vm8, 1, %v7466_v8 }
 0xaf0   : > { %vm3679_vm1 = vcmp.eq.f32.partialorder %v6236_v37, %v3653_v35  ;;  %vm3671_vm3 = vcmp.lt.f32.partialorder %v6236_v37, %v3653_v35  ;;  %v3556_v35 = vcvt.s32.f32 %v3554_v34 }
 0xaf1   : > { %vm3688_vm13 = vmand %vm3679_vm1, %vm3683_vm14 }
 0xaf2   : > { %3571 = vadd.xlane.f32.xlu0 %v3569_v10  ;;  %v3344_v10 = vshll.u32 %v3343_v30, 16  ;;  %vm6698_vm1 = vmor %vm3671_vm3, %vm3688_vm13 }
 0xaf3   : > { %3370 = vrot.lane.b32.xlu1 %v3157_v0, %s4130_s16  ;;  %v3661_v18 = vpop.permute.xlu0 %3660 }
 0xaf4   : > { %vm3681_vm4 = vcmp.eq.f32.partialorder %v6694_v6, %v3661_v18 }
 0xaf7   : > { %3374 = vrot.lane.b32.xlu1 %v3159_v43, %s4130_s16  ;;  %v3502_v43 = vand.u32 65535, %v6535_v11  ;;  %v3528_v11 = vand.u32 65535, %v6610_v56 }
 0xaf9   : > { %v3504_v37 = vcvt.s32.f32 %v3502_v43 }
 0xb06   : > { %v3289_v27 = vpop.xlane.xlu1 %3288 }
 0xb07   : > { %v3291_v40 = vcvt.f32.s32 %v3289_v27 }
 0xb09   : > { %v3292_v39 = vshll.u32 %v3291_v40, 16 }
 0xb0a   : > { %v3328_v22 = vpop.xlane.xlu1 %3327 }
 0xb0b   : > { %v3330_v15 = vcvt.f32.s32 %v3328_v22 }
 0xb0d   : > { %v3331_v54 = vshll.u32 %v3330_v15, 16  ;;  %v6704_v15 = vsel %vm252_vm0, %v3701_v4, 0 }
 0xb0e   : > { %v3287_v44 = vpop.xlane.xlu1 %3286 }
 0xb0f   : > { %v6668_v38 = vadd.s32 %v3331_v54, %v3329_v31  ;;  %v3290_v14 = vcvt.f32.s32 %v3287_v44  ;;  %v3530_v44 = vcvt.s32.f32 %v3528_v11 }
 0xb11   : > { %v6670_v61 = vadd.s32 %v3292_v39, %v3290_v14 }
 0xb12   : > { %v3313_v16 = vpop.xlane.xlu1 %3312 }
 0xb13   : > { %v3316_v47 = vcvt.f32.s32 %v3313_v16  ;;  %v3723_v16 = vshrl.u32 %v6704_v15, 16 }
 0xb15   : > { %v6674_v13 = vadd.s32 %v3318_v25, %v3316_v47  ;;  %v6735_v47 = vld [vmem:[%s4175_s15 + $0x18] sm:$0xff] }
 0xb16   : > { %v3339_v41 = vpop.xlane.xlu1 %3338 }
 0xb17   : > { %v3342_v0 = vcvt.f32.s32 %v3339_v41 }
 0xb19   : > { %v6682_v63 = vadd.s32 %v3344_v10, %v3342_v0 }
 0xb1a   : > { %v3637_v27 = vpop.permute.xlu1 %3636 }
 0xb1b   : > { %vm3667_vm2 = vcmp.lt.f32.partialorder %v6219_v5, %v3637_v27  ;;  %vm3675_vm12 = vcmp.eq.f32.partialorder %v6219_v5, %v3637_v27  ;;  %3480 = vadd.xlane.f32.xlu1 %v3478_v21  ;;  %v3725_v21 = vcvt.s32.f32 %v3723_v16 }
 0xb1c   : > { %vm3684_vm15 = vmand %vm3675_vm12, %vm3683_vm14 }
 0xb1d   : > { %vm3692_vm10 = vmor %vm3667_vm2, %vm3684_vm15 }
 0xb1e   : > { %v3700_v5 = vsel %vm3692_vm10, 1, %v7466_v8  ;;  %v3645_v40 = vpop.permute.xlu1 %3644  ;;  %vm6711_vm12 = vmand %vm3681_vm4, %vm3683_vm14  ;;  %vm3673_vm10 = vcmp.lt.f32.partialorder %v6694_v6, %v3661_v18  ;;  %v6748_v18 = vld [vmem:[%s4175_s15 + $0x28] sm:$0xff] }
 0xb1f   : > { %v6707_v31 = vsel %vm252_vm0, %v3700_v5, 0  ;;  %vm3669_vm13 = vcmp.lt.f32.partialorder %v6223_v36, %v3645_v40  ;;  %vm3677_vm3 = vcmp.eq.f32.partialorder %v6223_v36, %v3645_v40  ;;  %3506 = vadd.xlane.f32.xlu1 %v3504_v37  ;;  %v3704_v36 = vsel %vm6698_vm1, 1, %v7466_v8  ;;  %vm6729_vm15 = vmor %vm3673_vm10, %vm6711_vm12 }
 0xb20   : > { %vm3686_vm8 = vmand %vm3677_vm3, %vm3683_vm14  ;;  %v3710_v56 = vshrl.u32 %v6707_v31, 16  ;;  %v3760_v9 = vsel %vm252_vm0, %v3704_v36, 0  ;;  %v3706_v43 = vsel %vm6729_vm15, 1, %v7466_v8  ;;  %v3709_v42 = vand.u32 65535, %v6707_v31 }
 0xb21   : > { %vm3694_vm2 = vmor %vm3669_vm13, %vm3686_vm8  ;;  %v3762_v37 = vshrl.u32 %v3760_v9, 16  ;;  %v6755_v11 = vsel %vm252_vm0, %v3706_v43, 0 }
 0xb22   : > { %v3702_v39 = vsel %vm3694_vm2, 1, %v7466_v8  ;;  %v3649_v14 = vpop.permute.xlu1 %3648  ;;  %v3712_v55 = vcvt.s32.f32 %v3710_v56  ;;  %v6760_v56 = vld [vmem:[%s4175_s15 + $0x38] sm:$0xff] }
 0xb23   : > { %v3734_v30 = vsel %vm252_vm0, %v3702_v39, 0  ;;  %vm3670_vm4 = vcmp.lt.f32.partialorder %v6735_v47, %v3649_v14  ;;  %vm3678_vm13 = vcmp.eq.f32.partialorder %v6735_v47, %v3649_v14  ;;  %3532 = vadd.xlane.f32.xlu1 %v3530_v44  ;;  %v3764_v34 = vcvt.s32.f32 %v3762_v37 }
 0xb24   : > { %vm3687_vm3 = vmand %vm3678_vm13, %vm3683_vm14  ;;  %3715 = vadd.xlane.f32.xlu0 %v3712_v55  ;;  %v3736_v49 = vshrl.u32 %v3734_v30, 16  ;;  %v3788_v39 = vshrl.u32 %v6755_v11, 16  ;;  %v3761_v37 = vand.u32 65535, %v3760_v9  ;;  %v3251_v9 = vcvt.f32.s32 %v6451_v46 }
 0xb25   : > { %vm3695_vm1 = vmor %vm3670_vm4, %vm3687_vm3 }
 0xb26   : > { %v3703_v41 = vsel %vm3695_vm1, 1, %v7466_v8  ;;  %v3657_v10 = vpop.permute.xlu1 %3656  ;;  %v3738_v0 = vcvt.s32.f32 %v3736_v49  ;;  %v3790_v25 = vcvt.s32.f32 %v3788_v39 }
 0xb27   : > { %v3747_v27 = vsel %vm252_vm0, %v3703_v41, 0  ;;  %vm3672_vm12 = vcmp.lt.f32.partialorder %v6748_v18, %v3657_v10  ;;  %vm3680_vm10 = vcmp.eq.f32.partialorder %v6748_v18, %v3657_v10  ;;  %3558 = vadd.xlane.f32.xlu1 %v3556_v35  ;;  %v3722_v35 = vand.u32 65535, %v6704_v15  ;;  %v6774_v41 = vpop.xlane.xlu0 %3482 }
 0xb28   : > { %vm3689_vm8 = vmand %vm3680_vm10, %vm3683_vm14  ;;  %3741 = vadd.xlane.f32.xlu0 %v3738_v0  ;;  %v3749_v4 = vshrl.u32 %v3747_v27, 16  ;;  %v3711_v10 = vcvt.s32.f32 %v3709_v42  ;;  %v3735_v0 = vand.u32 65535, %v3734_v30  ;;  %v3748_v43 = vand.u32 65535, %v3747_v27 }
 0xb29   : > { %vm3697_vm2 = vmor %vm3672_vm12, %vm3689_vm8  ;;  %v3763_v15 = vcvt.s32.f32 %v3761_v37  ;;  %v3252_v30 = vcvt.f32.s32 %v6490_v3  ;;  %v7561_v37 = vld [vmem:[#allocation30_spill] sm:$0xff] }
 0xb2a   : > { %v3705_v22 = vsel %vm3697_vm2, 1, %v7466_v8  ;;  %v3665_v5 = vpop.permute.xlu1 %3664  ;;  %v3751_v40 = vcvt.s32.f32 %v3749_v4  ;;  %v3737_v4 = vcvt.s32.f32 %v3735_v0  ;;  %vm7562_vm10 = vcmp.eq.s32.totalorder %v7561_v37, 7  ;;  %v6862_v37 = vld [vmem:[%s4175_s15 + $0x20] sm:$0xff] }
 0xb2b   : > { %v3773_v54 = vsel %vm252_vm0, %v3705_v22, 0  ;;  %vm3674_vm15 = vcmp.lt.f32.partialorder %v6760_v56, %v3665_v5  ;;  %vm3682_vm4 = vcmp.eq.f32.partialorder %v6760_v56, %v3665_v5  ;;  %3728 = vadd.xlane.f32.xlu1 %v3725_v21  ;;  %v3724_v21 = vcvt.s32.f32 %v3722_v35  ;;  %v6776_v22 = vpop.xlane.xlu0 %3508 }
 0xb2c   : > { %vm3691_vm13 = vmand %vm3682_vm4, %vm3683_vm14  ;;  %3754 = vadd.xlane.f32.xlu0 %v3751_v40  ;;  %v3775_v44 = vshrl.u32 %v3773_v54, 16  ;;  %v3750_v5 = vcvt.s32.f32 %v3748_v43  ;;  %v3774_v31 = vand.u32 65535, %v3773_v54  ;;  %v3253_v27 = vshll.u32 %v3252_v30, 16  ;;  %v6788_v54 = vld [vmem:[%s4175_s15] sm:$0xff]  ;;  %v7565_v30 = vld [vmem:[#allocation25_spill] sm:$0xff] }
 0xb2d   : > { %vm3699_vm3 = vmor %vm3674_vm15, %vm3691_vm13  ;;  %vm3347_vm14 = vcmp.eq.s32.totalorder %v6528_v12, 7  ;;  %vm7566_vm8 = vcmp.eq.s32.totalorder %v7565_v30, 7  ;;  %vm7567_vm2 = vcmp.eq.s32.totalorder %v5406_v28, 7  ;;  %vm7570_vm4 = vcmp.eq.s32.totalorder %v5585_v33, 7  ;;  %v7575_v30 = vld [vmem:[#allocation41_spill] sm:$0xff] }
 0xb2e   : > { %v3707_v14 = vsel %vm3699_vm3, 1, %v7466_v8  ;;  %v3777_v55 = vcvt.s32.f32 %v3775_v44  ;;  %v3776_v40 = vcvt.s32.f32 %v3774_v31  ;;  %v6784_v39 = vadd.s32 %v3253_v27, %v3251_v9  ;;  %v7555_v9 = vld [vmem:[#allocation24_spill] sm:$0xff] }
 0xb2f   : > { %v6769_v16 = vsel %vm252_vm0, %v3707_v14, 0  ;;  %3767 = vadd.xlane.f32.xlu1 %v3764_v34  ;;  %v6778_v44 = vpop.xlane.xlu0 %3521  ;;  %v603_v27 = vsel %vm555_vm6, 1, %v7466_v8  ;;  %vm7556_vm12 = vcmp.eq.s32.totalorder %v7555_v9, 7  ;;  %vm3350_vm13 = vcmp.eq.s32.totalorder %v6628_v53, 7 }
 0xb30   : > { %3780 = vadd.xlane.f32.xlu0 %v3777_v55  ;;  %v3801_v36 = vshrl.u32 %v6769_v16, 16  ;;  %vm3346_vm0 = vcmp.eq.s32.totalorder %v6784_v39, 7  ;;  %vm3349_vm3 = vcmp.eq.s32.totalorder %v6670_v61, 7 }
 0xb32   : > { %v3803_v49 = vcvt.s32.f32 %v3801_v36 }
 0xb33   : > { %3793 = vadd.xlane.f32.xlu1 %v3790_v25  ;;  %v6781_v34 = vpop.xlane.xlu0 %3547  ;;  %v3278_v25 = vcvt.f32.s32 %v6550_v20 }
 0xb34   : > { %3806 = vadd.xlane.f32.xlu0 %v3803_v49 }
 0xb35   : > { %v3279_v49 = vshll.u32 %v3278_v25, 16 }
 0xb37   : > { %3713 = vadd.xlane.f32.xlu1 %v3711_v10  ;;  %v3363_v14 = vpop.permute.xlu0 %3362  ;;  %v3277_v10 = vcvt.f32.s32 %v6498_v60  ;;  %v7563_v60 = vld [vmem:[#allocation20_spill] sm:$0xff] }
 0xb38   : > { %3726 = vadd.xlane.f32.xlu0 %v3724_v21  ;;  %v3386_v55 = vsel %vm3346_vm0, %v6788_v54, %v3363_v14  ;;  %vm7564_vm6 = vcmp.eq.s32.totalorder %v7563_v60, 7 }
 0xb39   : > { %v6803_v0 = vadd.s32 %v3279_v49, %v3277_v10  ;;  %v7557_v49 = vld [vmem:[#allocation9_spill] sm:$0xff] }
 0xb3b   : > { %3739 = vadd.xlane.f32.xlu1 %v3737_v4  ;;  %v3369_v3 = vpop.permute.xlu0 %3368  ;;  %v6808_v4 = vld [vmem:[%s4175_s15 + $0x8] sm:$0xff]  ;;  %vm3348_vm1 = vcmp.eq.s32.totalorder %v6803_v0, 7 }
 0xb3c   : > { %3752 = vadd.xlane.f32.xlu0 %v3750_v5  ;;  %v601_v5 = vsel %vm553_vm5, 1, %v7466_v8  ;;  %vm7558_vm5 = vcmp.eq.s32.totalorder %v7557_v49, 7  ;;  %v7568_v49 = vld [vmem:[#allocation32_spill] sm:$0xff]  ;;  %v3389_v28 = vsel %vm3349_vm3, %v6735_v47, %v3369_v3 }
 0xb3d   : > { %v834_v31 = vsel %vm786_vm11, 2, %v601_v5  ;;  %v605_v10 = vsel %vm7558_vm5, 1, %v7466_v8  ;;  %vm7569_vm15 = vcmp.eq.s32.totalorder %v7568_v49, 7 }
 0xb3e   : > { %v1067_v14 = vsel %vm7556_vm12, 3, %v834_v31  ;;  %v838_v31 = vsel %vm7564_vm6, 2, %v605_v10  ;;  %v7571_v10 = vld [vmem:[#allocation53_spill] sm:$0xff] }
 0xb3f   : > { %3765 = vadd.xlane.f32.xlu1 %v3763_v15  ;;  %v3373_v42 = vpop.permute.xlu0 %3372  ;;  %v1300_v5 = vsel %vm7562_vm10, 4, %v1067_v14  ;;  %vm7572_vm12 = vcmp.eq.s32.totalorder %v7571_v10, 7 }
 0xb40   : > { %3778 = vadd.xlane.f32.xlu0 %v3776_v40 }
 0xb43   : > { %v6805_v21 = vpop.permute.xlu0 %3376 }
 0xb50   : > { %3595 = vrot.lane.b32.xlu1 %v3386_v55, %s4130_s16  ;;  %v6828_v55 = vld [vmem:[%s4175_s15 + $0x10] sm:$0xff] }
 0xb5b   : > { %v6794_v36 = vpop.xlane.xlu1 %3495 }
 0xb5f   : > { %v6797_v46 = vpop.xlane.xlu1 %3534 }
 0xb63   : > { %v6799_v35 = vpop.xlane.xlu1 %3560 }
 0xb67   : > { %v3365_v43 = vpop.permute.xlu1 %3364 }
 0xb68   : > { %v3387_v20 = vsel %vm3347_vm14, %v6808_v4, %v3365_v43  ;;  %v7559_v43 = vld [vmem:[#allocation18_spill] sm:$0xff] }
 0xb69   : > { %3597 = vrot.lane.b32.xlu0 %v3387_v20, %s4130_s16  ;;  %vm7560_vm11 = vcmp.eq.s32.totalorder %v7559_v43, 7 }
 0xb6a   : > { %v836_v20 = vsel %vm7560_vm11, 2, %v603_v27  ;;  %vm7576_vm11 = vcmp.eq.s32.totalorder %v7575_v30, 7 }
 0xb6b   : > { %v3367_v15 = vpop.permute.xlu1 %3366  ;;  %v6820_v40 = vpop.xlane.xlu0 %3573  ;;  %v1069_v9 = vsel %vm7566_vm8, 3, %v836_v20  ;;  %v3524_v20 = vcvt.f32.s32 %v6778_v44  ;;  %v7579_v44 = vld [vmem:[#allocation33_spill] sm:$0xff] }
 0xb6c   : > { %v3388_v25 = vsel %vm3348_vm1, %v6828_v55, %v3367_v15  ;;  %v1533_v15 = vsel %vm7567_vm2, 5, %v1300_v5  ;;  %v1302_v48 = vsel %vm7569_vm15, 4, %v1069_v9  ;;  %v7573_v5 = vld [vmem:[#allocation12_spill] sm:$0xff]  ;;  %vm7580_vm6 = vcmp.eq.s32.totalorder %v7579_v44, 7 }
 0xb6d   : > { %3599 = vrot.lane.b32.xlu1 %v3388_v25, %s4130_s16  ;;  %v1766_v27 = vsel %vm7570_vm4, 6, %v1533_v15  ;;  %vm7574_vm5 = vcmp.eq.s32.totalorder %v7573_v5, 7  ;;  %v1535_v9 = vsel %vm7576_vm11, 5, %v1302_v48  ;;  %v7577_v15 = vld [vmem:[#allocation61_spill] sm:$0xff]  ;;  %vm7583_vm2 = vcmp.eq.s32.totalorder %v6102_v24, 7 }
 0xb6e   : > { %v1999_v43 = vsel %vm7572_vm12, 7, %v1766_v27  ;;  %v1071_v60 = vsel %vm7574_vm5, 3, %v838_v31  ;;  %vm7578_vm10 = vcmp.eq.s32.totalorder %v7577_v15, 7  ;;  %v7581_v27 = vld [vmem:[#allocation34_spill] sm:$0xff]  ;;  %vm7584_vm15 = vcmp.eq.s32.totalorder %v6265_v58, 7 }
 0xb6f   : > { %v3371_v14 = vpop.permute.xlu1 %3370  ;;  %v6853_v25 = vpop.xlane.xlu0 %3493  ;;  %v2232_v49 = vsel %vm7578_vm10, 8, %v1999_v43  ;;  %v1304_v3 = vsel %vm7580_vm6, 4, %v1071_v60  ;;  %vm7582_vm8 = vcmp.eq.s32.totalorder %v7581_v27, 7  ;;  %vm3352_vm4 = vcmp.eq.s32.totalorder %v6668_v38, 7  ;;  %v7585_v58 = vld [vmem:[#allocation42_spill] sm:$0xff] }
 0xb70   : > { %v3390_v33 = vsel %vm3350_vm13, %v6862_v37, %v3371_v14  ;;  %v1768_v10 = vsel %vm7582_vm8, 6, %v1535_v9  ;;  %v2465_v14 = vsel %vm7583_vm2, 9, %v2232_v49  ;;  %vm3351_vm12 = vcmp.eq.s32.totalorder %v6674_v13, 7  ;;  %v7587_v9 = vld [vmem:[#allocation54_spill] sm:$0xff] }
 0xb71   : > { %3603 = vrot.lane.b32.xlu0 %v3390_v33, %s4130_s16  ;;  %3601 = vrot.lane.b32.xlu1 %v3389_v28, %s4130_s16  ;;  %v2698_v31 = vsel %vm7584_vm15, 10, %v2465_v14  ;;  %v3550_v48 = vcvt.f32.s32 %v6781_v34  ;;  %v3525_v33 = vshll.u32 %v3524_v20, 16  ;;  %v3391_v5 = vsel %vm3351_vm12, %v6748_v18, %v3373_v42  ;;  %v7590_v20 = vld [vmem:[#allocation35_spill] sm:$0xff]  ;;  %v7592_v49 = vld [vmem:[#allocation62_spill] sm:$0xff]  ;;  %v7594_v14 = vld [vmem:[#allocation69_spill] sm:$0xff] }
 0xb72   : > { %vm7586_vm5 = vcmp.eq.s32.totalorder %v7585_v58, 7  ;;  %vm7588_vm11 = vcmp.eq.s32.totalorder %v7587_v9, 7  ;;  %vm7589_vm10 = vcmp.eq.s32.totalorder %v6392_v32, 7  ;;  %vm7591_vm6 = vcmp.eq.s32.totalorder %v7590_v20, 7  ;;  %v7600_v58 = vld [vmem:[#allocation63_spill] sm:$0xff]  ;;  %v7603_v9 = vld [vmem:[#allocation70_spill] sm:$0xff] }
 0xb73   : > { %v3375_v43 = vpop.permute.xlu1 %3374  ;;  %v3520_v28 = vpop.xlane.xlu0 %3519  ;;  %v1537_v30 = vsel %vm7586_vm5, 5, %v1304_v3  ;;  %v2001_v15 = vsel %vm7588_vm11, 7, %v1768_v10  ;;  %v2931_v34 = vsel %vm7589_vm10, 11, %v2698_v31  ;;  %vm7593_vm8 = vcmp.eq.s32.totalorder %v7592_v49, 7 }
 0xb74   : > { %v3392_v24 = vsel %vm3352_vm4, %v6694_v6, %v3375_v43  ;;  %v3523_v60 = vcvt.f32.s32 %v3520_v28  ;;  %v1770_v42 = vsel %vm7591_vm6, 6, %v1537_v30  ;;  %v2234_v44 = vsel %vm7593_vm8, 8, %v2001_v15 }
 0xb75   : > { %3607 = vrot.lane.b32.xlu0 %v3392_v24, %s4130_s16  ;;  %3605 = vrot.lane.b32.xlu1 %v3391_v5, %s4130_s16  ;;  %v3164_v27 = vsel %vm3116_vm7, 12, %v2931_v34  ;;  %vm7595_vm2 = vcmp.eq.s32.totalorder %v7594_v14, 7  ;;  %vm3353_vm15 = vcmp.eq.s32.totalorder %v6682_v63, 7  ;;  %v3551_v31 = vshll.u32 %v3550_v48, 16  ;;  %v7596_v5 = vld [vmem:[#allocation55_spill] sm:$0xff] }
 0xb76   : > { %v6906_v3 = vadd.s32 %v3525_v33, %v3523_v60  ;;  %v2467_v10 = vsel %vm7595_vm2, 9, %v2234_v44  ;;  %v3397_v32 = vsel %vm3349_vm3, 13, %v3164_v27  ;;  %v3393_v28 = vsel %vm3353_vm15, %v6760_v56, %v6805_v21  ;;  %v7598_v60 = vld [vmem:[#allocation73_spill] sm:$0xff]  ;;  %v7605_v27 = vld [vmem:[#allocation74_spill] sm:$0xff] }
 0xb77   : > { %v3546_v43 = vpop.xlane.xlu0 %3545  ;;  %v3576_v1 = vcvt.f32.s32 %v6820_v40  ;;  %vm7597_vm5 = vcmp.eq.s32.totalorder %v7596_v5, 7  ;;  %vm7599_vm11 = vcmp.eq.s32.totalorder %v7598_v60, 7  ;;  %vm7601_vm3 = vcmp.eq.s32.totalorder %v7600_v58, 7  ;;  %v7609_v60 = vld [vmem:[#allocation5_spill] sm:$0xff] }
 0xb78   : > { %vm3582_vm7 = vcmp.eq.s32.totalorder %v6906_v3, 7  ;;  %v3549_v33 = vcvt.f32.s32 %v3546_v43  ;;  %v2003_v24 = vsel %vm7597_vm5, 7, %v1770_v42  ;;  %v2700_v61 = vsel %vm7599_vm11, 10, %v2467_v10 }
 0xb79   : > { %v6925_v48 = vsel %vm3582_vm7, 14, %v3397_v32  ;;  %3609 = vrot.lane.b32.xlu1 %v3393_v28, %s4130_s16  ;;  %v2236_v21 = vsel %vm7601_vm3, 8, %v2003_v24  ;;  %vm7602_vm10 = vcmp.eq.s32.totalorder %v6401_v57, 7  ;;  %vm7604_vm6 = vcmp.eq.s32.totalorder %v7603_v9, 7 }
 0xb7a   : > { %v2933_v40 = vsel %vm7602_vm10, 11, %v2700_v61  ;;  %v6932_v30 = vadd.s32 %v3551_v31, %v3549_v33  ;;  %v2469_v15 = vsel %vm7604_vm6, 9, %v2236_v21  ;;  %v3577_v49 = vshll.u32 %v3576_v1, 16 }
 0xb7b   : > { %v3166_v34 = vsel %vm3118_vm9, 12, %v2933_v40  ;;  %v3572_v20 = vpop.xlane.xlu0 %3571  ;;  %vm7606_vm2 = vcmp.eq.s32.totalorder %v7605_v27, 7  ;;  %vm7607_vm5 = vcmp.eq.s32.totalorder %v6409_v51, 7  ;;  %vm7608_vm9 = vcmp.eq.s32.totalorder %v6580_v2, 7  ;;  %v7615_v40 = vld [vmem:[#allocation4_spill] sm:$0xff] }
 0xb7c   : > { %v3399_v42 = vsel %vm3351_vm12, 13, %v3166_v34  ;;  %vm3584_vm8 = vcmp.eq.s32.totalorder %v6932_v30, 7  ;;  %v3575_v44 = vcvt.f32.s32 %v3572_v20  ;;  %v2702_v57 = vsel %vm7606_vm2, 10, %v2469_v15  ;;  %v7617_v34 = vld [vmem:[#allocation15_spill] sm:$0xff]  ;;  %v7696_v30 = vld [vmem:[#allocation6_spill] sm:$0xff] }
 0xb7d   : > { %v6945_v14 = vsel %vm3584_vm8, 14, %v3399_v42  ;;  %v2935_v10 = vsel %vm7607_vm5, 11, %v2702_v57  ;;  %v3800_v43 = vand.u32 65535, %v6769_v16  ;;  %v3787_v51 = vand.u32 65535, %v6755_v11  ;;  %v7611_v16 = vld [vmem:[#allocation3_spill] sm:$0xff]  ;;  %v7613_v11 = vld [vmem:[#allocation2_spill] sm:$0xff] }
 0xb7e   : > { %v6949_v45 = vadd.s32 %v3577_v49, %v3575_v44  ;;  %v3168_v13 = vsel %vm7608_vm9, 12, %v2935_v10  ;;  %vm7612_vm11 = vcmp.eq.s32.totalorder %v7611_v16, 7  ;;  %vm7614_vm3 = vcmp.eq.s32.totalorder %v7613_v11, 7  ;;  %v7619_v42 = vld [vmem:[#allocation14_spill] sm:$0xff]  ;;  %v7621_v44 = vld [vmem:[#allocation17_spill] sm:$0xff]  ;;  %v7633_v11 = vld [vmem:[#allocation27_spill] sm:$0xff] }
 0xb7f   : > { %v3401_v32 = vsel %vm3353_vm15, 13, %v3168_v13  ;;  %v3802_v28 = vcvt.s32.f32 %v3800_v43  ;;  %v3789_v1 = vcvt.s32.f32 %v3787_v51  ;;  %vm7610_vm15 = vcmp.eq.s32.totalorder %v7609_v60, 7  ;;  %v7623_v57 = vld [vmem:[#allocation13_spill] sm:$0xff]  ;;  %v7627_v43 = vld [vmem:[#allocation23_spill] sm:$0xff]  ;;  %v7629_v51 = vld [vmem:[#allocation22_spill] sm:$0xff] }
 0xb80   : > { %vm3586_vm12 = vcmp.eq.s32.totalorder %v6949_v45, 7  ;;  %v598_v61 = vsel %vm7610_vm15, 1, %v7466_v8  ;;  %v600_v58 = vsel %vm7612_vm11, 1, %v7466_v8  ;;  %v599_v21 = vsel %vm7614_vm3, 1, %v7466_v8  ;;  %v7625_v13 = vld [vmem:[#allocation21_spill] sm:$0xff]  ;;  %v7631_v60 = vld [vmem:[#allocation10_spill] sm:$0xff] }
 0xb81   : > { %v6958_v31 = vsel %vm3586_vm12, 14, %v3401_v32  ;;  %vm7616_vm10 = vcmp.eq.s32.totalorder %v7615_v40, 7  ;;  %vm7618_vm6 = vcmp.eq.s32.totalorder %v7617_v34, 7  ;;  %vm7620_vm2 = vcmp.eq.s32.totalorder %v7619_v42, 7  ;;  %v7639_v34 = vld [vmem:[#allocation29_spill] sm:$0xff] }
 0xb82   : > { %v602_v9 = vsel %vm7616_vm10, 1, %v7466_v8  ;;  %v832_v20 = vsel %vm7618_vm6, 2, %v599_v21  ;;  %v833_v49 = vsel %vm7620_vm2, 2, %v600_v58  ;;  %vm7622_vm5 = vcmp.eq.s32.totalorder %v7621_v44, 7  ;;  %v7635_v21 = vld [vmem:[#allocation26_spill] sm:$0xff] }
 0xb83   : > { %v835_v27 = vsel %vm7622_vm5, 2, %v602_v9  ;;  %vm7624_vm9 = vcmp.eq.s32.totalorder %v7623_v57, 7  ;;  %vm7626_vm15 = vcmp.eq.s32.totalorder %v7625_v13, 7  ;;  %vm7628_vm11 = vcmp.eq.s32.totalorder %v7627_v43, 7  ;;  %v7637_v9 = vld [vmem:[#allocation28_spill] sm:$0xff] }
 0xb84   : > { %v831_v10 = vsel %vm7624_vm9, 2, %v598_v61  ;;  %vm7630_vm3 = vcmp.eq.s32.totalorder %v7629_v51, 7  ;;  %vm7632_vm10 = vcmp.eq.s32.totalorder %v7631_v60, 7  ;;  %vm7634_vm6 = vcmp.eq.s32.totalorder %v7633_v11, 7 }
 0xb85   : > { %v1064_v32 = vsel %vm7626_vm15, 3, %v831_v10  ;;  %v1068_v16 = vsel %vm7632_vm10, 3, %v835_v27  ;;  %vm7636_vm2 = vcmp.eq.s32.totalorder %v7635_v21, 7  ;;  %vm7638_vm5 = vcmp.eq.s32.totalorder %v7637_v9, 7  ;;  %v7645_v27 = vld [vmem:[#allocation38_spill] sm:$0xff]  ;;  %v7655_v9 = vld [vmem:[#allocation45_spill] sm:$0xff] }
 0xb86   : > { %v1297_v40 = vsel %vm7636_vm2, 4, %v1064_v32  ;;  %vm7640_vm9 = vcmp.eq.s32.totalorder %v7639_v34, 7  ;;  %v3498_v43 = vcvt.f32.s32 %v6794_v36  ;;  %v7647_v32 = vld [vmem:[#allocation39_spill] sm:$0xff]  ;;  %v3485_v21 = vcvt.f32.s32 %v6774_v41 }
 0xb87   : > { %v1301_v42 = vsel %vm7640_vm9, 4, %v1068_v16  ;;  %vm7648_vm10 = vcmp.eq.s32.totalorder %v7647_v32, 7  ;;  %v7651_v16 = vld [vmem:[#allocation44_spill] sm:$0xff]  ;;  %vm7656_vm9 = vcmp.eq.s32.totalorder %v7655_v9, 7  ;;  %v7657_v36 = vld [vmem:[#allocation51_spill] sm:$0xff] }
 0xb88   : > { %vm7652_vm2 = vcmp.eq.s32.totalorder %v7651_v16, 7  ;;  %v7667_v16 = vld [vmem:[#allocation59_spill] sm:$0xff]  ;;  %v3499_v9 = vshll.u32 %v3498_v43, 16 }
 0xb94   : > { %3804 = vadd.xlane.f32.xlu0 %v3802_v28  ;;  %v1066_v28 = vsel %vm7628_vm11, 3, %v833_v49  ;;  %v7641_v49 = vld [vmem:[#allocation37_spill] sm:$0xff] }
 0xb95   : > { %v1299_v61 = vsel %vm7638_vm5, 4, %v1066_v28  ;;  %vm7642_vm15 = vcmp.eq.s32.totalorder %v7641_v49, 7  ;;  %v1534_v28 = vsel %vm7648_vm10, 5, %v1301_v42  ;;  %v3497_v49 = vcvt.f32.s32 %v6853_v25  ;;  %v7659_v42 = vld [vmem:[#allocation48_spill] sm:$0xff] }
 0xb96   : > { %v1530_v57 = vsel %vm7642_vm15, 5, %v1297_v40  ;;  %v7653_v40 = vld [vmem:[#allocation46_spill] sm:$0xff]  ;;  %vm7658_vm15 = vcmp.eq.s32.totalorder %v7657_v36, 7 }
 0xb97   : > { %v1763_v11 = vsel %vm7652_vm2, 6, %v1530_v57  ;;  %vm7654_vm5 = vcmp.eq.s32.totalorder %v7653_v40, 7  ;;  %v7663_v57 = vld [vmem:[#allocation49_spill] sm:$0xff]  ;;  %vm7668_vm2 = vcmp.eq.s32.totalorder %v7667_v16, 7  ;;  %v7671_v36 = vld [vmem:[#allocation58_spill] sm:$0xff] }
 0xb98   : > { %v1996_v34 = vsel %vm7658_vm15, 7, %v1763_v11  ;;  %vm7664_vm10 = vcmp.eq.s32.totalorder %v7663_v57, 7  ;;  %v7669_v40 = vld [vmem:[#allocation57_spill] sm:$0xff]  ;;  %v7675_v57 = vld [vmem:[#allocation64_spill] sm:$0xff] }
 0xb99   : > { %v7679_v16 = vld [vmem:[#allocation65_spill] sm:$0xff] }
 0xb9d   : > { %3791 = vadd.xlane.f32.xlu1 %v3789_v1  ;;  %v1065_v1 = vsel %vm7630_vm3, 3, %v832_v20  ;;  %v7643_v20 = vld [vmem:[#allocation36_spill] sm:$0xff]  ;;  %vm7646_vm3 = vcmp.eq.s32.totalorder %v7645_v27, 7 }
 0xb9e   : > { %v1298_v58 = vsel %vm7634_vm6, 4, %v1065_v1  ;;  %vm7644_vm11 = vcmp.eq.s32.totalorder %v7643_v20, 7  ;;  %v1532_v13 = vsel %vm7646_vm3, 5, %v1299_v61  ;;  %v7649_v1 = vld [vmem:[#allocation43_spill] sm:$0xff]  ;;  %v1767_v61 = vsel %vm7656_vm9, 6, %v1534_v28 }
 0xb9f   : > { %v1531_v10 = vsel %vm7644_vm11, 5, %v1298_v58  ;;  %vm7650_vm6 = vcmp.eq.s32.totalorder %v7649_v1, 7  ;;  %v1765_v58 = vsel %vm7654_vm5, 6, %v1532_v13  ;;  %vm7660_vm11 = vcmp.eq.s32.totalorder %v7659_v42, 7  ;;  %v7665_v13 = vld [vmem:[#allocation56_spill] sm:$0xff]  ;;  %v7673_v42 = vld [vmem:[#allocation67_spill] sm:$0xff] }
 0xba0   : > { %v1764_v60 = vsel %vm7650_vm6, 6, %v1531_v10  ;;  %v7661_v10 = vld [vmem:[#allocation50_spill] sm:$0xff]  ;;  %v1998_v41 = vsel %vm7664_vm10, 7, %v1765_v58  ;;  %vm7666_vm6 = vcmp.eq.s32.totalorder %v7665_v13, 7  ;;  %vm7670_vm5 = vcmp.eq.s32.totalorder %v7669_v40, 7  ;;  %v7682_v40 = vld [vmem:[#allocation71_spill] sm:$0xff] }
 0xba1   : > { %v1997_v20 = vsel %vm7660_vm11, 7, %v1764_v60  ;;  %vm7662_vm3 = vcmp.eq.s32.totalorder %v7661_v10, 7  ;;  %v2231_v11 = vsel %vm7668_vm2, 8, %v1998_v41  ;;  %v2229_v25 = vsel %vm7670_vm5, 8, %v1996_v34  ;;  %v7677_v13 = vld [vmem:[#allocation66_spill] sm:$0xff] }
 0xba2   : > { %v2000_v27 = vsel %vm7662_vm3, 7, %v1767_v61  ;;  %v2230_v28 = vsel %vm7666_vm6, 8, %v1997_v20  ;;  %vm7672_vm9 = vcmp.eq.s32.totalorder %v7671_v36, 7  ;;  %vm7674_vm15 = vcmp.eq.s32.totalorder %v7673_v42, 7 }
 0xba3   : > { %v2233_v61 = vsel %vm7672_vm9, 8, %v2000_v27  ;;  %v3486_v58 = vshll.u32 %v3485_v21, 16  ;;  %v3511_v10 = vcvt.f32.s32 %v6776_v22  ;;  %vm7676_vm11 = vcmp.eq.s32.totalorder %v7675_v57, 7 }
 0xba4   : > { %v3481_v33 = vpop.xlane.xlu1 %3480  ;;  %v2463_v20 = vsel %vm7676_vm11, 9, %v2230_v28  ;;  %vm7678_vm3 = vcmp.eq.s32.totalorder %v7677_v13, 7  ;;  %vm7680_vm10 = vcmp.eq.s32.totalorder %v7679_v16, 7  ;;  %v7058_v34 = vadd.s32 %v3499_v9, %v3497_v49  ;;  %v7684_v28 = vld [vmem:[#allocation72_spill] sm:$0xff] }
 0xba5   : > { %v3484_v32 = vcvt.f32.s32 %v3481_v33  ;;  %v2462_v33 = vsel %vm7674_vm15, 9, %v2229_v25  ;;  %v2466_v41 = vsel %vm7678_vm3, 9, %v2233_v61  ;;  %v2464_v43 = vsel %vm7680_vm10, 9, %v2231_v11 }
 0xba6   : > { %vm7681_vm6 = vcmp.eq.s32.totalorder %v6336_v23, 7  ;;  %vm7683_vm2 = vcmp.eq.s32.totalorder %v7682_v40, 7  ;;  %vm7685_vm5 = vcmp.eq.s32.totalorder %v7684_v28, 7  ;;  %vm7686_vm9 = vcmp.eq.s32.totalorder %v6387_v59, 7 }
 0xba7   : > { %v2696_v27 = vsel %vm7681_vm6, 10, %v2463_v20  ;;  %v2695_v25 = vsel %vm7683_vm2, 10, %v2462_v33  ;;  %v7064_v21 = vadd.s32 %v3486_v58, %v3484_v32  ;;  %v2697_v61 = vsel %vm7685_vm5, 10, %v2464_v43 }
 0xba8   : > { %v6962_v2 = vpop.xlane.xlu1 %3506  ;;  %v2928_v11 = vsel %vm7686_vm9, 11, %v2695_v25  ;;  %vm7687_vm15 = vcmp.eq.s32.totalorder %v6448_v50, 7  ;;  %vm7688_vm11 = vcmp.eq.s32.totalorder %v6458_v62, 7  ;;  %v3512_v42 = vshll.u32 %v3511_v10, 16 }
 0xba9   : > { %v3510_v22 = vcvt.f32.s32 %v6962_v2  ;;  %v2929_v49 = vsel %vm7687_vm15, 11, %v2696_v27  ;;  %v2930_v32 = vsel %vm7688_vm11, 11, %v2697_v61  ;;  %v3537_v2 = vcvt.f32.s32 %v6797_v46 }
 0xbaa   : > { %vm7689_vm3 = vcmp.eq.s32.totalorder %v6558_v26, 7  ;;  %vm7690_vm10 = vcmp.eq.s32.totalorder %v6633_v52, 7  ;;  %vm7691_vm6 = vcmp.eq.s32.totalorder %v6638_v7, 7  ;;  %vm3580_vm2 = vcmp.eq.s32.totalorder %v7058_v34, 7 }
 0xbab   : > { %v3161_v58 = vsel %vm7689_vm3, 12, %v2928_v11  ;;  %v3162_v59 = vsel %vm7690_vm10, 12, %v2929_v49  ;;  %v3163_v50 = vsel %vm7691_vm6, 12, %v2930_v32  ;;  %vm3579_vm5 = vcmp.eq.s32.totalorder %v7064_v21, 7  ;;  %v7692_v32 = vld [vmem:[#allocation75_spill] sm:$0xff] }
 0xbac   : > { %v6964_v5 = vpop.xlane.xlu1 %3532  ;;  %v3394_v26 = vsel %vm3346_vm0, 13, %v3161_v58  ;;  %v3538_v20 = vshll.u32 %v3537_v2, 16  ;;  %v3395_v13 = vsel %vm3347_vm14, 13, %v3162_v59  ;;  %vm3900_vm9 = vcmask 7168  }
 0xbad   : > { %v6966_v63 = vpop.xlane.xlu0 %3715  ;;  %v3536_v62 = vcvt.f32.s32 %v6964_v5  ;;  %v3628_v5 = vsel %vm3580_vm2, 14, %v3395_v13  ;;  %vm7693_vm11 = vcmp.eq.s32.totalorder %v7692_v32, 7  ;;  %v3396_v2 = vsel %vm3348_vm1, 13, %v3163_v50 }
 0xbae   : > { %v3718_v23 = vcvt.f32.s32 %v6966_v63  ;;  %v7089_v63 = vadd.s32 %v3512_v42, %v3510_v22  ;;  %v2699_v42 = vsel %vm7693_vm11, 10, %v2466_v41  ;;  %vm7694_vm3 = vcmp.eq.s32.totalorder %v6468_v17, 7 }
 0xbaf   : > { %vm7695_vm11 = vcmp.eq.s32.totalorder %v6647_v29, 7 }
 0xbb0   : > { %v6968_v24 = vpop.xlane.xlu1 %3558  ;;  %v3719_v52 = vshll.u32 %v3718_v23, 16  ;;  %vm3581_vm0 = vcmp.eq.s32.totalorder %v7089_v63, 7 }
 0xbb1   : > { %v6982_v15 = vpop.xlane.xlu0 %3741  ;;  %v3629_v58 = vsel %vm3581_vm0, 14, %v3396_v2  ;;  %v7698_v2 = vld [vmem:[#allocation19_spill] sm:$0xff] }
 0xbb2   : > { %v3744_v46 = vcvt.f32.s32 %v6982_v15  ;;  %v3627_v15 = vsel %vm3579_vm5, 14, %v3394_v26 }
 0xbb4   : > { %v3729_v44 = vpop.xlane.xlu1 %3728  ;;  %v3745_v27 = vshll.u32 %v3744_v46, 16 }
 0xbb5   : > { %v7015_v51 = vpop.xlane.xlu0 %3754  ;;  %v3731_v33 = vcvt.f32.s32 %v3729_v44 }
 0xbb6   : > { %v3757_v10 = vcvt.f32.s32 %v7015_v51  ;;  %v7105_v51 = vadd.s32 %v3538_v20, %v3536_v62 }
 0xbb7   : > { %v3732_v16 = vshll.u32 %v3731_v33, 16 }
 0xbb8   : > { %v7037_v1 = vpop.xlane.xlu1 %3767  ;;  %v3758_v25 = vshll.u32 %v3757_v10, 16  ;;  %vm3583_vm1 = vcmp.eq.s32.totalorder %v7105_v51, 7 }
 0xbb9   : > { %v7045_v60 = vpop.xlane.xlu0 %3780  ;;  %v3770_v22 = vcvt.f32.s32 %v7037_v1 }
 0xbba   : > { %v3783_v11 = vcvt.f32.s32 %v7045_v60  ;;  %v2932_v60 = vsel %vm7694_vm3, 11, %v2699_v42 }
 0xbbb   : > { %v3771_v59 = vshll.u32 %v3770_v22, 16  ;;  %v3165_v26 = vsel %vm7695_vm11, 12, %v2932_v60  ;;  %v7700_v60 = vld [vmem:[#allocation11_spill] sm:$0xff] }
 0xbbc   : > { %v7067_v36 = vpop.xlane.xlu1 %3793  ;;  %v3784_v46 = vshll.u32 %v3783_v11, 16 }
 0xbbd   : > { %v7076_v9 = vpop.xlane.xlu0 %3806 }
 0xbbe   : > { %v3809_v11 = vcvt.f32.s32 %v7076_v9 }
 0xbc0   : > { %v3714_v44 = vpop.xlane.xlu1 %3713  ;;  %v3810_v32 = vshll.u32 %v3809_v11, 16 }
 0xbc1   : > { %v3717_v7 = vcvt.f32.s32 %v3714_v44  ;;  %v3727_v57 = vpop.xlane.xlu0 %3726 }
 0xbc2   : > { %v3730_v43 = vcvt.f32.s32 %v3727_v57 }
 0xbc3   : > { %v7102_v39 = vadd.s32 %v3719_v52, %v3717_v7  ;;  %v3398_v7 = vsel %vm3350_vm13, 13, %v3165_v26 }
 0xbc4   : > { %v7113_v12 = vadd.s32 %v3732_v16, %v3730_v43  ;;  %v3740_v40 = vpop.xlane.xlu1 %3739  ;;  %v3631_v29 = vsel %vm3583_vm1, 14, %v3398_v7  ;;  %v3563_v43 = vcvt.f32.s32 %v6799_v35 }
 0xbc5   : > { %vm3812_vm14 = vcmp.eq.s32.totalorder %v7102_v39, 7  ;;  %v3743_v28 = vcvt.f32.s32 %v3740_v40  ;;  %v3753_v61 = vpop.xlane.xlu0 %3752 }
 0xbc6   : > { %v3860_v49 = vsel %vm3812_vm14, 15, %v3627_v15  ;;  %vm3813_vm15 = vcmp.eq.s32.totalorder %v7113_v12, 7  ;;  %v3756_v23 = vcvt.f32.s32 %v3753_v61  ;;  %v3564_v40 = vshll.u32 %v3563_v43, 16 }
 0xbc7   : > { %3909 = vst.msk [vmem:[%s7111_s19] sm:$0xff] %vm3900_vm9, %v3860_v49  ;;  %v3861_v1 = vsel %vm3813_vm15, 15, %v3628_v5  ;;  %v7129_v33 = vadd.s32 %v3745_v27, %v3743_v28  ;;  %v3562_v5 = vcvt.f32.s32 %v6968_v24 }
 0xbc8   : > { %3910 = vst.msk [vmem:[%s7111_s19 + $0x8] sm:$0xff] %vm3900_vm9, %v3861_v1  ;;  %v7137_v41 = vadd.s32 %v3758_v25, %v3756_v23  ;;  %v3766_v0 = vpop.xlane.xlu1 %3765 }
 0xbc9   : > { %vm3814_vm10 = vcmp.eq.s32.totalorder %v7129_v33, 7  ;;  %v3769_v50 = vcvt.f32.s32 %v3766_v0  ;;  %v3779_v62 = vpop.xlane.xlu0 %3778  ;;  %v7702_v0 = vld [vmem:[#allocation31_spill] sm:$0xff] }
 0xbca   : > { %v3862_v17 = vsel %vm3814_vm10, 15, %v3629_v58  ;;  %vm3815_vm6 = vcmp.eq.s32.totalorder %v7137_v41, 7  ;;  %v3782_v44 = vcvt.f32.s32 %v3779_v62  ;;  %v7706_v62 = vld [vmem:[#allocation47_spill] sm:$0xff] }
 0xbcb   : > { %3911 = vst.msk [vmem:[%s7111_s19 + $0x10] sm:$0xff] %vm3900_vm9, %v3862_v17  ;;  %v3863_v52 = vsel %vm3815_vm6, 15, %v6925_v48  ;;  %v7151_v10 = vadd.s32 %v3771_v59, %v3769_v50  ;;  %v7704_v50 = vld [vmem:[#allocation40_spill] sm:$0xff] }
 0xbcc   : > { %3912 = vst.msk [vmem:[%s7111_s19 + $0x18] sm:$0xff] %vm3900_vm9, %v3863_v52  ;;  %v7157_v57 = vadd.s32 %v3784_v46, %v3782_v44  ;;  %v3596_v20 = vpop.permute.xlu1 %3595  ;;  %v7708_v44 = vld [vmem:[#allocation52_spill] sm:$0xff] }
 0xbcd   : > { %vm3816_vm3 = vcmp.eq.s32.totalorder %v7151_v10, 7  ;;  %v3619_v13 = vsel %vm3579_vm5, %v6788_v54, %v3596_v20  ;;  %vm7705_vm5 = vcmp.eq.s32.totalorder %v7704_v50, 7  ;;  %v7710_v52 = vld [vmem:[#allocation60_spill] sm:$0xff] }
 0xbce   : > { %v3864_v48 = vsel %vm3816_vm3, 15, %v3631_v29  ;;  %vm3817_vm11 = vcmp.eq.s32.totalorder %v7157_v57, 7  ;;  %3828 = vrot.lane.b32.xlu1 %v3619_v13, %s4130_s16  ;;  %v7712_v20 = vld [vmem:[#allocation68_spill] sm:$0xff] }
 0xbcf   : > { %3913 = vst.msk [vmem:[%s7111_s19 + $0x20] sm:$0xff] %vm3900_vm9, %v3864_v48  ;;  %v3865_v53 = vsel %vm3817_vm11, 15, %v6945_v14  ;;  %v3565_v14 = vadd.s32 %v3564_v40, %v3562_v5  ;;  %v7714_v48 = vld [vmem:[#allocation76_spill] sm:$0xff] }
 0xbd0   : > { %3914 = vst.msk [vmem:[%s7111_s19 + $0x28] sm:$0xff] %vm3900_vm9, %v3865_v53 }
 0xbd1   : > { %vm3585_vm13 = vcmp.eq.s32.totalorder %v3565_v14, 7 }
 0xbdb   : > { %v3598_v16 = vpop.permute.xlu0 %3597 }
 0xbdc   : > { %v3620_v21 = vsel %vm3580_vm2, %v6808_v4, %v3598_v16  ;;  %vm7701_vm2 = vcmp.eq.s32.totalorder %v7700_v60, 7 }
 0xbdd   : > { %3830 = vrot.lane.b32.xlu0 %v3620_v21, %s4130_s16  ;;  %v7717_v21 = vld [vmem:[#allocation77_spill] sm:$0xff] }
 0xbdf   : > { %v3600_v15 = vpop.permute.xlu1 %3599 }
 0xbe0   : > { %v3621_v27 = vsel %vm3581_vm0, %v6828_v55, %v3600_v15 }
 0xbe1   : > { %3832 = vrot.lane.b32.xlu1 %v3621_v27, %s4130_s16 }
 0xbe3   : > { %v3602_v25 = vpop.permute.xlu1 %3601  ;;  %v3604_v22 = vpop.permute.xlu0 %3603 }
 0xbe4   : > { %v3622_v34 = vsel %vm3582_vm7, %v6735_v47, %v3602_v25  ;;  %v3623_v35 = vsel %vm3583_vm1, %v6862_v37, %v3604_v22  ;;  %vm7697_vm7 = vcmp.eq.s32.totalorder %v7696_v30, 7  ;;  %vm7707_vm1 = vcmp.eq.s32.totalorder %v7706_v62, 7 }
 0xbe5   : > { %3834 = vrot.lane.b32.xlu1 %v3622_v34, %s4130_s16  ;;  %3836 = vrot.lane.b32.xlu0 %v3623_v35, %s4130_s16  ;;  %v604_v23 = vsel %vm7697_vm7, 1, %v7466_v8  ;;  %v3796_v8 = vcvt.f32.s32 %v7067_v36  ;;  %vm7709_vm7 = vcmp.eq.s32.totalorder %v7708_v44, 7 }
 0xbe7   : > { %v3606_v24 = vpop.permute.xlu1 %3605  ;;  %v3608_v63 = vpop.permute.xlu0 %3607  ;;  %v3797_v36 = vshll.u32 %v3796_v8, 16 }
 0xbe8   : > { %v3624_v28 = vsel %vm3584_vm8, %v6748_v18, %v3606_v24  ;;  %v3625_v61 = vsel %vm3585_vm13, %v6694_v6, %v3608_v63  ;;  %vm7699_vm8 = vcmp.eq.s32.totalorder %v7698_v2, 7 }
 0xbe9   : > { %3838 = vrot.lane.b32.xlu1 %v3624_v28, %s4130_s16  ;;  %3840 = vrot.lane.b32.xlu0 %v3625_v61, %s4130_s16  ;;  %v837_v1 = vsel %vm7699_vm8, 2, %v604_v23  ;;  %vm7711_vm8 = vcmp.eq.s32.totalorder %v7710_v52, 7 }
 0xbea   : > { %v1070_v58 = vsel %vm7701_vm2, 3, %v837_v1  ;;  %vm7713_vm2 = vcmp.eq.s32.totalorder %v7712_v20, 7 }
 0xbeb   : > { %v3610_v3 = vpop.permute.xlu1 %3609 }
 0xbec   : > { %v3626_v51 = vsel %vm3586_vm12, %v6760_v56, %v3610_v3  ;;  %vm7703_vm12 = vcmp.eq.s32.totalorder %v7702_v0, 7 }
 0xbed   : > { %3842 = vrot.lane.b32.xlu1 %v3626_v51, %s4130_s16  ;;  %v1303_v59 = vsel %vm7703_vm12, 4, %v1070_v58  ;;  %vm7715_vm12 = vcmp.eq.s32.totalorder %v7714_v48, 7 }
 0xbee   : > { %v1536_v9 = vsel %vm7705_vm5, 5, %v1303_v59  ;;  %vm7716_vm5 = vcmp.eq.s32.totalorder %v6478_v19, 7 }
 0xbef   : > { %v1769_v46 = vsel %vm7707_vm1, 6, %v1536_v9  ;;  %vm7718_vm1 = vcmp.eq.s32.totalorder %v7717_v21, 7 }
 0xbf0   : > { %v2002_v26 = vsel %vm7709_vm7, 7, %v1769_v46 }
 0xbf1   : > { %v2235_v7 = vsel %vm7711_vm8, 8, %v2002_v26 }
 0xbf2   : > { %v2468_v29 = vsel %vm7713_vm2, 9, %v2235_v7 }
 0xbf3   : > { %v2701_v53 = vsel %vm7715_vm12, 10, %v2468_v29 }
 0xc1d   : > { %v3805_v49 = vpop.xlane.xlu0 %3804 }
 0xc1e   : > { %v3808_v42 = vcvt.f32.s32 %v3805_v49 }
 0xc20   : > { %v3811_v45 = vadd.s32 %v3810_v32, %v3808_v42 }
 0xc22   : > { %vm3819_vm0 = vcmp.eq.s32.totalorder %v3811_v45, 7 }
 0xc23   : > { %v3867_v17 = vsel %vm3819_vm0, 15, %v6958_v31  ;;  %v2934_v31 = vsel %vm7716_vm5, 11, %v2701_v53 }
 0xc24   : > { %3916 = vst.msk [vmem:[%s7111_s19 + $0x38] sm:$0xff] %vm3900_vm9, %v3867_v17  ;;  %v3167_v43 = vsel %vm7718_vm1, 12, %v2934_v31 }
 0xc25   : > { %v3400_v15 = vsel %vm3352_vm4, 13, %v3167_v43 }
 0xc26   : > { %v3792_v13 = vpop.xlane.xlu1 %3791  ;;  %v3633_v27 = vsel %vm3585_vm13, 14, %v3400_v15 }
 0xc27   : > { %v3795_v16 = vcvt.f32.s32 %v3792_v13 }
 0xc29   : > { %v3798_v5 = vadd.s32 %v3797_v36, %v3795_v16 }
 0xc2b   : > { %vm3818_vm7 = vcmp.eq.s32.totalorder %v3798_v5, 7 }
 0xc2c   : > { %v3866_v40 = vsel %vm3818_vm7, 15, %v3633_v27 }
 0xc2d   : > { %3915 = vst.msk [vmem:[%s7111_s19 + $0x30] sm:$0xff] %vm3900_vm9, %v3866_v40 }
 0xc40   : > { %v3829_v25 = vpop.permute.xlu1 %3828 }
 0xc41   : > { %v3852_v19 = vsel %vm3812_vm14, %v6788_v54, %v3829_v25 }
 0xc42   : > { %3876 = vrot.lane.b32.xlu0 %v3852_v19, %s4143_s20 }
 0xc4f   : > { %v3831_v22 = vpop.permute.xlu0 %3830 }
 0xc50   : > { %v3853_v38 = vsel %vm3813_vm15, %v6808_v4, %v3831_v22 }
 0xc51   : > { %3878 = vrot.lane.b32.xlu1 %v3853_v38, %s4143_s20 }
 0xc53   : > { %v3833_v14 = vpop.permute.xlu1 %3832 }
 0xc54   : > { %v3854_v34 = vsel %vm3814_vm10, %v6828_v55, %v3833_v14 }
 0xc55   : > { %3880 = vrot.lane.b32.xlu0 %v3854_v34, %s4143_s20 }
 0xc57   : > { %v3835_v35 = vpop.permute.xlu1 %3834  ;;  %v3837_v24 = vpop.permute.xlu0 %3836 }
 0xc58   : > { %v3855_v54 = vsel %vm3815_vm6, %v6735_v47, %v3835_v35  ;;  %v3856_v39 = vsel %vm3816_vm3, %v6862_v37, %v3837_v24 }
 0xc59   : > { %3882 = vrot.lane.b32.xlu1 %v3855_v54, %s4143_s20  ;;  %3884 = vrot.lane.b32.xlu0 %v3856_v39, %s4143_s20 }
 0xc5b   : > { %v3839_v4 = vpop.permute.xlu1 %3838  ;;  %v3841_v12 = vpop.permute.xlu0 %3840 }
 0xc5c   : > { %v3857_v55 = vsel %vm3817_vm11, %v6748_v18, %v3839_v4  ;;  %v3858_v33 = vsel %vm3818_vm7, %v6694_v6, %v3841_v12 }
 0xc5d   : > { %3886 = vrot.lane.b32.xlu1 %v3857_v55, %s4143_s20  ;;  %3888 = vrot.lane.b32.xlu0 %v3858_v33, %s4143_s20 }
 0xc5f   : > { %v3843_v63 = vpop.permute.xlu1 %3842 }
 0xc60   : > { %v3859_v47 = vsel %vm3819_vm0, %v6760_v56, %v3843_v63 }
 0xc61   : > { %3890 = vrot.lane.b32.xlu1 %v3859_v47, %s4143_s20 }
 0xcb4   : > { %v3877_v37 = vpop.permute.xlu0 %3876 }
 0xcb5   : > { %3901 = vst.msk [vmem:[%s153_s23] sm:$0xff] %vm3900_vm9, %v3877_v37 }
 0xcc3   : > { %v3879_v41 = vpop.permute.xlu1 %3878 }
 0xcc4   : > { %3902 = vst.msk [vmem:[%s153_s23 + $0x8] sm:$0xff] %vm3900_vm9, %v3879_v41 }
 0xcc7   : > { %v3881_v18 = vpop.permute.xlu0 %3880 }
 0xcc8   : > { %3903 = vst.msk [vmem:[%s153_s23 + $0x10] sm:$0xff] %vm3900_vm9, %v3881_v18 }
 0xccb   : > { %v3883_v6 = vpop.permute.xlu1 %3882  ;;  %v3885_v10 = vpop.permute.xlu0 %3884 }
 0xccc   : > { %3904 = vst.msk [vmem:[%s153_s23 + $0x18] sm:$0xff] %vm3900_vm9, %v3883_v6  ;;  %3905 = vst.msk [vmem:[%s153_s23 + $0x20] sm:$0xff] %vm3900_vm9, %v3885_v10 }
 0xccf   : > { %v3887_v56 = vpop.permute.xlu1 %3886  ;;  %v3889_v57 = vpop.permute.xlu0 %3888 }
 0xcd0   : > { %3906 = vst.msk [vmem:[%s153_s23 + $0x28] sm:$0xff] %vm3900_vm9, %v3887_v56  ;;  %3907 = vst.msk [vmem:[%s153_s23 + $0x30] sm:$0xff] %vm3900_vm9, %v3889_v57 }
 0xcd3   : > { %v3891_v28 = vpop.permute.xlu1 %3890 }
 0xcd4   : > { %3908 = vst.msk [vmem:[%s153_s23 + $0x38] sm:$0xff] %vm3900_vm9, %v3891_v28 }
 0xcd5 PF: > { %s13_s9 = sadd.s32 1, %s4124_s9  }
 0xcd6   : > { %p10_p4 = scmp.ge.s32.totalorder %s13_s9, 4  }
 0xcd8   :  { %12 = sbr.rel (!%p10_p4) target bundleno = 1 (0x1), region = 66 }

</bundles_post_ra>
